<compile_context>
chip_gen: v7x
topology: tpu7x:2x2x1
jax: 0.10.0
libtpu: 0.0.40
codegen_flags: <defaults>
</compile_context>

<pallas_src>
import numpy as np
import jax
import jax.numpy as jnp
from jax.experimental import pallas as pl
from jax.experimental.pallas import tpu as pltpu

D_LATENT = 50
L_LAYERS = 3


# ----------------------------------------------------------------------------- parameters

def vae_dims(d=D_LATENT, l=L_LAYERS):
    """Replicates build_VAE's layer-size arithmetic."""
    alpha = 3.0 / l
    enc = [784]
    for lyr in list(range(l))[::-1]:
        lyr += 1
        dim_b = int(np.ceil(2 ** (alpha * lyr)))
        enc.append(d * dim_b)                       # [784, 400, 200, 100]
    dec = [d] + list(reversed(enc))                 # [50, 100, 200, 400, 784]
    return enc, dec


def init_linear(key, fan_in, fan_out):
    """Deterministic PyTorch-style uniform(-1/sqrt(fan_in), 1/sqrt(fan_in)) init, W as (in, out)."""
    kw, kb = jax.random.split(key)
    bound = 1.0 / np.sqrt(fan_in)
    w = jax.random.uniform(kw, (fan_in, fan_out), jnp.float32, -bound, bound)
    b = jax.random.uniform(kb, (1, fan_out), jnp.float32, -bound, bound)
    return w, b


def build_params(key):
    """9 (W, b) pairs in f32 (unpadded) — the 'master' params, matching the torch module."""
    enc, dec = vae_dims()
    params = []
    for fi, fo in zip(enc[:-1], enc[1:]):           # 784->400, 400->200, 200->100
        key, sub = jax.random.split(key)
        params.append(init_linear(sub, fi, fo))
    for _ in range(2):                              # encoder_mean, encoder_lv : 100 -> 50
        key, sub = jax.random.split(key)
        params.append(init_linear(sub, enc[-1], D_LATENT))
    for fi, fo in zip(dec[:-1], dec[1:]):           # 50->100, 100->200, 200->400, 400->784
        key, sub = jax.random.split(key)
        params.append(init_linear(sub, fi, fo))
    return params


def _pad_wb(w, b, fi_p, fo_p):
    """Zero-pad a linear layer to (fi_p, fo_p); weight -> bf16, bias stays f32."""
    fi, fo = w.shape
    wp = jnp.zeros((fi_p, fo_p), jnp.float32).at[:fi, :fo].set(w)
    bp = jnp.zeros((1, fo_p), jnp.float32).at[:, :fo].set(b[0])
    return wp.astype(jnp.bfloat16), bp


def pad_params(params):
    """Lane-align (out dims to multiples of 128), fuse the mu/logvar heads, cast weights to bf16.

    The first layer keeps its 784-row K dim unpadded (the input block uses the full array dim);
    the final decoder layer's 784 outputs are padded to 896 so the recon store is lane-dense.
    """
    e0, e1, e2, m, v, d0, d1, d2, d3 = params
    out = [
        _pad_wb(*e0, 784, 512),     # 784 -> 400
        _pad_wb(*e1, 512, 256),     # 400 -> 200
        _pad_wb(*e2, 256, 128),     # 200 -> 100
    ]
    # fused heads: (128, 256); mu occupies lanes [0, 50), logvar occupies lanes [128, 178)
    hw = jnp.zeros((128, 256), jnp.float32)
    hw = hw.at[:100, :50].set(m[0]).at[:100, 128:178].set(v[0])
    hb = jnp.zeros((1, 256), jnp.float32)
    hb = hb.at[:, :50].set(m[1][0]).at[:, 128:178].set(v[1][0])
    out.append((hw.astype(jnp.bfloat16), hb))
    out += [
        _pad_wb(*d0, 128, 128),     # 50  -> 100
        _pad_wb(*d1, 128, 256),     # 100 -> 200
        _pad_wb(*d2, 256, 512),     # 200 -> 400
        _pad_wb(*d3, 512, 896),     # 400 -> 784 (output lane-padded to 896)
    ]
    return out  # 8 (W, b) pairs


# ----------------------------------------------------------------------------- kernel

def vae_kernel(x_ref, eps_ref,
               e0w, e0b, e1w, e1b, e2w, e2b,
               hw, hb,
               d0w, d0b, d1w, d1b, d2w, d2b, d3w, d3b,
               recon_ref, mulv_ref):
    def linear(h, w_ref, b_ref):
        # bf16 x bf16 on the MXU, f32 accumulation; f32 bias add on the VPU.
        return jnp.dot(h.astype(jnp.bfloat16), w_ref[...],
                       preferred_element_type=jnp.float32) + b_ref[...]

    # encoder (padded lanes carry exact zeros through ReLU)
    h = jnp.maximum(linear(x_ref[...], e0w, e0b), 0.0)
    h = jnp.maximum(linear(h, e1w, e1b), 0.0)
    h = jnp.maximum(linear(h, e2w, e2b), 0.0)

    # fused latent heads: one lane-aligned (128 -> 256) matmul, one lane-dense output
    ml = linear(h, hw, hb)                 # (tile_b, 256) = [ mu | logvar ] (padded)
    mu = ml[:, :128]                       # vreg-aligned split: free
    lv = ml[:, 128:]

    # reparameterize in f32; padded lanes: 0 + 0 * exp(0) = 0, so z stays clean
    z = mu + eps_ref[...] * jnp.exp(0.5 * lv)

    # decoder
    g = jnp.maximum(linear(z, d0w, d0b), 0.0)
    g = jnp.maximum(linear(g, d1w, d1b), 0.0)
    g = jnp.maximum(linear(g, d2w, d2b), 0.0)
    # sigmoid in f32 (v5e has no bf16 EUP); store bf16 to halve the dominant HBM output stream
    recon_ref[...] = jax.nn.sigmoid(linear(g, d3w, d3b)).astype(recon_ref.dtype)
    mulv_ref[...] = ml


# ----------------------------------------------------------------------------- wrapper

def _choose_tile_b(B):
    """Pick a batch tile: big enough to amortize per-step overhead, >=2 grid steps for
    v7x megacore when B >= 256, and limited batch-remainder (garbage padded rows) waste."""
    if B < 128:
        return max(8, ((B + 7) // 8) * 8)          # single small tile, <= 7 pad rows
    for t in (512, 256, 128):
        n = -(-B // t)                              # grid steps
        waste = n * t - B
        if 2 * waste < t and (B < 256 or n >= 2):
            return t
    return 128


def vae_forward_padded(x_img, eps, padded_params, *, tile_b=None):
    """Fused VAE forward.  Returns lane-padded outputs:
         recon_p : (B_pad, 896) bf16   — valid image in [:B, :784]
         mulv    : (B_pad, 256) f32    — mu in [:B, :50], logvar in [:B, 128:178]
    Rows [B:B_pad] are padding garbage; downstream consumers (loss) should mask / slice there
    rather than forcing a wrapper-side un-pad copy.
    """
    B = x_img.shape[0]
    if tile_b is None:
        tile_b = _choose_tile_b(B)
    B_pad = ((B + tile_b - 1) // tile_b) * tile_b

    # x stays at 784 lanes (no 784->896 pad pass); bf16 halves input DMA and matches MXU dtype
    x = x_img.reshape(B, 784).astype(jnp.bfloat16)             # == x.view(-1, 784)
    if B_pad != B:
        x = jnp.zeros((B_pad, 784), jnp.bfloat16).at[:B].set(x)
    # eps lane-padded to 128 so it lines up with the mu vreg; bf16 (tiny stream anyway)
    eps_p = jnp.zeros((B_pad, 128), jnp.bfloat16).at[:B, :D_LATENT].set(eps.astype(jnp.bfloat16))

    flat_args = [x, eps_p]
    in_specs = [pl.BlockSpec((tile_b, 784), lambda i: (i, 0)),
                pl.BlockSpec((tile_b, 128), lambda i: (i, 0))]
    for w, b in padded_params:
        flat_args += [w, b]
        # constant index_map -> weights/biases are DMA'd once and stay resident in VMEM
        in_specs += [pl.BlockSpec(w.shape, lambda i: (0, 0)),
                     pl.BlockSpec(b.shape, lambda i: (0, 0))]

    out_shape = (
        jax.ShapeDtypeStruct((B_pad, 896), jnp.bfloat16),   # recon (padded, bf16)
        jax.ShapeDtypeStruct((B_pad, 256), jnp.float32),    # fused [mu | logvar] (padded)
    )
    out_specs = (
        pl.BlockSpec((tile_b, 896), lambda i: (i, 0)),
        pl.BlockSpec((tile_b, 256), lambda i: (i, 0)),
    )

    recon_p, mulv = pl.pallas_call(
        vae_kernel,
        grid=(B_pad // tile_b,),
        out_shape=out_shape,
        in_specs=in_specs,
        out_specs=out_specs,
        compiler_params=pltpu.CompilerParams(
            dimension_semantics=("parallel",),          # megacore sharding on v7x
            vmem_limit_bytes=32 * 1024 * 1024),         # fit 512-row tiles on v5e too
    )(*flat_args)
    return recon_p, mulv


def vae_forward(x_img, eps, padded_params, *, tile_b=None):
    """Module-equivalent API: (recon (B,784), mu (B,d), logvar (B,d)).
    NOTE: the final slices are extra XLA copy passes; throughput callers should consume
    vae_forward_padded's outputs directly and fuse the slice/mask into the loss jit."""
    B = x_img.shape[0]
    recon_p, mulv = vae_forward_padded(x_img, eps, padded_params, tile_b=tile_b)
    return recon_p[:B, :784], mulv[:B, :D_LATENT], mulv[:B, 128:128 + D_LATENT]


# ----------------------------------------------------------------------------- reference

def vae_forward_ref(x_img, eps, params):
    """Pure-JAX reference mirroring the PyTorch forward (with the same bf16 weight/act/eps quant)."""
    B = x_img.shape[0]

    def lin(h, w, b):
        return jnp.dot(h.astype(jnp.bfloat16), w.astype(jnp.bfloat16),
                       preferred_element_type=jnp.float32) + b

    h = x_img.reshape(B, 784)
    e0, e1, e2, m, v, d0, d1, d2, d3 = params
    for w, b in (e0, e1, e2):
        h = jnp.maximum(lin(h, w, b), 0.0)
    mu = lin(h, *m)
    lv = lin(h, *v)
    z = mu + eps.astype(jnp.bfloat16) * jnp.exp(0.5 * lv)
    g = z
    for w, b in (d0, d1, d2):
        g = jnp.maximum(lin(g, w, b), 0.0)
    recon = jax.nn.sigmoid(lin(g, *d3))
    return recon, mu, lv


# ----------------------------------------------------------------------------- main

if __name__ == "__main__":
    key = jax.random.PRNGKey(0)
    k_params, k_x, k_eps = jax.random.split(key, 3)

    B = 8
    x_img = jax.random.uniform(k_x, (B, 1, 28, 28), jnp.float32)     # NCHW images
    eps = jax.random.normal(k_eps, (B, D_LATENT), jnp.float32)       # reparam noise (explicit)

    params = build_params(k_params)        # f32 master params (torch-equivalent)
    padded = pad_params(params)            # lane-aligned bf16 kernel params

    recon, mu, logvar = vae_forward(x_img, eps, padded)
    recon, mu, logvar = jax.block_until_ready((recon, mu, logvar))

    r_ref, mu_ref, lv_ref = vae_forward_ref(x_img, eps, params)
    assert recon.shape == (B, 784) and mu.shape == (B, D_LATENT) and logvar.shape == (B, D_LATENT)
    np.testing.assert_allclose(np.asarray(recon.astype(jnp.float32)), np.asarray(r_ref),
                               rtol=1e-2, atol=1e-2)
    np.testing.assert_allclose(np.asarray(mu), np.asarray(mu_ref), rtol=1e-2, atol=1e-2)
    np.testing.assert_allclose(np.asarray(logvar), np.asarray(lv_ref), rtol=1e-2, atol=1e-2)

    print("KERNEL_OK")
</pallas_src>

<mosaic_0001>
module attributes {stable_mosaic.version = 11 : i64} {
  func.func @vae_kernel(%arg0: i32, %arg1: memref<8x784xbf16, #tpu.memory_space<vmem>>, %arg2: memref<8x128xbf16, #tpu.memory_space<vmem>>, %arg3: memref<784x512xbf16, #tpu.memory_space<vmem>>, %arg4: memref<1x512xf32, #tpu.memory_space<vmem>>, %arg5: memref<512x256xbf16, #tpu.memory_space<vmem>>, %arg6: memref<1x256xf32, #tpu.memory_space<vmem>>, %arg7: memref<256x128xbf16, #tpu.memory_space<vmem>>, %arg8: memref<1x128xf32, #tpu.memory_space<vmem>>, %arg9: memref<128x256xbf16, #tpu.memory_space<vmem>>, %arg10: memref<1x256xf32, #tpu.memory_space<vmem>>, %arg11: memref<128x128xbf16, #tpu.memory_space<vmem>>, %arg12: memref<1x128xf32, #tpu.memory_space<vmem>>, %arg13: memref<128x256xbf16, #tpu.memory_space<vmem>>, %arg14: memref<1x256xf32, #tpu.memory_space<vmem>>, %arg15: memref<256x512xbf16, #tpu.memory_space<vmem>>, %arg16: memref<1x512xf32, #tpu.memory_space<vmem>>, %arg17: memref<512x896xbf16, #tpu.memory_space<vmem>>, %arg18: memref<1x896xf32, #tpu.memory_space<vmem>>, %arg19: memref<8x896xbf16, #tpu.memory_space<vmem>>, %arg20: memref<8x256xf32, #tpu.memory_space<vmem>>) attributes {dimension_semantics = [#tpu.dimension_semantics<parallel>], iteration_bounds = array<i64: 1>, scalar_prefetch = 0 : i64, scratch_operands = 0 : i64, tpu.core_type = #tpu.core_type<tc>, window_params = [{transform_indices = @transform_0, window_bounds = array<i64: 8, 784>}, {transform_indices = @transform_1, window_bounds = array<i64: 8, 128>}, {pipeline_mode = #tpu.pipeline_mode<synchronous>, transform_indices = @transform_2, window_bounds = array<i64: 784, 512>}, {pipeline_mode = #tpu.pipeline_mode<synchronous>, transform_indices = @transform_3, window_bounds = array<i64: 1, 512>}, {pipeline_mode = #tpu.pipeline_mode<synchronous>, transform_indices = @transform_4, window_bounds = array<i64: 512, 256>}, {pipeline_mode = #tpu.pipeline_mode<synchronous>, transform_indices = @transform_5, window_bounds = array<i64: 1, 256>}, {pipeline_mode = #tpu.pipeline_mode<synchronous>, transform_indices = @transform_6, window_bounds = array<i64: 256, 128>}, {pipeline_mode = #tpu.pipeline_mode<synchronous>, transform_indices = @transform_7, window_bounds = array<i64: 1, 128>}, {pipeline_mode = #tpu.pipeline_mode<synchronous>, transform_indices = @transform_8, window_bounds = array<i64: 128, 256>}, {pipeline_mode = #tpu.pipeline_mode<synchronous>, transform_indices = @transform_9, window_bounds = array<i64: 1, 256>}, {pipeline_mode = #tpu.pipeline_mode<synchronous>, transform_indices = @transform_10, window_bounds = array<i64: 128, 128>}, {pipeline_mode = #tpu.pipeline_mode<synchronous>, transform_indices = @transform_11, window_bounds = array<i64: 1, 128>}, {pipeline_mode = #tpu.pipeline_mode<synchronous>, transform_indices = @transform_12, window_bounds = array<i64: 128, 256>}, {pipeline_mode = #tpu.pipeline_mode<synchronous>, transform_indices = @transform_13, window_bounds = array<i64: 1, 256>}, {pipeline_mode = #tpu.pipeline_mode<synchronous>, transform_indices = @transform_14, window_bounds = array<i64: 256, 512>}, {pipeline_mode = #tpu.pipeline_mode<synchronous>, transform_indices = @transform_15, window_bounds = array<i64: 1, 512>}, {pipeline_mode = #tpu.pipeline_mode<synchronous>, transform_indices = @transform_16, window_bounds = array<i64: 512, 896>}, {pipeline_mode = #tpu.pipeline_mode<synchronous>, transform_indices = @transform_17, window_bounds = array<i64: 1, 896>}, {transform_indices = @transform_18, window_bounds = array<i64: 8, 896>}, {transform_indices = @transform_19, window_bounds = array<i64: 8, 256>}]} {
    %c0 = arith.constant 0 : index
    %c0_0 = arith.constant 0 : index
    %0 = vector.load %arg1[%c0, %c0_0] : memref<8x784xbf16, #tpu.memory_space<vmem>>, vector<8x784xbf16>
    %c0_1 = arith.constant 0 : index
    %c0_2 = arith.constant 0 : index
    %1 = vector.load %arg3[%c0_1, %c0_2] : memref<784x512xbf16, #tpu.memory_space<vmem>>, vector<784x512xbf16>
    %cst = arith.constant dense<0.000000e+00> : vector<8x512xf32>
    %2 = tpu.matmul %0, %1, %cst {dimension_numbers = #tpu.dot_dimension_numbers<[1], [0], [0], [1], [0, 0, 1, 1], [], []>} : vector<8x784xbf16>, vector<784x512xbf16>, vector<8x512xf32> -> vector<8x512xf32>
    %c0_3 = arith.constant 0 : index
    %c0_4 = arith.constant 0 : index
    %3 = vector.load %arg4[%c0_3, %c0_4] : memref<1x512xf32, #tpu.memory_space<vmem>>, vector<1x512xf32>
    %4 = vector.broadcast %3 : vector<1x512xf32> to vector<8x512xf32>
    %5 = arith.addf %2, %4 : vector<8x512xf32>
    %cst_5 = arith.constant 0.000000e+00 : f32
    %6 = vector.broadcast %cst_5 : f32 to vector<8x512xf32>
    %7 = arith.maximumf %5, %6 : vector<8x512xf32>
    %8 = arith.truncf %7 : vector<8x512xf32> to vector<8x512xbf16>
    %c0_6 = arith.constant 0 : index
    %c0_7 = arith.constant 0 : index
    %9 = vector.load %arg5[%c0_6, %c0_7] : memref<512x256xbf16, #tpu.memory_space<vmem>>, vector<512x256xbf16>
    %cst_8 = arith.constant dense<0.000000e+00> : vector<8x256xf32>
    %10 = tpu.matmul %8, %9, %cst_8 {dimension_numbers = #tpu.dot_dimension_numbers<[1], [0], [0], [1], [0, 0, 1, 1], [], []>} : vector<8x512xbf16>, vector<512x256xbf16>, vector<8x256xf32> -> vector<8x256xf32>
    %c0_9 = arith.constant 0 : index
    %c0_10 = arith.constant 0 : index
    %11 = vector.load %arg6[%c0_9, %c0_10] : memref<1x256xf32, #tpu.memory_space<vmem>>, vector<1x256xf32>
    %12 = vector.broadcast %11 : vector<1x256xf32> to vector<8x256xf32>
    %13 = arith.addf %10, %12 : vector<8x256xf32>
    %cst_11 = arith.constant 0.000000e+00 : f32
    %14 = vector.broadcast %cst_11 : f32 to vector<8x256xf32>
    %15 = arith.maximumf %13, %14 : vector<8x256xf32>
    %16 = arith.truncf %15 : vector<8x256xf32> to vector<8x256xbf16>
    %c0_12 = arith.constant 0 : index
    %c0_13 = arith.constant 0 : index
    %17 = vector.load %arg7[%c0_12, %c0_13] : memref<256x128xbf16, #tpu.memory_space<vmem>>, vector<256x128xbf16>
    %cst_14 = arith.constant dense<0.000000e+00> : vector<8x128xf32>
    %18 = tpu.matmul %16, %17, %cst_14 {dimension_numbers = #tpu.dot_dimension_numbers<[1], [0], [0], [1], [0, 0, 1, 1], [], []>} : vector<8x256xbf16>, vector<256x128xbf16>, vector<8x128xf32> -> vector<8x128xf32>
    %c0_15 = arith.constant 0 : index
    %c0_16 = arith.constant 0 : index
    %19 = vector.load %arg8[%c0_15, %c0_16] : memref<1x128xf32, #tpu.memory_space<vmem>>, vector<1x128xf32>
    %20 = vector.broadcast %19 : vector<1x128xf32> to vector<8x128xf32>
    %21 = arith.addf %18, %20 : vector<8x128xf32>
    %cst_17 = arith.constant 0.000000e+00 : f32
    %22 = vector.broadcast %cst_17 : f32 to vector<8x128xf32>
    %23 = arith.maximumf %21, %22 : vector<8x128xf32>
    %24 = arith.truncf %23 : vector<8x128xf32> to vector<8x128xbf16>
    %c0_18 = arith.constant 0 : index
    %c0_19 = arith.constant 0 : index
    %25 = vector.load %arg9[%c0_18, %c0_19] : memref<128x256xbf16, #tpu.memory_space<vmem>>, vector<128x256xbf16>
    %cst_20 = arith.constant dense<0.000000e+00> : vector<8x256xf32>
    %26 = tpu.matmul %24, %25, %cst_20 {dimension_numbers = #tpu.dot_dimension_numbers<[1], [0], [0], [1], [0, 0, 1, 1], [], []>} : vector<8x128xbf16>, vector<128x256xbf16>, vector<8x256xf32> -> vector<8x256xf32>
    %c0_21 = arith.constant 0 : index
    %c0_22 = arith.constant 0 : index
    %27 = vector.load %arg10[%c0_21, %c0_22] : memref<1x256xf32, #tpu.memory_space<vmem>>, vector<1x256xf32>
    %28 = vector.broadcast %27 : vector<1x256xf32> to vector<8x256xf32>
    %29 = arith.addf %26, %28 : vector<8x256xf32>
    %30 = vector.extract_strided_slice %29 {offsets = [0, 0], sizes = [8, 128], strides = [1, 1]} : vector<8x256xf32> to vector<8x128xf32>
    %31 = vector.extract_strided_slice %29 {offsets = [0, 128], sizes = [8, 128], strides = [1, 1]} : vector<8x256xf32> to vector<8x128xf32>
    %c0_23 = arith.constant 0 : index
    %c0_24 = arith.constant 0 : index
    %32 = vector.load %arg2[%c0_23, %c0_24] : memref<8x128xbf16, #tpu.memory_space<vmem>>, vector<8x128xbf16>
    %cst_25 = arith.constant 5.000000e-01 : f32
    %33 = vector.broadcast %cst_25 : f32 to vector<8x128xf32>
    %34 = arith.mulf %33, %31 : vector<8x128xf32>
    %35 = math.exp %34 : vector<8x128xf32>
    %36 = arith.extf %32 : vector<8x128xbf16> to vector<8x128xf32>
    %37 = arith.mulf %36, %35 : vector<8x128xf32>
    %38 = arith.addf %30, %37 : vector<8x128xf32>
    %39 = arith.truncf %38 : vector<8x128xf32> to vector<8x128xbf16>
    %c0_26 = arith.constant 0 : index
    %c0_27 = arith.constant 0 : index
    %40 = vector.load %arg11[%c0_26, %c0_27] : memref<128x128xbf16, #tpu.memory_space<vmem>>, vector<128x128xbf16>
    %cst_28 = arith.constant dense<0.000000e+00> : vector<8x128xf32>
    %41 = tpu.matmul %39, %40, %cst_28 {dimension_numbers = #tpu.dot_dimension_numbers<[1], [0], [0], [1], [0, 0, 1, 1], [], []>} : vector<8x128xbf16>, vector<128x128xbf16>, vector<8x128xf32> -> vector<8x128xf32>
    %c0_29 = arith.constant 0 : index
    %c0_30 = arith.constant 0 : index
    %42 = vector.load %arg12[%c0_29, %c0_30] : memref<1x128xf32, #tpu.memory_space<vmem>>, vector<1x128xf32>
    %43 = vector.broadcast %42 : vector<1x128xf32> to vector<8x128xf32>
    %44 = arith.addf %41, %43 : vector<8x128xf32>
    %cst_31 = arith.constant 0.000000e+00 : f32
    %45 = vector.broadcast %cst_31 : f32 to vector<8x128xf32>
    %46 = arith.maximumf %44, %45 : vector<8x128xf32>
    %47 = arith.truncf %46 : vector<8x128xf32> to vector<8x128xbf16>
    %c0_32 = arith.constant 0 : index
    %c0_33 = arith.constant 0 : index
    %48 = vector.load %arg13[%c0_32, %c0_33] : memref<128x256xbf16, #tpu.memory_space<vmem>>, vector<128x256xbf16>
    %cst_34 = arith.constant dense<0.000000e+00> : vector<8x256xf32>
    %49 = tpu.matmul %47, %48, %cst_34 {dimension_numbers = #tpu.dot_dimension_numbers<[1], [0], [0], [1], [0, 0, 1, 1], [], []>} : vector<8x128xbf16>, vector<128x256xbf16>, vector<8x256xf32> -> vector<8x256xf32>
    %c0_35 = arith.constant 0 : index
    %c0_36 = arith.constant 0 : index
    %50 = vector.load %arg14[%c0_35, %c0_36] : memref<1x256xf32, #tpu.memory_space<vmem>>, vector<1x256xf32>
    %51 = vector.broadcast %50 : vector<1x256xf32> to vector<8x256xf32>
    %52 = arith.addf %49, %51 : vector<8x256xf32>
    %cst_37 = arith.constant 0.000000e+00 : f32
    %53 = vector.broadcast %cst_37 : f32 to vector<8x256xf32>
    %54 = arith.maximumf %52, %53 : vector<8x256xf32>
    %55 = arith.truncf %54 : vector<8x256xf32> to vector<8x256xbf16>
    %c0_38 = arith.constant 0 : index
    %c0_39 = arith.constant 0 : index
    %56 = vector.load %arg15[%c0_38, %c0_39] : memref<256x512xbf16, #tpu.memory_space<vmem>>, vector<256x512xbf16>
    %cst_40 = arith.constant dense<0.000000e+00> : vector<8x512xf32>
    %57 = tpu.matmul %55, %56, %cst_40 {dimension_numbers = #tpu.dot_dimension_numbers<[1], [0], [0], [1], [0, 0, 1, 1], [], []>} : vector<8x256xbf16>, vector<256x512xbf16>, vector<8x512xf32> -> vector<8x512xf32>
    %c0_41 = arith.constant 0 : index
    %c0_42 = arith.constant 0 : index
    %58 = vector.load %arg16[%c0_41, %c0_42] : memref<1x512xf32, #tpu.memory_space<vmem>>, vector<1x512xf32>
    %59 = vector.broadcast %58 : vector<1x512xf32> to vector<8x512xf32>
    %60 = arith.addf %57, %59 : vector<8x512xf32>
    %cst_43 = arith.constant 0.000000e+00 : f32
    %61 = vector.broadcast %cst_43 : f32 to vector<8x512xf32>
    %62 = arith.maximumf %60, %61 : vector<8x512xf32>
    %63 = arith.truncf %62 : vector<8x512xf32> to vector<8x512xbf16>
    %c0_44 = arith.constant 0 : index
    %c0_45 = arith.constant 0 : index
    %64 = vector.load %arg17[%c0_44, %c0_45] : memref<512x896xbf16, #tpu.memory_space<vmem>>, vector<512x896xbf16>
    %cst_46 = arith.constant dense<0.000000e+00> : vector<8x896xf32>
    %65 = tpu.matmul %63, %64, %cst_46 {dimension_numbers = #tpu.dot_dimension_numbers<[1], [0], [0], [1], [0, 0, 1, 1], [], []>} : vector<8x512xbf16>, vector<512x896xbf16>, vector<8x896xf32> -> vector<8x896xf32>
    %c0_47 = arith.constant 0 : index
    %c0_48 = arith.constant 0 : index
    %66 = vector.load %arg18[%c0_47, %c0_48] : memref<1x896xf32, #tpu.memory_space<vmem>>, vector<1x896xf32>
    %67 = vector.broadcast %66 : vector<1x896xf32> to vector<8x896xf32>
    %68 = arith.addf %65, %67 : vector<8x896xf32>
    %69 = arith.negf %68 : vector<8x896xf32>
    %70 = math.exp %69 : vector<8x896xf32>
    %cst_49 = arith.constant 1.000000e+00 : f32
    %71 = vector.broadcast %cst_49 : f32 to vector<8x896xf32>
    %72 = arith.addf %71, %70 : vector<8x896xf32>
    %73 = arith.divf %71, %72 : vector<8x896xf32>
    %74 = arith.truncf %73 : vector<8x896xf32> to vector<8x896xbf16>
    %c0_50 = arith.constant 0 : index
    %c0_51 = arith.constant 0 : index
    %75 = vector.load %arg19[%c0_50, %c0_51] : memref<8x896xbf16, #tpu.memory_space<vmem>>, vector<8x896xbf16>
    tpu.vector_store %arg19[%c0_50, %c0_51], %74 {strides = array<i32>} : memref<8x896xbf16, #tpu.memory_space<vmem>>, vector<8x896xbf16>,
    %c0_52 = arith.constant 0 : index
    %c0_53 = arith.constant 0 : index
    %76 = vector.load %arg20[%c0_52, %c0_53] : memref<8x256xf32, #tpu.memory_space<vmem>>, vector<8x256xf32>
    tpu.vector_store %arg20[%c0_52, %c0_53], %29 {strides = array<i32>} : memref<8x256xf32, #tpu.memory_space<vmem>>, vector<8x256xf32>,
    return
  }
  func.func @transform_0(%arg0: i32) -> (i32, i32) {
    %c0_i32 = arith.constant 0 : i32
    %c0_i32_0 = arith.constant 0 : i32
    return %arg0, %c0_i32 : i32, i32
  }
  func.func @transform_1(%arg0: i32) -> (i32, i32) {
    %c0_i32 = arith.constant 0 : i32
    %c0_i32_0 = arith.constant 0 : i32
    return %arg0, %c0_i32 : i32, i32
  }
  func.func @transform_2(%arg0: i32) -> (i32, i32) {
    %c0_i32 = arith.constant 0 : i32
    %c0_i32_0 = arith.constant 0 : i32
    %c0_i32_1 = arith.constant 0 : i32
    return %c0_i32, %c0_i32_0 : i32, i32
  }
  func.func @transform_3(%arg0: i32) -> (i32, i32) {
    %c0_i32 = arith.constant 0 : i32
    %c0_i32_0 = arith.constant 0 : i32
    %c0_i32_1 = arith.constant 0 : i32
    return %c0_i32, %c0_i32_0 : i32, i32
  }
  func.func @transform_4(%arg0: i32) -> (i32, i32) {
    %c0_i32 = arith.constant 0 : i32
    %c0_i32_0 = arith.constant 0 : i32
    %c0_i32_1 = arith.constant 0 : i32
    return %c0_i32, %c0_i32_0 : i32, i32
  }
  func.func @transform_5(%arg0: i32) -> (i32, i32) {
    %c0_i32 = arith.constant 0 : i32
    %c0_i32_0 = arith.constant 0 : i32
    %c0_i32_1 = arith.constant 0 : i32
    return %c0_i32, %c0_i32_0 : i32, i32
  }
  func.func @transform_6(%arg0: i32) -> (i32, i32) {
    %c0_i32 = arith.constant 0 : i32
    %c0_i32_0 = arith.constant 0 : i32
    %c0_i32_1 = arith.constant 0 : i32
    return %c0_i32, %c0_i32_0 : i32, i32
  }
  func.func @transform_7(%arg0: i32) -> (i32, i32) {
    %c0_i32 = arith.constant 0 : i32
    %c0_i32_0 = arith.constant 0 : i32
    %c0_i32_1 = arith.constant 0 : i32
    return %c0_i32, %c0_i32_0 : i32, i32
  }
  func.func @transform_8(%arg0: i32) -> (i32, i32) {
    %c0_i32 = arith.constant 0 : i32
    %c0_i32_0 = arith.constant 0 : i32
    %c0_i32_1 = arith.constant 0 : i32
    return %c0_i32, %c0_i32_0 : i32, i32
  }
  func.func @transform_9(%arg0: i32) -> (i32, i32) {
    %c0_i32 = arith.constant 0 : i32
    %c0_i32_0 = arith.constant 0 : i32
    %c0_i32_1 = arith.constant 0 : i32
    return %c0_i32, %c0_i32_0 : i32, i32
  }
  func.func @transform_10(%arg0: i32) -> (i32, i32) {
    %c0_i32 = arith.constant 0 : i32
    %c0_i32_0 = arith.constant 0 : i32
    %c0_i32_1 = arith.constant 0 : i32
    return %c0_i32, %c0_i32_0 : i32, i32
  }
  func.func @transform_11(%arg0: i32) -> (i32, i32) {
    %c0_i32 = arith.constant 0 : i32
    %c0_i32_0 = arith.constant 0 : i32
    %c0_i32_1 = arith.constant 0 : i32
    return %c0_i32, %c0_i32_0 : i32, i32
  }
  func.func @transform_12(%arg0: i32) -> (i32, i32) {
    %c0_i32 = arith.constant 0 : i32
    %c0_i32_0 = arith.constant 0 : i32
    %c0_i32_1 = arith.constant 0 : i32
    return %c0_i32, %c0_i32_0 : i32, i32
  }
  func.func @transform_13(%arg0: i32) -> (i32, i32) {
    %c0_i32 = arith.constant 0 : i32
    %c0_i32_0 = arith.constant 0 : i32
    %c0_i32_1 = arith.constant 0 : i32
    return %c0_i32, %c0_i32_0 : i32, i32
  }
  func.func @transform_14(%arg0: i32) -> (i32, i32) {
    %c0_i32 = arith.constant 0 : i32
    %c0_i32_0 = arith.constant 0 : i32
    %c0_i32_1 = arith.constant 0 : i32
    return %c0_i32, %c0_i32_0 : i32, i32
  }
  func.func @transform_15(%arg0: i32) -> (i32, i32) {
    %c0_i32 = arith.constant 0 : i32
    %c0_i32_0 = arith.constant 0 : i32
    %c0_i32_1 = arith.constant 0 : i32
    return %c0_i32, %c0_i32_0 : i32, i32
  }
  func.func @transform_16(%arg0: i32) -> (i32, i32) {
    %c0_i32 = arith.constant 0 : i32
    %c0_i32_0 = arith.constant 0 : i32
    %c0_i32_1 = arith.constant 0 : i32
    return %c0_i32, %c0_i32_0 : i32, i32
  }
  func.func @transform_17(%arg0: i32) -> (i32, i32) {
    %c0_i32 = arith.constant 0 : i32
    %c0_i32_0 = arith.constant 0 : i32
    %c0_i32_1 = arith.constant 0 : i32
    return %c0_i32, %c0_i32_0 : i32, i32
  }
  func.func @transform_18(%arg0: i32) -> (i32, i32) {
    %c0_i32 = arith.constant 0 : i32
    %c0_i32_0 = arith.constant 0 : i32
    return %arg0, %c0_i32 : i32, i32
  }
  func.func @transform_19(%arg0: i32) -> (i32, i32) {
    %c0_i32 = arith.constant 0 : i32
    %c0_i32_0 = arith.constant 0 : i32
    return %arg0, %c0_i32 : i32, i32
  }
}

</mosaic_0001>

<bundles_post_ra>
// kernel: tpu_custom_call.1
= control target key start
LH: loop header
LB: loop body
LE: loop exit
PB: predicated region body
PF: predicated region fallthrough
CT: control target
= control target key end

     0   :  { %s7650_s0 = inlined_call_operand.hbm [shape: bf16[8,784], index: 0, kind: input, shape index: {}]   ;;  %s7651_s1 = inlined_call_operand.hbm [shape: bf16[8,128], index: 1, kind: input, shape index: {}]   ;;  %s7652_s2 = inlined_call_operand.hbm [shape: bf16[784,512], index: 2, kind: input, shape index: {}]   ;;  %s7653_s3 = inlined_call_operand.vmem [shape: f32[1,512], index: 3, kind: input, shape index: {}]   ;;  %s7654_s4 = inlined_call_operand.hbm [shape: bf16[512,256], index: 4, kind: input, shape index: {}]   ;;  %s7655_s5 = inlined_call_operand.vmem [shape: f32[1,256], index: 5, kind: input, shape index: {}]   ;;  %s7656_s6 = inlined_call_operand.hbm [shape: bf16[256,128], index: 6, kind: input, shape index: {}]   ;;  %s7657_s7 = inlined_call_operand.vmem [shape: f32[1,128], index: 7, kind: input, shape index: {}]   ;;  %s7658_s8 = inlined_call_operand.hbm [shape: bf16[128,256], index: 8, kind: input, shape index: {}]   ;;  %s7659_s9 = inlined_call_operand.vmem [shape: f32[1,256], index: 9, kind: input, shape index: {}]   ;;  %s7660_s10 = inlined_call_operand.hbm [shape: bf16[128,128], index: 10, kind: input, shape index: {}]   ;;  %s7661_s11 = inlined_call_operand.vmem [shape: f32[1,128], index: 11, kind: input, shape index: {}]   ;;  %s7662_s12 = inlined_call_operand.hbm [shape: bf16[128,256], index: 12, kind: input, shape index: {}]   ;;  %s7663_s13 = inlined_call_operand.vmem [shape: f32[1,256], index: 13, kind: input, shape index: {}]   ;;  %s7664_s14 = inlined_call_operand.hbm [shape: bf16[256,512], index: 14, kind: input, shape index: {}]   ;;  %s7665_s15 = inlined_call_operand.vmem [shape: f32[1,512], index: 15, kind: input, shape index: {}]   ;;  %s7666_s16 = inlined_call_operand.hbm [shape: bf16[512,896], index: 16, kind: input, shape index: {}]   ;;  %s7667_s17 = inlined_call_operand.vmem [shape: f32[1,896], index: 17, kind: input, shape index: {}]   ;;  %s7668_s18 = inlined_call_operand.hbm [shape: bf16[8,896], index: 18, kind: output, shape index: {0}]   ;;  %s7669_s19 = inlined_call_operand.hbm [shape: f32[8,256], index: 19, kind: output, shape index: {1}]  }
   0x1   :  { %7674 = sst [smem:[#allocation30_spill]] %s7650_s0 }
   0x2   :  { %7675 = sst [smem:[#allocation31_spill]] %s7651_s1 }
   0x3   :  { %7676 = sst [smem:[#allocation32_spill]] %s7652_s2 }
   0x4   :  { %7677 = sst [smem:[#allocation33_spill]] %s7653_s3 }
   0x5   :  { %7678 = sst [smem:[#allocation34_spill]] %s7668_s18 }
   0x6   :  { %25 = vsyncpa [#allocation3], 0 }
   0x7   :  { %26 = vsyncpa [#allocation6], 0 }
   0x8   :  { %27 = vsyncpa [#allocation9], 0 }
   0x9   :  { %28 = vsyncpa [#allocation12], 0 }
   0xa   :  { %29 = vsyncpa [#allocation15], 0 }
   0xb   :  { %30 = vsyncpa [#allocation18], 0 }
   0xc   :  { %31 = vsyncpa [#allocation4], 0 }
   0xd   :  { %32 = vsyncpa [#allocation21], 0  ;;  %s7216_s0 = smov [#allocation5]   ;;  %s7217_s20 = smov [#allocation8]  }
   0xe   :  { %s49_s30 = sshll.u32 %s7216_s0, 4  ;;  %s72_s21 = sshll.u32 %s7217_s20, 4  ;;  %s50_s30 = int_to_ptr.vmem [resolvable:$true] %s49_s30  ;;  %s7339_s21 = int_to_ptr.vmem [resolvable:$true] %s72_s21 }
   0xf   :  { %s7679_s2 = sld [smem:[#allocation31_spill]] }
  0x15   :  { %s6936_s23 = scalar_lea.hbm %s7679_s2, 64 }
  0x16   :  { %p6937_p0 = scmp.ne.s32.totalorder %s7679_s2, %s6936_s23  ;;  %p6940_p1 = scmp.lt.u32.totalorder %s6936_s23, %s7679_s2 }
  0x18   :  { %p6942_p2 = pnand %p6940_p1, %p6937_p0 }
  0x1a   :  { %6945 = shalt.err (!%p6942_p2)
}
  0x1b   :  { %s6946_s27 = scalar_lea.vmem %s50_s30, 64  ;;  %p6951_p4 = scmp.lt.s32.totalorder %s50_s30, %s50_s30 }
  0x1c   :  { %p6947_p3 = scmp.ne.s32.totalorder %s50_s30, %s6946_s27  ;;  %p6952_p5 = scmp.lt.s32.totalorder %s6946_s27, %s6946_s27 }
  0x1e   :  { %p6953_p6 = por %p6952_p5, %p6951_p4 }
  0x20   :  { %p6954_p7 = pnand %p6953_p6, %p6947_p3 }
  0x22   :  { %6957 = shalt.err (!%p6954_p7)
}
  0x23   :  { %52 = dma.hbm_to_vmem [thread:$0]  %s7679_s2, 64, %s50_s30, [#allocation6]  }
  0x24   :  { %s6958_s1 = scalar_lea.hbm %s7654_s4, 8192 }
  0x25   :  { %p6959_p8 = scmp.ne.s32.totalorder %s7654_s4, %s6958_s1  ;;  %p6962_p9 = scmp.lt.u32.totalorder %s6958_s1, %s7654_s4 }
  0x27   :  { %p6964_p10 = pnand %p6962_p9, %p6959_p8 }
  0x29   :  { %6967 = shalt.err (!%p6964_p10)
}
  0x2a   :  { %s6968_s3 = scalar_lea.vmem %s7339_s21, 8192  ;;  %p6973_p12 = scmp.lt.s32.totalorder %s7339_s21, %s7339_s21 }
  0x2b   :  { %p6969_p11 = scmp.ne.s32.totalorder %s7339_s21, %s6968_s3  ;;  %p6974_p13 = scmp.lt.s32.totalorder %s6968_s3, %s6968_s3 }
  0x2d   :  { %p6975_p0 = por %p6974_p13, %p6973_p12 }
  0x2f   :  { %p6976_p1 = pnand %p6975_p0, %p6969_p11 }
  0x31   :  { %6979 = shalt.err (!%p6976_p1)
}
  0x32   :  { %s7218_s30 = smov 128   ;;  %s7219_s2 = smov 8  }
  0x33   :  { %78 = dma.hbm_to_vmem [thread:$0]  %s7654_s4, 8192, %s7339_s21, [#allocation9], %s7218_s30, %s7218_s30, %s7219_s2  }
  0x34   :  { %s7220_s28 = smov [#allocation11]   ;;  %s7221_s0 = smov [#allocation14]  }
  0x35   :  { %s100_s29 = sshll.u32 %s7220_s28, 4  ;;  %s128_s20 = sshll.u32 %s7221_s0, 4  ;;  %s101_s29 = int_to_ptr.vmem [resolvable:$true] %s100_s29  ;;  %s7373_s20 = int_to_ptr.vmem [resolvable:$true] %s128_s20 }
  0x36   :  { %s6980_s24 = scalar_lea.hbm %s7658_s8, 2048 }
  0x37   :  { %p6981_p2 = scmp.ne.s32.totalorder %s7658_s8, %s6980_s24  ;;  %p6984_p3 = scmp.lt.u32.totalorder %s6980_s24, %s7658_s8 }
  0x39   :  { %p6986_p4 = pnand %p6984_p3, %p6981_p2 }
  0x3b   :  { %6989 = shalt.err (!%p6986_p4)
}
  0x3c   :  { %s6990_s4 = scalar_lea.vmem %s101_s29, 2048  ;;  %p6995_p6 = scmp.lt.s32.totalorder %s101_s29, %s101_s29 }
  0x3d   :  { %p6991_p5 = scmp.ne.s32.totalorder %s101_s29, %s6990_s4  ;;  %p6996_p7 = scmp.lt.s32.totalorder %s6990_s4, %s6990_s4 }
  0x3f   :  { %p6997_p8 = por %p6996_p7, %p6995_p6 }
  0x41   :  { %p6998_p9 = pnand %p6997_p8, %p6991_p5 }
  0x43   :  { %7001 = shalt.err (!%p6998_p9)
}
  0x44   :  { %106 = dma.hbm_to_vmem [thread:$0]  %s7658_s8, 2048, %s101_s29, [#allocation12], %s7218_s30, %s7218_s30, %s7219_s2  }
  0x45   :  { %s7002_s18 = scalar_lea.hbm %s7662_s12, 2048 }
  0x46   :  { %p7003_p10 = scmp.ne.s32.totalorder %s7662_s12, %s7002_s18  ;;  %p7006_p11 = scmp.lt.u32.totalorder %s7002_s18, %s7662_s12 }
  0x48   :  { %p7008_p12 = pnand %p7006_p11, %p7003_p10 }
  0x4a   :  { %7011 = shalt.err (!%p7008_p12)
}
  0x4b   :  { %s7012_s23 = scalar_lea.vmem %s7373_s20, 2048  ;;  %p7017_p0 = scmp.lt.s32.totalorder %s7373_s20, %s7373_s20 }
  0x4c   :  { %p7013_p13 = scmp.ne.s32.totalorder %s7373_s20, %s7012_s23  ;;  %p7018_p1 = scmp.lt.s32.totalorder %s7012_s23, %s7012_s23 }
  0x4e   :  { %p7019_p2 = por %p7018_p1, %p7017_p0 }
  0x50   :  { %p7020_p3 = pnand %p7019_p2, %p7013_p13 }
  0x52   :  { %7023 = shalt.err (!%p7020_p3)
}
  0x53   :  { %134 = dma.hbm_to_vmem [thread:$0]  %s7662_s12, 2048, %s7373_s20, [#allocation15], %s7218_s30, %s7218_s30, %s7219_s2  }
  0x54   :  { %s7222_s25 = smov [#allocation2]   ;;  %s7223_s4 = smov [#allocation7]  }
  0x55   :  { %s39_s3 = sshll.u32 %s7222_s25, 4  ;;  %s58_s21 = sshll.u32 %s7223_s4, 4  ;;  %s40_s3 = int_to_ptr.vmem [resolvable:$true] %s39_s3  ;;  %s7410_s21 = int_to_ptr.vmem [resolvable:$true] %s58_s21 }
  0x56   :  { %s7680_s28 = sld [smem:[#allocation30_spill]] }
  0x5c   :  { %s7024_s18 = scalar_lea.hbm %s7680_s28, 448 }
  0x5d   :  { %p7025_p4 = scmp.ne.s32.totalorder %s7680_s28, %s7024_s18  ;;  %p7028_p5 = scmp.lt.u32.totalorder %s7024_s18, %s7680_s28 }
  0x5f   :  { %p7030_p6 = pnand %p7028_p5, %p7025_p4 }
  0x61   :  { %7033 = shalt.err (!%p7030_p6)
}
  0x62   :  { %s7034_s12 = scalar_lea.vmem %s40_s3, 448  ;;  %p7039_p8 = scmp.lt.s32.totalorder %s40_s3, %s40_s3 }
  0x63   :  { %p7035_p7 = scmp.ne.s32.totalorder %s40_s3, %s7034_s12  ;;  %p7040_p9 = scmp.lt.s32.totalorder %s7034_s12, %s7034_s12 }
  0x65   :  { %p7041_p10 = por %p7040_p9, %p7039_p8 }
  0x67   :  { %p7042_p11 = pnand %p7041_p10, %p7035_p7 }
  0x69   :  { %7045 = shalt.err (!%p7042_p11)
}
  0x6a   :  { %42 = dma.hbm_to_vmem [thread:$0]  %s7680_s28, 448, %s40_s3, [#allocation3]  }
  0x6b   :  { %s7681_s8 = sld [smem:[#allocation32_spill]] }
  0x71   :  { %s7046_s29 = scalar_lea.hbm %s7681_s8, 25088 }
  0x72   :  { %p7047_p12 = scmp.ne.s32.totalorder %s7681_s8, %s7046_s29  ;;  %p7050_p13 = scmp.lt.u32.totalorder %s7046_s29, %s7681_s8 }
  0x74   :  { %p7052_p0 = pnand %p7050_p13, %p7047_p12 }
  0x76   :  { %7055 = shalt.err (!%p7052_p0)
}
  0x77   :  { %s7056_s18 = scalar_lea.vmem %s7410_s21, 25088  ;;  %p7061_p2 = scmp.lt.s32.totalorder %s7410_s21, %s7410_s21 }
  0x78   :  { %p7057_p1 = scmp.ne.s32.totalorder %s7410_s21, %s7056_s18  ;;  %p7062_p3 = scmp.lt.s32.totalorder %s7056_s18, %s7056_s18 }
  0x7a   :  { %p7063_p4 = por %p7062_p3, %p7061_p2 }
  0x7c   :  { %p7064_p5 = pnand %p7063_p4, %p7057_p1 }
  0x7e   :  { %7067 = shalt.err (!%p7064_p5)
}
  0x7f   :  { %s7224_s3 = smov 256   ;;  %s7225_s28 = smov 16  }
  0x80   :  { %64 = dma.hbm_to_vmem [thread:$0]  %s7681_s8, 25088, %s7410_s21, [#allocation6], %s7224_s3, %s7224_s3, %s7225_s28  }
  0x81   :  { %s7226_s22 = smov [#allocation10]   ;;  %s7068_s2 = scalar_lea.hbm %s7656_s6, 2048 }
  0x82   :  { %s86_s24 = sshll.u32 %s7226_s22, 4  ;;  %p7069_p6 = scmp.ne.s32.totalorder %s7656_s6, %s7068_s2  ;;  %s87_s24 = int_to_ptr.vmem [resolvable:$true] %s86_s24 }
  0x83   :  { %p7072_p7 = scmp.lt.u32.totalorder %s7068_s2, %s7656_s6 }
  0x85   :  { %p7074_p8 = pnand %p7072_p7, %p7069_p6 }
  0x87   :  { %7077 = shalt.err (!%p7074_p8)
}
  0x88   :  { %s7078_s4 = scalar_lea.vmem %s87_s24, 2048  ;;  %p7083_p10 = scmp.lt.s32.totalorder %s87_s24, %s87_s24 }
  0x89   :  { %p7079_p9 = scmp.ne.s32.totalorder %s87_s24, %s7078_s4  ;;  %p7084_p11 = scmp.lt.s32.totalorder %s7078_s4, %s7078_s4 }
  0x8b   :  { %p7085_p12 = por %p7084_p11, %p7083_p10 }
  0x8d   :  { %p7086_p13 = pnand %p7085_p12, %p7079_p9 }
  0x8f   :  { %7089 = shalt.err (!%p7086_p13)
}
  0x90   :  { %s7227_s21 = smov 64   ;;  %s7228_s8 = smov 4  }
  0x91   :  { %92 = dma.hbm_to_vmem [thread:$0]  %s7656_s6, 2048, %s87_s24, [#allocation9], %s7227_s21, %s7227_s21, %s7228_s8  }
  0x92   :  { %s7229_s18 = smov [#allocation13]   ;;  %s7230_s1 = smov [#allocation16]  }
  0x93   :  { %s114_s0 = sshll.u32 %s7229_s18, 4  ;;  %s142_s22 = sshll.u32 %s7230_s1, 4  ;;  %s115_s0 = int_to_ptr.vmem [resolvable:$true] %s114_s0  ;;  %s143_s22 = int_to_ptr.vmem [resolvable:$true] %s142_s22 }
  0x94   :  { %s7090_s2 = scalar_lea.hbm %s7660_s10, 1024 }
  0x95   :  { %p7091_p0 = scmp.ne.s32.totalorder %s7660_s10, %s7090_s2  ;;  %p7094_p1 = scmp.lt.u32.totalorder %s7090_s2, %s7660_s10 }
  0x97   :  { %p7096_p2 = pnand %p7094_p1, %p7091_p0 }
  0x99   :  { %7099 = shalt.err (!%p7096_p2)
}
  0x9a   :  { %s7100_s6 = scalar_lea.vmem %s115_s0, 1024  ;;  %p7105_p4 = scmp.lt.s32.totalorder %s115_s0, %s115_s0 }
  0x9b   :  { %p7101_p3 = scmp.ne.s32.totalorder %s115_s0, %s7100_s6  ;;  %p7106_p5 = scmp.lt.s32.totalorder %s7100_s6, %s7100_s6 }
  0x9d   :  { %p7107_p6 = por %p7106_p5, %p7105_p4 }
  0x9f   :  { %p7108_p7 = pnand %p7107_p6, %p7101_p3 }
  0xa1   :  { %7111 = shalt.err (!%p7108_p7)
}
  0xa2   :  { %120 = dma.hbm_to_vmem [thread:$0]  %s7660_s10, 1024, %s115_s0, [#allocation12], %s7227_s21, %s7227_s21, %s7228_s8  }
  0xa3   :  { %s7112_s18 = scalar_lea.hbm %s7664_s14, 8192 }
  0xa4   :  { %p7113_p8 = scmp.ne.s32.totalorder %s7664_s14, %s7112_s18  ;;  %p7116_p9 = scmp.lt.u32.totalorder %s7112_s18, %s7664_s14 }
  0xa6   :  { %p7118_p10 = pnand %p7116_p9, %p7113_p8 }
  0xa8   :  { %7121 = shalt.err (!%p7118_p10)
}
  0xa9   :  { %s7122_s20 = scalar_lea.vmem %s143_s22, 8192  ;;  %p7127_p12 = scmp.lt.s32.totalorder %s143_s22, %s143_s22 }
  0xaa   :  { %p7123_p11 = scmp.ne.s32.totalorder %s143_s22, %s7122_s20  ;;  %p7128_p13 = scmp.lt.s32.totalorder %s7122_s20, %s7122_s20 }
  0xac   :  { %p7129_p0 = por %p7128_p13, %p7127_p12 }
  0xae   :  { %p7130_p1 = pnand %p7129_p0, %p7123_p11 }
  0xb0   :  { %7133 = shalt.err (!%p7130_p1)
}
  0xb1   :  { %148 = dma.hbm_to_vmem [thread:$0]  %s7664_s14, 8192, %s143_s22, [#allocation15], %s7224_s3, %s7224_s3, %s7225_s28  }
  0xb2   :  { %s7231_s8 = smov [#allocation17]   ;;  %s7134_s25 = scalar_lea.hbm %s7666_s16, 28672 }
  0xb3   :  { %s156_s0 = sshll.u32 %s7231_s8, 4  ;;  %p7135_p2 = scmp.ne.s32.totalorder %s7666_s16, %s7134_s25  ;;  %s157_s0 = int_to_ptr.vmem [resolvable:$true] %s156_s0 }
  0xb4   :  { %p7138_p3 = scmp.lt.u32.totalorder %s7134_s25, %s7666_s16 }
  0xb6   :  { %p7140_p4 = pnand %p7138_p3, %p7135_p2 }
  0xb8   :  { %7143 = shalt.err (!%p7140_p4)
}
  0xb9   :  { %s7144_s27 = scalar_lea.vmem %s157_s0, 28672  ;;  %p7149_p6 = scmp.lt.s32.totalorder %s157_s0, %s157_s0 }
  0xba   :  { %p7145_p5 = scmp.ne.s32.totalorder %s157_s0, %s7144_s27  ;;  %p7150_p7 = scmp.lt.s32.totalorder %s7144_s27, %s7144_s27 }
  0xbc   :  { %p7151_p8 = por %p7150_p7, %p7149_p6 }
  0xbe   :  { %p7152_p9 = pnand %p7151_p8, %p7145_p5 }
  0xc0   :  { %7155 = shalt.err (!%p7152_p9)
}
  0xc1   :  { %s7232_s14 = smov 448   ;;  %s7233_s3 = smov 28  }
  0xc2   :  { %162 = dma.hbm_to_vmem [thread:$0]  %s7666_s16, 28672, %s157_s0, [#allocation18], %s7232_s14, %s7232_s14, %s7233_s3  }
  0xc3   :  { %7200 = dma.done.wait [#allocation3], 448  }
  0xc4   :  { %7201 = vsyncadd [#allocation3], 4294966848 }
  0xc5   :  { %7202 = dma.done.wait [#allocation6], 25152  }
  0xc6   :  { %7203 = vsyncadd [#allocation6], 4294942144 }
  0xc7   :  { %7204 = dma.done.wait [#allocation9], 10240  }
  0xc8   :  { %7205 = vsyncadd [#allocation9], 4294957056 }
  0xc9   :  { %7206 = dma.done.wait [#allocation12], 3072  }
  0xca   :  { %7207 = vsyncadd [#allocation12], 4294964224 }
  0xcb   :  { %7208 = dma.done.wait [#allocation15], 10240  }
  0xcc   :  { %7209 = vsyncadd [#allocation15], 4294957056 }
  0xcd   :  { %7210 = dma.done.wait [#allocation18], 28672  }
  0xce   :  { %7211 = vsyncadd [#allocation18], 4294938624  ;;  %v7234_v0 = vmov 0   ;;  %v6020_v1 = vld [vmem:[#allocation7 + $0x4] ss:$16 sps:$4 sm:$0xff]   ;;  %vm1422_vm0 = vcmask 130048  }
  0xcf   :  { %1581 = vmatprep.mubr.bf16.mxu1 %v7234_v0  ;;  %v6022_v2 = vld [vmem:[#allocation7 + $0x604] ss:$16 sps:$4 sm:$0xff]   ;;  %1426 = vmatprep.subr.bf16.mxu0 %v6020_v1  ;;  %v6024_v3 = vld [vmem:[#allocation7] ss:$16 sps:$4 sm:$0xff]   ;;  %v6028_v6 = vld [vmem:[#allocation7 + $0x8] ss:$16 sps:$4 sm:$0xff]  }
  0xd0   :  { %v6025_v4 = vld [vmem:[#allocation7 + $0x600] ss:$16 sps:$4 sm:$0xff]   ;;  %1549 = vmatprep.subr.bf16.mxu1 %v6022_v2  ;;  %v6026_v5 = vld [vmem:[#allocation7 + $0x24] ss:$16 sps:$4 sm:$0xff]   ;;  %1427 = vmatpush1.bf16.msra.mxu0 %v6024_v3  ;;  %v6030_v7 = vld [vmem:[#allocation7 + $0xc] ss:$16 sps:$4 sm:$0xff]  }
  0xd1   :  { %1550 = vmatpush1.bf16.msra.mxu1 %v6025_v4  ;;  %1428 = vmatprep.subr.bf16.mxu0 %v6026_v5  ;;  %v6031_v8 = vld [vmem:[#allocation7 + $0x20] ss:$16 sps:$4 sm:$0xff]   ;;  %v6032_v9 = vld [vmem:[#allocation2 + $0x18] ss:$0 sps:$4 sm:$0xff]   ;;  %v6033_v10 = vld [vmem:[#allocation7 + $0x44] ss:$16 sps:$4 sm:$0xff]  }
  0xd2   :  { %1590 = vmatprep.subr.bf16.mxu1 %v6030_v7  ;;  %v6035_v11 = vld [vmem:[#allocation7 + $0x28] ss:$16 sps:$4 sm:$0xff]   ;;  %v6037_v12 = vld [vmem:[#allocation7 + $0x2c] ss:$16 sps:$4 sm:$0xff]   ;;  %v6038_v13 = vld [vmem:[#allocation7 + $0x40] ss:$16 sps:$4 sm:$0xff]  }
  0xd3   :  { %v6039_v14 = vld [vmem:[#allocation7 + $0x64] ss:$16 sps:$4 sm:$0xff]   ;;  %v6043_v15 = vld [vmem:[#allocation7 + $0x4c] ss:$16 sps:$4 sm:$0xff]   ;;  %v6041_v16 = vld [vmem:[#allocation7 + $0x48] ss:$16 sps:$4 sm:$0xff]  }
  0xd4   :  { %5425 = vmatmul.mubr.msk.bf16.vlgmr.msra.gmra.mrb[0].mxu1 %vm1422_vm0, %v6032_v9  ;;  %1429 = vmatpush1.bf16.msra.mxu0 %v6031_v8  ;;  %v6044_v17 = vld [vmem:[#allocation7 + $0x60] ss:$16 sps:$4 sm:$0xff]   ;;  %v6045_v18 = vld [vmem:[#allocation7 + $0x84] ss:$16 sps:$4 sm:$0xff]   ;;  %v6049_v19 = vld [vmem:[#allocation7 + $0x6c] ss:$16 sps:$4 sm:$0xff]  }
  0xd5   :  { %1591 = vmatpush1.bf16.msra.mxu1 %v6028_v6  ;;  %1430 = vmatprep.subr.bf16.mxu0 %v6033_v10  ;;  %v6047_v20 = vld [vmem:[#allocation7 + $0x68] ss:$16 sps:$4 sm:$0xff]   ;;  %v6050_v21 = vld [vmem:[#allocation7 + $0x80] ss:$16 sps:$4 sm:$0xff]   ;;  %v6051_v22 = vld [vmem:[#allocation7 + $0xa4] ss:$16 sps:$4 sm:$0xff]  }
  0xd6   :  { %1592 = vmatprep.subr.bf16.mxu1 %v6037_v12  ;;  %v6055_v23 = vld [vmem:[#allocation7 + $0x8c] ss:$16 sps:$4 sm:$0xff]   ;;  %v6053_v24 = vld [vmem:[#allocation7 + $0x88] ss:$16 sps:$4 sm:$0xff]   ;;  %v6056_v25 = vld [vmem:[#allocation7 + $0xa0] ss:$16 sps:$4 sm:$0xff]  }
  0xd7   :  { %v6057_v26 = vld [vmem:[#allocation7 + $0xc4] ss:$16 sps:$4 sm:$0xff]   ;;  %v6061_v27 = vld [vmem:[#allocation7 + $0xac] ss:$16 sps:$4 sm:$0xff]   ;;  %v6059_v28 = vld [vmem:[#allocation7 + $0xa8] ss:$16 sps:$4 sm:$0xff]  }
  0xd8   :  { %1431 = vmatpush1.bf16.msra.mxu0 %v6038_v13  ;;  %v6062_v29 = vld [vmem:[#allocation7 + $0xc0] ss:$16 sps:$4 sm:$0xff]   ;;  %v6063_v30 = vld [vmem:[#allocation7 + $0xe4] ss:$16 sps:$4 sm:$0xff]   ;;  %v6067_v31 = vld [vmem:[#allocation7 + $0xcc] ss:$16 sps:$4 sm:$0xff]  }
  0xd9   :  { %1593 = vmatpush1.bf16.msra.mxu1 %v6035_v11  ;;  %1432 = vmatprep.subr.bf16.mxu0 %v6039_v14  ;;  %v6065_v32 = vld [vmem:[#allocation7 + $0xc8] ss:$16 sps:$4 sm:$0xff]   ;;  %v6068_v33 = vld [vmem:[#allocation7 + $0xe0] ss:$16 sps:$4 sm:$0xff]   ;;  %v6069_v34 = vld [vmem:[#allocation7 + $0x104] ss:$16 sps:$4 sm:$0xff]  }
  0xda   :  { %1594 = vmatprep.subr.bf16.mxu1 %v6043_v15  ;;  %v6073_v35 = vld [vmem:[#allocation7 + $0xec] ss:$16 sps:$4 sm:$0xff]   ;;  %v6071_v36 = vld [vmem:[#allocation7 + $0xe8] ss:$16 sps:$4 sm:$0xff]   ;;  %v6074_v37 = vld [vmem:[#allocation7 + $0x100] ss:$16 sps:$4 sm:$0xff]  }
  0xdb   :  { %v6075_v38 = vld [vmem:[#allocation7 + $0x124] ss:$16 sps:$4 sm:$0xff]   ;;  %v6079_v39 = vld [vmem:[#allocation7 + $0x10c] ss:$16 sps:$4 sm:$0xff]   ;;  %v6077_v40 = vld [vmem:[#allocation7 + $0x108] ss:$16 sps:$4 sm:$0xff]  }
  0xdc   :  { %1433 = vmatpush1.bf16.msra.mxu0 %v6044_v17  ;;  %v6080_v41 = vld [vmem:[#allocation7 + $0x120] ss:$16 sps:$4 sm:$0xff]   ;;  %v6081_v42 = vld [vmem:[#allocation7 + $0x144] ss:$16 sps:$4 sm:$0xff]   ;;  %v6085_v43 = vld [vmem:[#allocation7 + $0x12c] ss:$16 sps:$4 sm:$0xff]  }
  0xdd   :  { %1595 = vmatpush1.bf16.msra.mxu1 %v6041_v16  ;;  %1434 = vmatprep.subr.bf16.mxu0 %v6045_v18  ;;  %v6083_v44 = vld [vmem:[#allocation7 + $0x128] ss:$16 sps:$4 sm:$0xff]   ;;  %v6086_v45 = vld [vmem:[#allocation7 + $0x140] ss:$16 sps:$4 sm:$0xff]   ;;  %v6087_v46 = vld [vmem:[#allocation7 + $0x164] ss:$16 sps:$4 sm:$0xff]  }
  0xde   :  { %1596 = vmatprep.subr.bf16.mxu1 %v6049_v19  ;;  %v6091_v47 = vld [vmem:[#allocation7 + $0x14c] ss:$16 sps:$4 sm:$0xff]   ;;  %v6089_v48 = vld [vmem:[#allocation7 + $0x148] ss:$16 sps:$4 sm:$0xff]   ;;  %v196_v49 = vld [vmem:[#allocation2] sm:$0xff]  ;;  %s7682_s1 = sld [smem:[#allocation33_spill]] }
  0xdf   :  { %v6092_v50 = vld [vmem:[#allocation7 + $0x160] ss:$16 sps:$4 sm:$0xff]   ;;  %v6093_v51 = vld [vmem:[#allocation7 + $0x184] ss:$16 sps:$4 sm:$0xff]   ;;  %v5223_v52 = vcombine.high %v196_v49, %v196_v49  ;;  %v6097_v53 = vld [vmem:[#allocation7 + $0x16c] ss:$16 sps:$4 sm:$0xff]   ;;  %v5222_v7 = vcombine.low %v196_v49, %v196_v49 }
  0xe0   :  { %1435 = vmatpush1.bf16.msra.mxu0 %v6050_v21  ;;  %v6095_v54 = vld [vmem:[#allocation7 + $0x168] ss:$16 sps:$4 sm:$0xff]   ;;  %v6098_v55 = vld [vmem:[#allocation7 + $0x180] ss:$16 sps:$4 sm:$0xff]   ;;  %v6099_v56 = vld [vmem:[#allocation7 + $0x1a4] ss:$16 sps:$4 sm:$0xff]  }
  0xe1   :  { %1597 = vmatpush1.bf16.msra.mxu1 %v6047_v20  ;;  %1436 = vmatprep.subr.bf16.mxu0 %v6051_v22  ;;  %v6103_v57 = vld [vmem:[#allocation7 + $0x18c] ss:$16 sps:$4 sm:$0xff]   ;;  %v6101_v58 = vld [vmem:[#allocation7 + $0x188] ss:$16 sps:$4 sm:$0xff]   ;;  %v6104_v59 = vld [vmem:[#allocation7 + $0x1a0] ss:$16 sps:$4 sm:$0xff]  }
  0xe2   :  { %1598 = vmatprep.subr.bf16.mxu1 %v6055_v23  ;;  %1458 = vmatprep.mubr.bf16.mxu0 %v5223_v52  ;;  %v6105_v60 = vld [vmem:[#allocation7 + $0x1c4] ss:$16 sps:$4 sm:$0xff]   ;;  %v6109_v61 = vld [vmem:[#allocation7 + $0x1ac] ss:$16 sps:$4 sm:$0xff]   ;;  %v6107_v62 = vld [vmem:[#allocation7 + $0x1a8] ss:$16 sps:$4 sm:$0xff]  }
  0xe3   :  { %1622 = vmatprep.mubr.bf16.mxu1 %v5223_v52  ;;  %v6110_v63 = vld [vmem:[#allocation7 + $0x1c0] ss:$16 sps:$4 sm:$0xff]   ;;  %v6111_v1 = vld [vmem:[#allocation7 + $0x1e4] ss:$16 sps:$4 sm:$0xff]   ;;  %v6115_v2 = vld [vmem:[#allocation7 + $0x1cc] ss:$16 sps:$4 sm:$0xff]  }
  0xe4   :  { %1437 = vmatpush1.bf16.msra.mxu0 %v6056_v25  ;;  %v6113_v3 = vld [vmem:[#allocation7 + $0x1c8] ss:$16 sps:$4 sm:$0xff]   ;;  %v6116_v4 = vld [vmem:[#allocation7 + $0x1e0] ss:$16 sps:$4 sm:$0xff]   ;;  %v6121_v5 = vld [vmem:[#allocation7 + $0x204] ss:$16 sps:$4 sm:$0xff]  }
  0xe5   :  { %1599 = vmatpush1.bf16.msra.mxu1 %v6053_v24  ;;  %1438 = vmatprep.subr.bf16.mxu0 %v6057_v26  ;;  %v6124_v6 = vld [vmem:[#allocation7 + $0x1ec] ss:$16 sps:$4 sm:$0xff]   ;;  %v6119_v8 = vld [vmem:[#allocation7 + $0x200] ss:$16 sps:$4 sm:$0xff]   ;;  %v6122_v9 = vld [vmem:[#allocation7 + $0x1e8] ss:$16 sps:$4 sm:$0xff]  }
  0xe6   :  { %1600 = vmatprep.subr.bf16.mxu1 %v6061_v27  ;;  %v6127_v10 = vld [vmem:[#allocation7 + $0x224] ss:$16 sps:$4 sm:$0xff]   ;;  %v6130_v11 = vld [vmem:[#allocation7 + $0x20c] ss:$16 sps:$4 sm:$0xff]   ;;  %v6125_v12 = vld [vmem:[#allocation7 + $0x220] ss:$16 sps:$4 sm:$0xff]  }
  0xe7   :  { %v6128_v13 = vld [vmem:[#allocation7 + $0x208] ss:$16 sps:$4 sm:$0xff]   ;;  %v6133_v14 = vld [vmem:[#allocation7 + $0x244] ss:$16 sps:$4 sm:$0xff]   ;;  %v6136_v15 = vld [vmem:[#allocation7 + $0x22c] ss:$16 sps:$4 sm:$0xff]  }
  0xe8   :  { %1439 = vmatpush1.bf16.msra.mxu0 %v6062_v29  ;;  %v6131_v16 = vld [vmem:[#allocation7 + $0x240] ss:$16 sps:$4 sm:$0xff]   ;;  %v6134_v17 = vld [vmem:[#allocation7 + $0x228] ss:$16 sps:$4 sm:$0xff]   ;;  %v6139_v18 = vld [vmem:[#allocation7 + $0x264] ss:$16 sps:$4 sm:$0xff]  }
  0xe9   :  { %1601 = vmatpush1.bf16.msra.mxu1 %v6059_v28  ;;  %1440 = vmatprep.subr.bf16.mxu0 %v6063_v30  ;;  %v6142_v19 = vld [vmem:[#allocation7 + $0x24c] ss:$16 sps:$4 sm:$0xff]   ;;  %v6137_v20 = vld [vmem:[#allocation7 + $0x260] ss:$16 sps:$4 sm:$0xff]   ;;  %v6140_v21 = vld [vmem:[#allocation7 + $0x248] ss:$16 sps:$4 sm:$0xff]  }
  0xea   :  { %1602 = vmatprep.subr.bf16.mxu1 %v6067_v31  ;;  %v6145_v22 = vld [vmem:[#allocation7 + $0x284] ss:$16 sps:$4 sm:$0xff]   ;;  %v6148_v23 = vld [vmem:[#allocation7 + $0x26c] ss:$16 sps:$4 sm:$0xff]   ;;  %v6143_v24 = vld [vmem:[#allocation7 + $0x280] ss:$16 sps:$4 sm:$0xff]  }
  0xeb   :  { %v6146_v25 = vld [vmem:[#allocation7 + $0x268] ss:$16 sps:$4 sm:$0xff]   ;;  %v6151_v26 = vld [vmem:[#allocation7 + $0x2a4] ss:$16 sps:$4 sm:$0xff]   ;;  %v6154_v27 = vld [vmem:[#allocation7 + $0x28c] ss:$16 sps:$4 sm:$0xff]  }
  0xec   :  { %1441 = vmatpush1.bf16.msra.mxu0 %v6068_v33  ;;  %v6149_v28 = vld [vmem:[#allocation7 + $0x2a0] ss:$16 sps:$4 sm:$0xff]   ;;  %v6152_v29 = vld [vmem:[#allocation7 + $0x288] ss:$16 sps:$4 sm:$0xff]   ;;  %v6157_v30 = vld [vmem:[#allocation7 + $0x2c4] ss:$16 sps:$4 sm:$0xff]  }
  0xed   :  { %1603 = vmatpush1.bf16.msra.mxu1 %v6065_v32  ;;  %1442 = vmatprep.subr.bf16.mxu0 %v6069_v34  ;;  %v6160_v31 = vld [vmem:[#allocation7 + $0x2ac] ss:$16 sps:$4 sm:$0xff]   ;;  %v6155_v33 = vld [vmem:[#allocation7 + $0x2c0] ss:$16 sps:$4 sm:$0xff]   ;;  %v6158_v34 = vld [vmem:[#allocation7 + $0x2a8] ss:$16 sps:$4 sm:$0xff]  }
  0xee   :  { %1604 = vmatprep.subr.bf16.mxu1 %v6073_v35  ;;  %v7497_v32 = vld [vmem:[#allocation2 + $0x8] sm:$0xff]  ;;  %v6187_v52 = vld [vmem:[#allocation7 + $0x364] ss:$16 sps:$4 sm:$0xff]   ;;  %vm7236_vm1 = vmmov 0  }
  0xef   :  { %v5225_v35 = vcombine.high %v7497_v32, %v7497_v32  ;;  %v6184_v49 = vld [vmem:[#allocation7 + $0x32c] ss:$16 sps:$4 sm:$0xff]  }
  0xf0   :  { %1443 = vmatpush1.bf16.msra.mxu0 %v6074_v37  ;;  %v6166_v37 = vld [vmem:[#allocation7 + $0x2cc] ss:$16 sps:$4 sm:$0xff]  }
  0xf1   :  { %1605 = vmatpush1.bf16.msra.mxu1 %v6071_v36  ;;  %1444 = vmatprep.subr.bf16.mxu0 %v6075_v38  ;;  %v6163_v36 = vld [vmem:[#allocation7 + $0x2e4] ss:$16 sps:$4 sm:$0xff]   ;;  %v6161_v38 = vld [vmem:[#allocation7 + $0x2e0] ss:$16 sps:$4 sm:$0xff]  }
  0xf2   :  { %1606 = vmatprep.subr.bf16.mxu1 %v6079_v39  ;;  %v6164_v39 = vld [vmem:[#allocation7 + $0x2c8] ss:$16 sps:$4 sm:$0xff]  }
  0xf4   :  { %1445 = vmatpush1.bf16.msra.mxu0 %v6080_v41  ;;  %v6172_v41 = vld [vmem:[#allocation7 + $0x2ec] ss:$16 sps:$4 sm:$0xff]  }
  0xf5   :  { %1607 = vmatpush1.bf16.msra.mxu1 %v6077_v40  ;;  %1446 = vmatprep.subr.bf16.mxu0 %v6081_v42  ;;  %v6169_v40 = vld [vmem:[#allocation7 + $0x304] ss:$16 sps:$4 sm:$0xff]   ;;  %v6167_v42 = vld [vmem:[#allocation7 + $0x300] ss:$16 sps:$4 sm:$0xff]  }
  0xf6   :  { %1608 = vmatprep.subr.bf16.mxu1 %v6085_v43  ;;  %v6170_v43 = vld [vmem:[#allocation7 + $0x2e8] ss:$16 sps:$4 sm:$0xff]  }
  0xf8   :  { %1447 = vmatpush1.bf16.msra.mxu0 %v6086_v45  ;;  %v6178_v45 = vld [vmem:[#allocation7 + $0x30c] ss:$16 sps:$4 sm:$0xff]  }
  0xf9   :  { %1609 = vmatpush1.bf16.msra.mxu1 %v6083_v44  ;;  %1448 = vmatprep.subr.bf16.mxu0 %v6087_v46  ;;  %v6175_v44 = vld [vmem:[#allocation7 + $0x324] ss:$16 sps:$4 sm:$0xff]   ;;  %v6173_v46 = vld [vmem:[#allocation7 + $0x320] ss:$16 sps:$4 sm:$0xff]  }
  0xfa   :  { %1610 = vmatprep.subr.bf16.mxu1 %v6091_v47  ;;  %v6176_v47 = vld [vmem:[#allocation7 + $0x308] ss:$16 sps:$4 sm:$0xff]  }
  0xfc   :  { %1449 = vmatpush1.bf16.msra.mxu0 %v6092_v50  ;;  %v6179_v50 = vld [vmem:[#allocation7 + $0x340] ss:$16 sps:$4 sm:$0xff]  }
  0xfd   :  { %1611 = vmatpush1.bf16.msra.mxu1 %v6089_v48  ;;  %1450 = vmatprep.subr.bf16.mxu0 %v6093_v51  ;;  %v6181_v48 = vld [vmem:[#allocation7 + $0x344] ss:$16 sps:$4 sm:$0xff]   ;;  %v6182_v51 = vld [vmem:[#allocation7 + $0x328] ss:$16 sps:$4 sm:$0xff]  }
  0xfe   :  { %1612 = vmatprep.subr.bf16.mxu1 %v6097_v53  ;;  %v6190_v53 = vld [vmem:[#allocation7 + $0x34c] ss:$16 sps:$4 sm:$0xff]  }
 0x100   :  { %1451 = vmatpush1.bf16.msra.mxu0 %v6098_v55  ;;  %v6188_v55 = vld [vmem:[#allocation7 + $0x348] ss:$16 sps:$4 sm:$0xff]  }
 0x101   :  { %1613 = vmatpush1.bf16.msra.mxu1 %v6095_v54  ;;  %1452 = vmatprep.subr.bf16.mxu0 %v6099_v56  ;;  %v6185_v54 = vld [vmem:[#allocation7 + $0x360] ss:$16 sps:$4 sm:$0xff]   ;;  %v6193_v56 = vld [vmem:[#allocation7 + $0x384] ss:$16 sps:$4 sm:$0xff]  }
 0x102   :  { %1614 = vmatprep.subr.bf16.mxu1 %v6103_v57  ;;  %v6196_v57 = vld [vmem:[#allocation7 + $0x36c] ss:$16 sps:$4 sm:$0xff]  }
 0x104   :  { %1453 = vmatpush1.bf16.msra.mxu0 %v6104_v59  ;;  %v6194_v59 = vld [vmem:[#allocation7 + $0x368] ss:$16 sps:$4 sm:$0xff]  }
 0x105   :  { %1615 = vmatpush1.bf16.msra.mxu1 %v6101_v58  ;;  %1454 = vmatprep.subr.bf16.mxu0 %v6105_v60  ;;  %v6191_v58 = vld [vmem:[#allocation7 + $0x380] ss:$16 sps:$4 sm:$0xff]   ;;  %v6199_v60 = vld [vmem:[#allocation7 + $0x3a4] ss:$16 sps:$4 sm:$0xff]  }
 0x106   :  { %1616 = vmatprep.subr.bf16.mxu1 %v6109_v61  ;;  %v6202_v61 = vld [vmem:[#allocation7 + $0x38c] ss:$16 sps:$4 sm:$0xff]  }
 0x108   :  { %1455 = vmatpush1.bf16.msra.mxu0 %v6110_v63  ;;  %v6200_v63 = vld [vmem:[#allocation7 + $0x388] ss:$16 sps:$4 sm:$0xff]  }
 0x109   :  { %1617 = vmatpush1.bf16.msra.mxu1 %v6107_v62  ;;  %1456 = vmatprep.subr.bf16.mxu0 %v6111_v1  ;;  %v6197_v62 = vld [vmem:[#allocation7 + $0x3a0] ss:$16 sps:$4 sm:$0xff]   ;;  %v6205_v1 = vld [vmem:[#allocation7 + $0x3c4] ss:$16 sps:$4 sm:$0xff]  }
 0x10a   :  { %1618 = vmatprep.subr.bf16.mxu1 %v6115_v2  ;;  %v6208_v2 = vld [vmem:[#allocation7 + $0x3ac] ss:$16 sps:$4 sm:$0xff]  }
 0x10c   :  { %1457 = vmatpush1.bf16.msra.mxu0 %v6116_v4  ;;  %v6206_v4 = vld [vmem:[#allocation7 + $0x3a8] ss:$16 sps:$4 sm:$0xff]  }
 0x10d   :  { %1619 = vmatpush1.bf16.msra.mxu1 %v6113_v3  ;;  %1467 = vmatprep.subr.bf16.mxu0 %v6121_v5  ;;  %v6203_v3 = vld [vmem:[#allocation7 + $0x3c0] ss:$16 sps:$4 sm:$0xff]   ;;  %v6211_v5 = vld [vmem:[#allocation7 + $0x3e4] ss:$16 sps:$4 sm:$0xff]  }
 0x10e   :  { %1620 = vmatprep.subr.bf16.mxu1 %v6124_v6  ;;  %v6214_v6 = vld [vmem:[#allocation7 + $0x3cc] ss:$16 sps:$4 sm:$0xff]  }
 0x10f   :  { %1459 = vmatmul.mubr.bf16.vlgmr.msra.gmra.mrb[0].mxu0 %v5222_v7 }
 0x110   :  { %1468 = vmatpush1.bf16.msra.mxu0 %v6119_v8  ;;  %1499 = vmatprep.mubr.bf16.mxu0 %v5225_v35  ;;  %v6212_v8 = vld [vmem:[#allocation7 + $0x3c8] ss:$16 sps:$4 sm:$0xff]  }
 0x111   :  { %1621 = vmatpush1.bf16.msra.mxu1 %v6122_v9  ;;  %1469 = vmatprep.subr.bf16.mxu0 %v6127_v10  ;;  %v6219_v9 = vld [vmem:[#allocation7 + $0x404] ss:$16 sps:$4 sm:$0xff]   ;;  %v6222_v10 = vld [vmem:[#allocation7 + $0x3ec] ss:$16 sps:$4 sm:$0xff]  }
 0x112   :  { %1631 = vmatprep.subr.bf16.mxu1 %v6130_v11  ;;  %v5224_v11 = vcombine.low %v7497_v32, %v7497_v32  ;;  %v6249_v32 = vld [vmem:[#allocation7 + $0x4a4] ss:$16 sps:$4 sm:$0xff]  }
 0x114   :  { %1623 = vmatmul.mubr.bf16.vlgmr.msra.gmra.mrb[4].mxu1 %v5222_v7  ;;  %1470 = vmatpush1.bf16.msra.mxu0 %v6125_v12  ;;  %v6209_v7 = vld [vmem:[#allocation7 + $0x3e0] ss:$16 sps:$4 sm:$0xff]  }
 0x115   :  { %1632 = vmatpush1.bf16.msra.mxu1 %v6128_v13  ;;  %1471 = vmatprep.subr.bf16.mxu0 %v6133_v14  ;;  %v6217_v12 = vld [vmem:[#allocation7 + $0x400] ss:$16 sps:$4 sm:$0xff]   ;;  %v6220_v13 = vld [vmem:[#allocation7 + $0x3e8] ss:$16 sps:$4 sm:$0xff]   ;;  %v6225_v14 = vld [vmem:[#allocation7 + $0x424] ss:$16 sps:$4 sm:$0xff]  }
 0x116   :  { %1633 = vmatprep.subr.bf16.mxu1 %v6136_v15  ;;  %1663 = vmatprep.mubr.bf16.mxu1 %v5225_v35  ;;  %v6228_v15 = vld [vmem:[#allocation7 + $0x40c] ss:$16 sps:$4 sm:$0xff]   ;;  %v6250_v35 = vld [vmem:[#allocation7 + $0x488] ss:$16 sps:$4 sm:$0xff]  }
 0x118   :  { %1472 = vmatpush1.bf16.msra.mxu0 %v6131_v16  ;;  %v7503_v16 = vld [vmem:[#allocation2 + $0x10] sm:$0xff] }
 0x119   :  { %1634 = vmatpush1.bf16.msra.mxu1 %v6134_v17  ;;  %1473 = vmatprep.subr.bf16.mxu0 %v6139_v18  ;;  %v5227_v17 = vcombine.high %v7503_v16, %v7503_v16  ;;  %v6223_v18 = vld [vmem:[#allocation7 + $0x420] ss:$16 sps:$4 sm:$0xff]  }
 0x11a   :  { %1635 = vmatprep.subr.bf16.mxu1 %v6142_v19  ;;  %v6226_v19 = vld [vmem:[#allocation7 + $0x408] ss:$16 sps:$4 sm:$0xff]  }
 0x11c   :  { %1474 = vmatpush1.bf16.msra.mxu0 %v6137_v20  ;;  %v6231_v20 = vld [vmem:[#allocation7 + $0x444] ss:$16 sps:$4 sm:$0xff]  }
 0x11d   :  { %1636 = vmatpush1.bf16.msra.mxu1 %v6140_v21  ;;  %1475 = vmatprep.subr.bf16.mxu0 %v6145_v22  ;;  %v6234_v21 = vld [vmem:[#allocation7 + $0x42c] ss:$16 sps:$4 sm:$0xff]   ;;  %v6229_v22 = vld [vmem:[#allocation7 + $0x440] ss:$16 sps:$4 sm:$0xff]  }
 0x11e   :  { %1637 = vmatprep.subr.bf16.mxu1 %v6148_v23  ;;  %v6232_v23 = vld [vmem:[#allocation7 + $0x428] ss:$16 sps:$4 sm:$0xff]  }
 0x120   :  { %1476 = vmatpush1.bf16.msra.mxu0 %v6143_v24  ;;  %v6237_v24 = vld [vmem:[#allocation7 + $0x464] ss:$16 sps:$4 sm:$0xff]  }
 0x121   :  { %1638 = vmatpush1.bf16.msra.mxu1 %v6146_v25  ;;  %1477 = vmatprep.subr.bf16.mxu0 %v6151_v26  ;;  %v6240_v25 = vld [vmem:[#allocation7 + $0x44c] ss:$16 sps:$4 sm:$0xff]   ;;  %v6235_v26 = vld [vmem:[#allocation7 + $0x460] ss:$16 sps:$4 sm:$0xff]  }
 0x122   :  { %1639 = vmatprep.subr.bf16.mxu1 %v6154_v27  ;;  %v6238_v27 = vld [vmem:[#allocation7 + $0x448] ss:$16 sps:$4 sm:$0xff]  }
 0x124   :  { %1478 = vmatpush1.bf16.msra.mxu0 %v6149_v28  ;;  %v6243_v28 = vld [vmem:[#allocation7 + $0x484] ss:$16 sps:$4 sm:$0xff]  }
 0x125   :  { %1640 = vmatpush1.bf16.msra.mxu1 %v6152_v29  ;;  %1479 = vmatprep.subr.bf16.mxu0 %v6157_v30  ;;  %v6246_v29 = vld [vmem:[#allocation7 + $0x46c] ss:$16 sps:$4 sm:$0xff]   ;;  %v6241_v30 = vld [vmem:[#allocation7 + $0x480] ss:$16 sps:$4 sm:$0xff]  }
 0x126   :  { %1641 = vmatprep.subr.bf16.mxu1 %v6160_v31  ;;  %v6244_v31 = vld [vmem:[#allocation7 + $0x468] ss:$16 sps:$4 sm:$0xff]  }
 0x128   :  { %1480 = vmatpush1.bf16.msra.mxu0 %v6155_v33  ;;  %v6252_v33 = vld [vmem:[#allocation7 + $0x48c] ss:$16 sps:$4 sm:$0xff]  }
 0x129   :  { %1642 = vmatpush1.bf16.msra.mxu1 %v6158_v34  ;;  %1481 = vmatprep.subr.bf16.mxu0 %v6163_v36  ;;  %v6247_v34 = vld [vmem:[#allocation7 + $0x4a0] ss:$16 sps:$4 sm:$0xff]   ;;  %v6255_v36 = vld [vmem:[#allocation7 + $0x4c4] ss:$16 sps:$4 sm:$0xff]  }
 0x12a   :  { %1643 = vmatprep.subr.bf16.mxu1 %v6166_v37  ;;  %v6258_v37 = vld [vmem:[#allocation7 + $0x4ac] ss:$16 sps:$4 sm:$0xff]  }
 0x12c   :  { %1482 = vmatpush1.bf16.msra.mxu0 %v6161_v38  ;;  %v6253_v38 = vld [vmem:[#allocation7 + $0x4c0] ss:$16 sps:$4 sm:$0xff]  }
 0x12d   :  { %1644 = vmatpush1.bf16.msra.mxu1 %v6164_v39  ;;  %1483 = vmatprep.subr.bf16.mxu0 %v6169_v40  ;;  %v6256_v39 = vld [vmem:[#allocation7 + $0x4a8] ss:$16 sps:$4 sm:$0xff]   ;;  %v6261_v40 = vld [vmem:[#allocation7 + $0x4e4] ss:$16 sps:$4 sm:$0xff]  }
 0x12e   :  { %1645 = vmatprep.subr.bf16.mxu1 %v6172_v41  ;;  %v6264_v41 = vld [vmem:[#allocation7 + $0x4cc] ss:$16 sps:$4 sm:$0xff]  }
 0x130   :  { %1484 = vmatpush1.bf16.msra.mxu0 %v6167_v42  ;;  %v6259_v42 = vld [vmem:[#allocation7 + $0x4e0] ss:$16 sps:$4 sm:$0xff]  }
 0x131   :  { %1646 = vmatpush1.bf16.msra.mxu1 %v6170_v43  ;;  %1485 = vmatprep.subr.bf16.mxu0 %v6175_v44  ;;  %v6262_v43 = vld [vmem:[#allocation7 + $0x4c8] ss:$16 sps:$4 sm:$0xff]   ;;  %v6267_v44 = vld [vmem:[#allocation7 + $0x504] ss:$16 sps:$4 sm:$0xff]  }
 0x132   :  { %1647 = vmatprep.subr.bf16.mxu1 %v6178_v45  ;;  %v6270_v45 = vld [vmem:[#allocation7 + $0x4ec] ss:$16 sps:$4 sm:$0xff]  }
 0x134   :  { %1486 = vmatpush1.bf16.msra.mxu0 %v6173_v46  ;;  %v6265_v46 = vld [vmem:[#allocation7 + $0x500] ss:$16 sps:$4 sm:$0xff]  }
 0x135   :  { %1648 = vmatpush1.bf16.msra.mxu1 %v6176_v47  ;;  %1487 = vmatprep.subr.bf16.mxu0 %v6181_v48  ;;  %v6268_v47 = vld [vmem:[#allocation7 + $0x4e8] ss:$16 sps:$4 sm:$0xff]   ;;  %v6273_v48 = vld [vmem:[#allocation7 + $0x524] ss:$16 sps:$4 sm:$0xff]  }
 0x136   :  { %1649 = vmatprep.subr.bf16.mxu1 %v6184_v49  ;;  %v6276_v49 = vld [vmem:[#allocation7 + $0x50c] ss:$16 sps:$4 sm:$0xff]  }
 0x138   :  { %1488 = vmatpush1.bf16.msra.mxu0 %v6179_v50  ;;  %v6271_v50 = vld [vmem:[#allocation7 + $0x520] ss:$16 sps:$4 sm:$0xff]  }
 0x139   :  { %1650 = vmatpush1.bf16.msra.mxu1 %v6182_v51  ;;  %1489 = vmatprep.subr.bf16.mxu0 %v6187_v52  ;;  %v6274_v51 = vld [vmem:[#allocation7 + $0x508] ss:$16 sps:$4 sm:$0xff]   ;;  %v6279_v52 = vld [vmem:[#allocation7 + $0x544] ss:$16 sps:$4 sm:$0xff]  }
 0x13a   :  { %1651 = vmatprep.subr.bf16.mxu1 %v6190_v53  ;;  %v6282_v53 = vld [vmem:[#allocation7 + $0x52c] ss:$16 sps:$4 sm:$0xff]  }
 0x13c   :  { %1490 = vmatpush1.bf16.msra.mxu0 %v6185_v54  ;;  %v6277_v54 = vld [vmem:[#allocation7 + $0x540] ss:$16 sps:$4 sm:$0xff]  }
 0x13d   :  { %1652 = vmatpush1.bf16.msra.mxu1 %v6188_v55  ;;  %1491 = vmatprep.subr.bf16.mxu0 %v6193_v56  ;;  %v6280_v55 = vld [vmem:[#allocation7 + $0x528] ss:$16 sps:$4 sm:$0xff]   ;;  %v6285_v56 = vld [vmem:[#allocation7 + $0x564] ss:$16 sps:$4 sm:$0xff]  }
 0x13e   :  { %1653 = vmatprep.subr.bf16.mxu1 %v6196_v57  ;;  %v6288_v57 = vld [vmem:[#allocation7 + $0x54c] ss:$16 sps:$4 sm:$0xff]  }
 0x140   :  { %1492 = vmatpush1.bf16.msra.mxu0 %v6191_v58  ;;  %v6283_v58 = vld [vmem:[#allocation7 + $0x560] ss:$16 sps:$4 sm:$0xff]  }
 0x141   :  { %1654 = vmatpush1.bf16.msra.mxu1 %v6194_v59  ;;  %1493 = vmatprep.subr.bf16.mxu0 %v6199_v60  ;;  %v6286_v59 = vld [vmem:[#allocation7 + $0x548] ss:$16 sps:$4 sm:$0xff]   ;;  %v6291_v60 = vld [vmem:[#allocation7 + $0x584] ss:$16 sps:$4 sm:$0xff]  }
 0x142   :  { %1655 = vmatprep.subr.bf16.mxu1 %v6202_v61  ;;  %v6294_v61 = vld [vmem:[#allocation7 + $0x56c] ss:$16 sps:$4 sm:$0xff]  }
 0x144   :  { %1494 = vmatpush1.bf16.msra.mxu0 %v6197_v62  ;;  %v6289_v62 = vld [vmem:[#allocation7 + $0x580] ss:$16 sps:$4 sm:$0xff]  }
 0x145   :  { %1656 = vmatpush1.bf16.msra.mxu1 %v6200_v63  ;;  %1495 = vmatprep.subr.bf16.mxu0 %v6205_v1  ;;  %v6292_v63 = vld [vmem:[#allocation7 + $0x568] ss:$16 sps:$4 sm:$0xff]   ;;  %v6297_v1 = vld [vmem:[#allocation7 + $0x5a4] ss:$16 sps:$4 sm:$0xff]  }
 0x146   :  { %1657 = vmatprep.subr.bf16.mxu1 %v6208_v2  ;;  %v6300_v2 = vld [vmem:[#allocation7 + $0x58c] ss:$16 sps:$4 sm:$0xff]  }
 0x148   :  { %1496 = vmatpush1.bf16.msra.mxu0 %v6203_v3  ;;  %v6295_v3 = vld [vmem:[#allocation7 + $0x5a0] ss:$16 sps:$4 sm:$0xff]  }
 0x149   :  { %1658 = vmatpush1.bf16.msra.mxu1 %v6206_v4  ;;  %1497 = vmatprep.subr.bf16.mxu0 %v6211_v5  ;;  %v6298_v4 = vld [vmem:[#allocation7 + $0x588] ss:$16 sps:$4 sm:$0xff]   ;;  %v6303_v5 = vld [vmem:[#allocation7 + $0x5c4] ss:$16 sps:$4 sm:$0xff]  }
 0x14a   :  { %1659 = vmatprep.subr.bf16.mxu1 %v6214_v6  ;;  %v6306_v6 = vld [vmem:[#allocation7 + $0x5ac] ss:$16 sps:$4 sm:$0xff]  }
 0x14c   :  { %1498 = vmatpush1.bf16.msra.mxu0 %v6209_v7  ;;  %v6301_v7 = vld [vmem:[#allocation7 + $0x5c0] ss:$16 sps:$4 sm:$0xff]  }
 0x14d   :  { %1660 = vmatpush1.bf16.msra.mxu1 %v6212_v8  ;;  %1508 = vmatprep.subr.bf16.mxu0 %v6219_v9  ;;  %v6304_v8 = vld [vmem:[#allocation7 + $0x5a8] ss:$16 sps:$4 sm:$0xff]   ;;  %v6309_v9 = vld [vmem:[#allocation7 + $0x5e4] ss:$16 sps:$4 sm:$0xff]  }
 0x14e   :  { %1661 = vmatprep.subr.bf16.mxu1 %v6222_v10  ;;  %v6312_v10 = vld [vmem:[#allocation7 + $0x5cc] ss:$16 sps:$4 sm:$0xff]  }
 0x14f   :  { %1500 = vmatmul.mubr.bf16.vlgmr.msra.gmra.mrb[0].mxu0 %v5224_v11 }
 0x150   :  { %1509 = vmatpush1.bf16.msra.mxu0 %v6217_v12  ;;  %1540 = vmatprep.mubr.bf16.mxu0 %v5227_v17  ;;  %v6310_v12 = vld [vmem:[#allocation7 + $0x5c8] ss:$16 sps:$4 sm:$0xff]  }
 0x151   :  { %1662 = vmatpush1.bf16.msra.mxu1 %v6220_v13  ;;  %1510 = vmatprep.subr.bf16.mxu0 %v6225_v14  ;;  %v6317_v13 = vld [vmem:[#allocation7 + $0x5ec] ss:$16 sps:$4 sm:$0xff]  }
 0x152   :  { %1672 = vmatprep.subr.bf16.mxu1 %v6228_v15  ;;  %v6323_v14 = vld [vmem:[#allocation8 + $0x4] ss:$8 sps:$4 sm:$0xff]   ;;  %v6315_v15 = vld [vmem:[#allocation7 + $0x5e8] ss:$16 sps:$4 sm:$0xff]  }
 0x154   :  { %1664 = vmatmul.mubr.bf16.vlgmr.msra.gmra.mrb[4].mxu1 %v5224_v11  ;;  %1511 = vmatpush1.bf16.msra.mxu0 %v6223_v18  ;;  %v6307_v11 = vld [vmem:[#allocation7 + $0x5e0] ss:$16 sps:$4 sm:$0xff]   ;;  %v5226_v18 = vcombine.low %v7503_v16, %v7503_v16  ;;  %v6332_v16 = vld [vmem:[#allocation8 + $0x34] ss:$8 sps:$4 sm:$0xff]  }
 0x155   :  { %1673 = vmatpush1.bf16.msra.mxu1 %v6226_v19  ;;  %1512 = vmatprep.subr.bf16.mxu0 %v6231_v20  ;;  %v6320_v19 = vld [vmem:[#allocation7 + $0x60c] ss:$16 sps:$4 sm:$0xff]  }
 0x156   :  { %1674 = vmatprep.subr.bf16.mxu1 %v6234_v21  ;;  %1704 = vmatprep.mubr.bf16.mxu1 %v5227_v17  ;;  %v6321_v17 = vld [vmem:[#allocation8] ss:$8 sps:$4 sm:$0xff]   ;;  %v6326_v20 = vld [vmem:[#allocation8 + $0x14] ss:$8 sps:$4 sm:$0xff]  }
 0x157   :  { %v6318_v21 = vld [vmem:[#allocation7 + $0x608] ss:$16 sps:$4 sm:$0xff]  }
 0x158   :  { %1513 = vmatpush1.bf16.msra.mxu0 %v6229_v22  ;;  %v6324_v22 = vld [vmem:[#allocation8 + $0x10] ss:$8 sps:$4 sm:$0xff]  }
 0x159   :  { %1675 = vmatpush1.bf16.msra.mxu1 %v6232_v23  ;;  %1514 = vmatprep.subr.bf16.mxu0 %v6237_v24  ;;  %v6329_v23 = vld [vmem:[#allocation8 + $0x24] ss:$8 sps:$4 sm:$0xff]   ;;  %v6327_v24 = vld [vmem:[#allocation8 + $0x20] ss:$8 sps:$4 sm:$0xff]  }
 0x15a   :  { %1676 = vmatprep.subr.bf16.mxu1 %v6240_v25  ;;  %v6330_v25 = vld [vmem:[#allocation8 + $0x30] ss:$8 sps:$4 sm:$0xff]  }
 0x15c   :  { %1515 = vmatpush1.bf16.msra.mxu0 %v6235_v26  ;;  %v6335_v26 = vld [vmem:[#allocation8 + $0x44] ss:$8 sps:$4 sm:$0xff]  }
 0x15d   :  { %1677 = vmatpush1.bf16.msra.mxu1 %v6238_v27  ;;  %1516 = vmatprep.subr.bf16.mxu0 %v6243_v28  ;;  %v6333_v27 = vld [vmem:[#allocation8 + $0x40] ss:$8 sps:$4 sm:$0xff]   ;;  %v6338_v28 = vld [vmem:[#allocation8 + $0x54] ss:$8 sps:$4 sm:$0xff]  }
 0x15e   :  { %1678 = vmatprep.subr.bf16.mxu1 %v6246_v29  ;;  %v6935_v29 = vld [vmem:[#allocation2 + $0x18] ss:$0 sps:$4 sm:$0xff]  }
 0x160   :  { %1517 = vmatpush1.bf16.msra.mxu0 %v6241_v30  ;;  %v6336_v30 = vld [vmem:[#allocation8 + $0x50] ss:$8 sps:$4 sm:$0xff]  }
 0x161   :  { %1679 = vmatpush1.bf16.msra.mxu1 %v6244_v31  ;;  %1518 = vmatprep.subr.bf16.mxu0 %v6249_v32  ;;  %v6341_v31 = vld [vmem:[#allocation8 + $0x64] ss:$8 sps:$4 sm:$0xff]   ;;  %v6339_v32 = vld [vmem:[#allocation8 + $0x60] ss:$8 sps:$4 sm:$0xff]  }
 0x162   :  { %1680 = vmatprep.subr.bf16.mxu1 %v6252_v33  ;;  %v6344_v33 = vld [vmem:[#allocation8 + $0x74] ss:$8 sps:$4 sm:$0xff]  }
 0x164   :  { %1519 = vmatpush1.bf16.msra.mxu0 %v6247_v34 }
 0x165   :  { %1681 = vmatpush1.bf16.msra.mxu1 %v6250_v35  ;;  %1520 = vmatprep.subr.bf16.mxu0 %v6255_v36  ;;  %v6342_v36 = vld [vmem:[#allocation8 + $0x70] ss:$8 sps:$4 sm:$0xff]  }
 0x166   :  { %1682 = vmatprep.subr.bf16.mxu1 %v6258_v37 }
 0x168   :  { %1521 = vmatpush1.bf16.msra.mxu0 %v6253_v38  ;;  %v6347_v38 = vld [vmem:[#allocation8 + $0x84] ss:$8 sps:$4 sm:$0xff]  }
 0x169   :  { %1683 = vmatpush1.bf16.msra.mxu1 %v6256_v39  ;;  %1522 = vmatprep.subr.bf16.mxu0 %v6261_v40  ;;  %v6345_v40 = vld [vmem:[#allocation8 + $0x80] ss:$8 sps:$4 sm:$0xff]  }
 0x16a   :  { %1684 = vmatprep.subr.bf16.mxu1 %v6264_v41  ;;  %v6350_v41 = vld [vmem:[#allocation8 + $0x94] ss:$8 sps:$4 sm:$0xff]  }
 0x16c   :  { %1523 = vmatpush1.bf16.msra.mxu0 %v6259_v42  ;;  %v6348_v42 = vld [vmem:[#allocation8 + $0x90] ss:$8 sps:$4 sm:$0xff]  }
 0x16d   :  { %1685 = vmatpush1.bf16.msra.mxu1 %v6262_v43  ;;  %1524 = vmatprep.subr.bf16.mxu0 %v6267_v44  ;;  %v6353_v43 = vld [vmem:[#allocation8 + $0xa4] ss:$8 sps:$4 sm:$0xff]   ;;  %v6351_v44 = vld [vmem:[#allocation8 + $0xa0] ss:$8 sps:$4 sm:$0xff]  }
 0x16e   :  { %1686 = vmatprep.subr.bf16.mxu1 %v6270_v45  ;;  %v6356_v45 = vld [vmem:[#allocation8 + $0xb4] ss:$8 sps:$4 sm:$0xff]  }
 0x170   :  { %1525 = vmatpush1.bf16.msra.mxu0 %v6265_v46  ;;  %v6354_v46 = vld [vmem:[#allocation8 + $0xb0] ss:$8 sps:$4 sm:$0xff]  }
 0x171   :  { %1687 = vmatpush1.bf16.msra.mxu1 %v6268_v47  ;;  %1526 = vmatprep.subr.bf16.mxu0 %v6273_v48  ;;  %v6359_v47 = vld [vmem:[#allocation8 + $0xc4] ss:$8 sps:$4 sm:$0xff]   ;;  %v6357_v48 = vld [vmem:[#allocation8 + $0xc0] ss:$8 sps:$4 sm:$0xff]  }
 0x172   :  { %1688 = vmatprep.subr.bf16.mxu1 %v6276_v49  ;;  %v6362_v49 = vld [vmem:[#allocation8 + $0xd4] ss:$8 sps:$4 sm:$0xff]  }
 0x174   :  { %1527 = vmatpush1.bf16.msra.mxu0 %v6271_v50  ;;  %v6360_v50 = vld [vmem:[#allocation8 + $0xd0] ss:$8 sps:$4 sm:$0xff]  }
 0x175   :  { %1689 = vmatpush1.bf16.msra.mxu1 %v6274_v51  ;;  %1528 = vmatprep.subr.bf16.mxu0 %v6279_v52  ;;  %v6365_v51 = vld [vmem:[#allocation8 + $0xe4] ss:$8 sps:$4 sm:$0xff]   ;;  %v6363_v52 = vld [vmem:[#allocation8 + $0xe0] ss:$8 sps:$4 sm:$0xff]  }
 0x176   :  { %1690 = vmatprep.subr.bf16.mxu1 %v6282_v53  ;;  %v6368_v53 = vld [vmem:[#allocation8 + $0xf4] ss:$8 sps:$4 sm:$0xff]  }
 0x178   :  { %1529 = vmatpush1.bf16.msra.mxu0 %v6277_v54  ;;  %v6366_v54 = vld [vmem:[#allocation8 + $0xf0] ss:$8 sps:$4 sm:$0xff]  }
 0x179   :  { %1691 = vmatpush1.bf16.msra.mxu1 %v6280_v55  ;;  %1530 = vmatprep.subr.bf16.mxu0 %v6285_v56  ;;  %v6371_v55 = vld [vmem:[#allocation8 + $0x104] ss:$8 sps:$4 sm:$0xff]  }
 0x17a   :  { %1692 = vmatprep.subr.bf16.mxu1 %v6288_v57  ;;  %v6417_v56 = vld [vmem:[#allocation10 + $0x40] sm:$0xff]  }
 0x17b   :  { %v6418_v57 = vld [vmem:[#allocation10] sm:$0xff]  }
 0x17c   :  { %1531 = vmatpush1.bf16.msra.mxu0 %v6283_v58  ;;  %v6419_v58 = vld [vmem:[#allocation10 + $0x48] sm:$0xff]  }
 0x17d   :  { %1693 = vmatpush1.bf16.msra.mxu1 %v6286_v59  ;;  %1532 = vmatprep.subr.bf16.mxu0 %v6291_v60  ;;  %v6420_v59 = vld [vmem:[#allocation10 + $0x8] sm:$0xff]   ;;  %v6421_v60 = vld [vmem:[#allocation10 + $0x50] sm:$0xff]  }
 0x17e   :  { %1694 = vmatprep.subr.bf16.mxu1 %v6294_v61  ;;  %v6422_v61 = vld [vmem:[#allocation10 + $0x10] sm:$0xff]  }
 0x180   :  { %1533 = vmatpush1.bf16.msra.mxu0 %v6289_v62  ;;  %v6423_v62 = vld [vmem:[#allocation10 + $0x58] sm:$0xff]  }
 0x181   :  { %1695 = vmatpush1.bf16.msra.mxu1 %v6292_v63  ;;  %1534 = vmatprep.subr.bf16.mxu0 %v6297_v1  ;;  %v6424_v63 = vld [vmem:[#allocation10 + $0x18] sm:$0xff]   ;;  %v6425_v1 = vld [vmem:[#allocation10 + $0x60] sm:$0xff]  }
 0x182   :  { %1696 = vmatprep.subr.bf16.mxu1 %v6300_v2  ;;  %v6426_v2 = vld [vmem:[#allocation10 + $0x20] sm:$0xff]  }
 0x184   :  { %1535 = vmatpush1.bf16.msra.mxu0 %v6295_v3  ;;  %v6427_v3 = vld [vmem:[#allocation10 + $0x68] sm:$0xff]  }
 0x185   :  { %1697 = vmatpush1.bf16.msra.mxu1 %v6298_v4  ;;  %1536 = vmatprep.subr.bf16.mxu0 %v6303_v5  ;;  %v6428_v4 = vld [vmem:[#allocation10 + $0x28] sm:$0xff]   ;;  %v398_v5 = vlaneseq }
 0x186   :  { %1698 = vmatprep.subr.bf16.mxu1 %v6306_v6 }
 0x187   :  { %v7515_v6 = vshrl.u32 %v398_v5, 7 }
 0x188   :  { %1537 = vmatpush1.bf16.msra.mxu0 %v6301_v7 }
 0x189   :  { %1699 = vmatpush1.bf16.msra.mxu1 %v6304_v8  ;;  %1538 = vmatprep.subr.bf16.mxu0 %v6309_v9  ;;  %v7518_v7 = vsub.s32 0, %v7515_v6  ;;  %v7523_v8 = vld [vmem:[%s7682_s1] sm:$0xf]  ;;  %v7526_v9 = vsub.s32 1, %v7515_v6 }
 0x18a   :  { %1700 = vmatprep.subr.bf16.mxu1 %v6312_v10 }
 0x18b   :  { %v401_v10 = vrot.slane %v7523_v8, %v7518_v7 }
 0x18c   :  { %1539 = vmatpush1.bf16.msra.mxu0 %v6307_v11  ;;  %v405_v11 = vrot.slane %v7523_v8, %v7526_v9 }
 0x18d   :  { %1701 = vmatpush1.bf16.msra.mxu1 %v6310_v12  ;;  %2158 = vmatprep.subr.bf16.mxu0 %v6323_v14 }
 0x18e   :  { %1702 = vmatprep.subr.bf16.mxu1 %v6317_v13 }
 0x18f   :  { %1541 = vmatmul.mubr.bf16.vlgmr.msra.gmra.mrb[0].mxu0 %v5226_v18 }
 0x190   :  { %2159 = vmatpush1.bf16.msra.mxu0 %v6321_v17 }
 0x191   :  { %1703 = vmatpush1.bf16.msra.mxu1 %v6315_v15  ;;  %2160 = vmatprep.subr.bf16.mxu0 %v6326_v20 }
 0x192   :  { %1713 = vmatprep.subr.bf16.mxu1 %v6320_v19 }
 0x194   :  { %1705 = vmatmul.mubr.bf16.vlgmr.msra.gmra.mrb[4].mxu1 %v5226_v18  ;;  %2161 = vmatpush1.bf16.msra.mxu0 %v6324_v22 }
 0x195   :  { %1714 = vmatpush1.bf16.msra.mxu1 %v6318_v21  ;;  %1745 = vmatprep.mubr.bf16.mxu1 %v7234_v0 }
 0x196   :  { %2162 = vmatprep.subr.bf16.mxu0 %v6329_v23  ;;  %5852 = vmatprep.subr.bf16.mxu1 %v6417_v56  ;;  %v6407_v56 = vld [vmem:[#allocation8 + $0x1c4] ss:$8 sps:$4 sm:$0xff]  }
 0x198   :  { %2163 = vmatpush1.bf16.msra.mxu0 %v6327_v24  ;;  %v6369_v24 = vld [vmem:[#allocation8 + $0x100] ss:$8 sps:$4 sm:$0xff]  }
 0x199   :  { %2164 = vmatprep.subr.bf16.mxu0 %v6332_v16 }
 0x19c   :  { %2165 = vmatpush1.bf16.msra.mxu0 %v6330_v25  ;;  %v6374_v25 = vld [vmem:[#allocation8 + $0x114] ss:$8 sps:$4 sm:$0xff]  }
 0x19d   :  { %2166 = vmatprep.subr.bf16.mxu0 %v6335_v26  ;;  %v7535_v26 = vsub.s32 3, %v7515_v6 }
 0x1a0   :  { %5426 = vmatmul.mubr.msk.bf16.vlgmr.msra.gmra.mrb[4].mxu1 %vm1422_vm0, %v6935_v29  ;;  %2167 = vmatpush1.bf16.msra.mxu0 %v6333_v27  ;;  %v6372_v27 = vld [vmem:[#allocation8 + $0x110] ss:$8 sps:$4 sm:$0xff]   ;;  %v413_v29 = vrot.slane %v7523_v8, %v7535_v26 }
 0x1a1   :  { %2168 = vmatprep.subr.bf16.mxu0 %v6338_v28  ;;  %5853 = vmatpush3.bf16.msra.mxu1 %v6418_v57  ;;  %v6377_v28 = vld [vmem:[#allocation8 + $0x124] ss:$8 sps:$4 sm:$0xff]   ;;  %v6405_v57 = vld [vmem:[#allocation8 + $0x1c0] ss:$8 sps:$4 sm:$0xff]  }
 0x1a2   :  { %5854 = vmatprep.subr.bf16.mxu1 %v6419_v58  ;;  %v7540_v58 = vsub.s32 2, %v7515_v6 }
 0x1a4   :  { %2169 = vmatpush1.bf16.msra.mxu0 %v6336_v30 }
 0x1a5   :  { %2170 = vmatprep.subr.bf16.mxu0 %v6341_v31  ;;  %5855 = vmatpush3.bf16.msra.mxu1 %v6420_v59  ;;  %v6375_v31 = vld [vmem:[#allocation8 + $0x120] ss:$8 sps:$4 sm:$0xff]   ;;  %v6410_v59 = vld [vmem:[#allocation8 + $0x1d4] ss:$8 sps:$4 sm:$0xff]  }
 0x1a6   :  { %5856 = vmatprep.subr.bf16.mxu1 %v6421_v60  ;;  %v6408_v60 = vld [vmem:[#allocation8 + $0x1d0] ss:$8 sps:$4 sm:$0xff]  }
 0x1a7   :  { %v7511_v34 = vpop.f32.mrb[0].mxu1 }
 0x1a8   :  { %v7513_v35 = vpop.f32.mrb[1].mxu1  ;;  %2171 = vmatpush1.bf16.msra.mxu0 %v6339_v32 }
 0x1a9   :  { %v1587_v37 = vpop.f32.mrb[2].mxu1  ;;  %2172 = vmatprep.subr.bf16.mxu0 %v6344_v33  ;;  %5857 = vmatpush3.bf16.msra.mxu1 %v6422_v61  ;;  %v6380_v33 = vld [vmem:[#allocation8 + $0x134] ss:$8 sps:$4 sm:$0xff]   ;;  %v409_v61 = vrot.slane %v7523_v8, %v7540_v58 }
 0x1aa   :  { %v1588_v39 = vpop.f32.mrb[3].mxu1  ;;  %5858 = vmatprep.subr.bf16.mxu1 %v6423_v62  ;;  %v6413_v62 = vld [vmem:[#allocation8 + $0x1e4] ss:$8 sps:$4 sm:$0xff]   ;;  %v6432_v8 = vld [vmem:[#allocation10 + $0x38] sm:$0xff]  }
 0x1ab   :  { %v6383_v39 = vld [vmem:[#allocation8 + $0x144] ss:$8 sps:$4 sm:$0xff]  }
 0x1ac   :  { %2173 = vmatpush1.bf16.msra.mxu0 %v6342_v36 }
 0x1ad   :  { %2174 = vmatprep.subr.bf16.mxu0 %v6347_v38  ;;  %5859 = vmatpush3.bf16.msra.mxu1 %v6424_v63  ;;  %v6378_v38 = vld [vmem:[#allocation8 + $0x130] ss:$8 sps:$4 sm:$0xff]   ;;  %v6411_v63 = vld [vmem:[#allocation8 + $0x1e0] ss:$8 sps:$4 sm:$0xff]  }
 0x1ae   :  { %5860 = vmatprep.subr.bf16.mxu1 %v6425_v1 }
 0x1b0   :  { %2175 = vmatpush1.bf16.msra.mxu0 %v6345_v40 }
 0x1b1   :  { %2176 = vmatprep.subr.bf16.mxu0 %v6350_v41  ;;  %5861 = vmatpush3.bf16.msra.mxu1 %v6426_v2  ;;  %v6381_v41 = vld [vmem:[#allocation8 + $0x140] ss:$8 sps:$4 sm:$0xff]   ;;  %v6416_v2 = vld [vmem:[#allocation8 + $0x1f4] ss:$8 sps:$4 sm:$0xff]  }
 0x1b2   :  { %5862 = vmatprep.subr.bf16.mxu1 %v6427_v3  ;;  %v6414_v3 = vld [vmem:[#allocation8 + $0x1f0] ss:$8 sps:$4 sm:$0xff]  }
 0x1b4   :  { %2177 = vmatpush1.bf16.msra.mxu0 %v6348_v42  ;;  %v6386_v42 = vld [vmem:[#allocation8 + $0x154] ss:$8 sps:$4 sm:$0xff]  }
 0x1b5   :  { %2178 = vmatprep.subr.bf16.mxu0 %v6353_v43  ;;  %5863 = vmatpush3.bf16.msra.mxu1 %v6428_v4  ;;  %v6384_v43 = vld [vmem:[#allocation8 + $0x150] ss:$8 sps:$4 sm:$0xff]  }
 0x1b8   :  { %2179 = vmatpush1.bf16.msra.mxu0 %v6351_v44  ;;  %v6389_v44 = vld [vmem:[#allocation8 + $0x164] ss:$8 sps:$4 sm:$0xff]  }
 0x1b9   :  { %2180 = vmatprep.subr.bf16.mxu0 %v6356_v45  ;;  %v6387_v45 = vld [vmem:[#allocation8 + $0x160] ss:$8 sps:$4 sm:$0xff]  }
 0x1bc   :  { %2181 = vmatpush1.bf16.msra.mxu0 %v6354_v46  ;;  %v6392_v46 = vld [vmem:[#allocation8 + $0x174] ss:$8 sps:$4 sm:$0xff]  }
 0x1bd   :  { %2182 = vmatprep.subr.bf16.mxu0 %v6359_v47  ;;  %v6390_v47 = vld [vmem:[#allocation8 + $0x170] ss:$8 sps:$4 sm:$0xff]  }
 0x1c0   :  { %2183 = vmatpush1.bf16.msra.mxu0 %v6357_v48  ;;  %v6395_v48 = vld [vmem:[#allocation8 + $0x184] ss:$8 sps:$4 sm:$0xff]  }
 0x1c1   :  { %2184 = vmatprep.subr.bf16.mxu0 %v6362_v49  ;;  %v6393_v49 = vld [vmem:[#allocation8 + $0x180] ss:$8 sps:$4 sm:$0xff]  }
 0x1c4   :  { %2185 = vmatpush1.bf16.msra.mxu0 %v6360_v50  ;;  %v6398_v50 = vld [vmem:[#allocation8 + $0x194] ss:$8 sps:$4 sm:$0xff]  }
 0x1c5   :  { %2186 = vmatprep.subr.bf16.mxu0 %v6365_v51  ;;  %v6396_v51 = vld [vmem:[#allocation8 + $0x190] ss:$8 sps:$4 sm:$0xff]  }
 0x1c8   :  { %2187 = vmatpush1.bf16.msra.mxu0 %v6363_v52  ;;  %v6401_v52 = vld [vmem:[#allocation8 + $0x1a4] ss:$8 sps:$4 sm:$0xff]  }
 0x1c9   :  { %2188 = vmatprep.subr.bf16.mxu0 %v6368_v53  ;;  %v6399_v53 = vld [vmem:[#allocation8 + $0x1a0] ss:$8 sps:$4 sm:$0xff]  }
 0x1cc   :  { %2189 = vmatpush1.bf16.msra.mxu0 %v6366_v54  ;;  %v6404_v54 = vld [vmem:[#allocation8 + $0x1b4] ss:$8 sps:$4 sm:$0xff]  }
 0x1cd   :  { %2199 = vmatprep.subr.bf16.mxu0 %v6371_v55  ;;  %v6402_v55 = vld [vmem:[#allocation8 + $0x1b0] ss:$8 sps:$4 sm:$0xff]  }
 0x262   :  { %v1542_v12 = vpop.f32.mrb[0].mxu0 }
 0x263   :  { %v5947_v13 = vadd.f32 %v1542_v12, %v401_v10  ;;  %v1544_v14 = vpop.f32.mrb[1].mxu0  ;;  %v6429_v10 = vld [vmem:[#allocation10 + $0x70] sm:$0xff]   ;;  %v6431_v12 = vld [vmem:[#allocation10 + $0x78] sm:$0xff]  }
 0x264   :  { %v5949_v15 = vadd.f32 %v1544_v14, %v405_v11  ;;  %v1546_v17 = vpop.f32.mrb[2].mxu0  ;;  %v6430_v11 = vld [vmem:[#allocation10 + $0x30] sm:$0xff]   ;;  %5864 = vmatprep.subr.bf16.mxu1 %v6429_v10  ;;  %v1826_v14 = vld [vmem:[%s7655_s5] sm:$0x3] }
 0x265   :  { %v5948_v18 = vadd.f32 %v5947_v13, %v7511_v34  ;;  %v1547_v19 = vpop.f32.mrb[3].mxu0  ;;  %5865 = vmatpush3.bf16.msra.mxu1 %v6430_v11  ;;  %v6435_v13 = vld [vmem:[#allocation11 + $0x4] ss:$8 sps:$4 sm:$0xff]   ;;  %v1835_v17 = vrot.slane %v1826_v14, %v7526_v9 }
 0x266   :  { %v5950_v20 = vadd.f32 %v5949_v15, %v7513_v35  ;;  %5866 = vmatprep.subr.bf16.mxu1 %v6431_v12  ;;  %v1831_v15 = vrot.slane %v1826_v14, %v7518_v7  ;;  %v2570_v14 = vld [vmem:[#allocation5] sm:$0xf] }
 0x267   :  { %v1754_v21 = vmax.f32 %v5948_v18, 0.0 }
 0x268   :  { %v1755_v22 = vmax.f32 %v5950_v20, 0.0 }
 0x269   :  { %v1758_v16 = vpack.c.bf16 %v1754_v21, %v1754_v21  ;;  %5867 = vmatpush3.bf16.msra.mxu1 %v6432_v8 }
 0x26a   :  { %v1759_v23 = vpack.c.bf16 %v1755_v22, %v1755_v22  ;;  %2529 = vmatprep.subr.bf16.mxu1 %v6435_v13 }
 0x26c   :  { %2190 = vmatprep.mubr.bf16.mxu0 %v1759_v23 }
 0x26d   :  { %2191 = vmatmul.mubr.bf16.vlgmr.msra.gmra.mrb[4].mxu0 %v1758_v16 }
 0x26e   :  { %2200 = vmatpush1.bf16.msra.mxu0 %v6369_v24 }
 0x26f   :  { %2201 = vmatprep.subr.bf16.mxu0 %v6374_v25 }
 0x272   :  { %2202 = vmatpush1.bf16.msra.mxu0 %v6372_v27  ;;  %v6433_v27 = vld [vmem:[#allocation11] ss:$8 sps:$4 sm:$0xff]  }
 0x273   :  { %v1747_v30 = vpop.f32.mrb[4].mxu1  ;;  %2203 = vmatprep.subr.bf16.mxu0 %v6377_v28 }
 0x274   :  { %v1749_v32 = vpop.f32.mrb[5].mxu1  ;;  %v5951_v1 = vadd.f32 %v1747_v30, %v409_v61  ;;  %v6436_v30 = vld [vmem:[#allocation11 + $0x10] ss:$8 sps:$4 sm:$0xff]  }
 0x275   :  { %v5952_v34 = vadd.f32 %v1749_v32, %v413_v29  ;;  %v1751_v35 = vpop.f32.mrb[6].mxu1  ;;  %v6438_v29 = vld [vmem:[#allocation11 + $0x14] ss:$8 sps:$4 sm:$0xff]   ;;  %v6439_v32 = vld [vmem:[#allocation11 + $0x20] ss:$8 sps:$4 sm:$0xff]  }
 0x276   :  { %v1752_v36 = vpop.f32.mrb[7].mxu1  ;;  %2204 = vmatpush1.bf16.msra.mxu0 %v6375_v31  ;;  %v1756_v4 = vmax.f32 %v5951_v1, 0.0  ;;  %v6441_v31 = vld [vmem:[#allocation11 + $0x24] ss:$8 sps:$4 sm:$0xff]   ;;  %v6464_v61 = vld [vmem:[#allocation13 + $0x38] sm:$0xff]  }
 0x277   :  { %v1757_v37 = vmax.f32 %v5952_v34, 0.0  ;;  %2205 = vmatprep.subr.bf16.mxu0 %v6380_v33  ;;  %v6444_v33 = vld [vmem:[#allocation11 + $0x34] ss:$8 sps:$4 sm:$0xff]   ;;  %v6442_v34 = vld [vmem:[#allocation11 + $0x30] ss:$8 sps:$4 sm:$0xff]  }
 0x278   :  { %v1760_v5 = vpack.c.bf16 %v1756_v4, %v1756_v4  ;;  %v6447_v35 = vld [vmem:[#allocation11 + $0x44] ss:$8 sps:$4 sm:$0xff]   ;;  %v6445_v36 = vld [vmem:[#allocation11 + $0x40] ss:$8 sps:$4 sm:$0xff]  }
 0x279   :  { %v1761_v40 = vpack.c.bf16 %v1757_v37, %v1757_v37  ;;  %v6450_v37 = vld [vmem:[#allocation11 + $0x54] ss:$8 sps:$4 sm:$0xff]  }
 0x27a   :  { %2206 = vmatpush1.bf16.msra.mxu0 %v6378_v38  ;;  %v6448_v38 = vld [vmem:[#allocation11 + $0x50] ss:$8 sps:$4 sm:$0xff]  }
 0x27b   :  { %2231 = vmatprep.mubr.bf16.mxu0 %v1761_v40  ;;  %2207 = vmatprep.subr.bf16.mxu0 %v6383_v39  ;;  %v6453_v39 = vld [vmem:[#allocation11 + $0x64] ss:$8 sps:$4 sm:$0xff]   ;;  %v6451_v40 = vld [vmem:[#allocation11 + $0x60] ss:$8 sps:$4 sm:$0xff]  }
 0x27e   :  { %2208 = vmatpush1.bf16.msra.mxu0 %v6381_v41  ;;  %v6456_v41 = vld [vmem:[#allocation11 + $0x74] ss:$8 sps:$4 sm:$0xff]  }
 0x27f   :  { %2209 = vmatprep.subr.bf16.mxu0 %v6386_v42  ;;  %v6454_v42 = vld [vmem:[#allocation11 + $0x70] ss:$8 sps:$4 sm:$0xff]  }
 0x282   :  { %2210 = vmatpush1.bf16.msra.mxu0 %v6384_v43  ;;  %v7235_v43 = vmov 0.0  }
 0x283   :  { %2211 = vmatprep.subr.bf16.mxu0 %v6389_v44 }
 0x286   :  { %2212 = vmatpush1.bf16.msra.mxu0 %v6387_v45  ;;  %v5491_v45 = vld [vmem:[%s7657_s7] ss:$0 sm:$0xff] }
 0x287   :  { %2213 = vmatprep.subr.bf16.mxu0 %v6392_v46 }
 0x28a   :  { %2214 = vmatpush1.bf16.msra.mxu0 %v6390_v47 }
 0x28b   :  { %2215 = vmatprep.subr.bf16.mxu0 %v6395_v48 }
 0x28e   :  { %2216 = vmatpush1.bf16.msra.mxu0 %v6393_v49 }
 0x28f   :  { %2217 = vmatprep.subr.bf16.mxu0 %v6398_v50 }
 0x292   :  { %2218 = vmatpush1.bf16.msra.mxu0 %v6396_v51 }
 0x293   :  { %2219 = vmatprep.subr.bf16.mxu0 %v6401_v52  ;;  %v6457_v52 = vld [vmem:[#allocation13] sm:$0xff]  }
 0x296   :  { %2220 = vmatpush1.bf16.msra.mxu0 %v6399_v53 }
 0x297   :  { %2221 = vmatprep.subr.bf16.mxu0 %v6404_v54  ;;  %v6458_v54 = vld [vmem:[#allocation13 + $0x8] sm:$0xff]  }
 0x29a   :  { %2222 = vmatpush1.bf16.msra.mxu0 %v6402_v55  ;;  %v6459_v55 = vld [vmem:[#allocation13 + $0x10] sm:$0xff]  }
 0x29b   :  { %2223 = vmatprep.subr.bf16.mxu0 %v6407_v56  ;;  %v6460_v56 = vld [vmem:[#allocation13 + $0x18] sm:$0xff]  }
 0x29e   :  { %2224 = vmatpush1.bf16.msra.mxu0 %v6405_v57  ;;  %v6461_v57 = vld [vmem:[#allocation13 + $0x20] sm:$0xff]  }
 0x29f   :  { %2225 = vmatprep.subr.bf16.mxu0 %v6410_v59  ;;  %v6462_v59 = vld [vmem:[#allocation13 + $0x28] sm:$0xff]  }
 0x2a2   :  { %2226 = vmatpush1.bf16.msra.mxu0 %v6408_v60  ;;  %v6463_v60 = vld [vmem:[#allocation13 + $0x30] sm:$0xff]  }
 0x2a3   :  { %2227 = vmatprep.subr.bf16.mxu0 %v6413_v62  ;;  %v6467_v62 = vld [vmem:[#allocation14 + $0x4] ss:$8 sps:$4 sm:$0xff]  }
 0x2a6   :  { %2228 = vmatpush1.bf16.msra.mxu0 %v6411_v63  ;;  %v2437_v63 = vld [vmem:[%s7659_s9] sm:$0x3] }
 0x2a7   :  { %2229 = vmatprep.subr.bf16.mxu0 %v6416_v2  ;;  %v2442_v1 = vrot.slane %v2437_v63, %v7518_v7  ;;  %v2446_v2 = vrot.slane %v2437_v63, %v7526_v9  ;;  %v6569_v63 = vld [vmem:[#allocation16 + $0x1a4] ss:$16 sps:$4 sm:$0xff]  }
 0x2aa   :  { %2230 = vmatpush1.bf16.msra.mxu0 %v6414_v3 }
 0x2ad   :  { %2232 = vmatmul.mubr.bf16.vlgmr.msra.gmra.mrb[4].mxu0 %v1760_v5 }
 0x380   :  { %v2233_v18 = vpop.f32.mrb[4].mxu0 }
 0x381   :  { %v5953_v19 = vadd.f32 %v2233_v18, %v1831_v15  ;;  %v2235_v20 = vpop.f32.mrb[5].mxu0  ;;  %v2574_v15 = vunpack.c.l.bf16 %v2570_v14  ;;  %v6500_v14 = vld [vmem:[#allocation16 + $0x2c] ss:$16 sps:$4 sm:$0xff]  }
 0x382   :  { %v5954_v21 = vadd.f32 %v2235_v20, %v1835_v17  ;;  %v2237_v22 = vpop.f32.mrb[6].mxu0  ;;  %v6465_v20 = vld [vmem:[#allocation14] ss:$8 sps:$4 sm:$0xff]  }
 0x383   :  { %v2240_v23 = vmax.f32 %v5953_v19, 0.0  ;;  %v2238_v24 = vpop.f32.mrb[7].mxu0  ;;  %v6470_v22 = vld [vmem:[#allocation14 + $0x14] ss:$8 sps:$4 sm:$0xff]  }
 0x384   :  { %v2241_v16 = vmax.f32 %v5954_v21, 0.0  ;;  %v6473_v24 = vld [vmem:[#allocation14 + $0x24] ss:$8 sps:$4 sm:$0xff]  }
 0x385   :  { %v2242_v28 = vpack.c.bf16 %v2240_v23, %v2240_v23  ;;  %v6468_v23 = vld [vmem:[#allocation14 + $0x10] ss:$8 sps:$4 sm:$0xff]  }
 0x386   :  { %v2243_v25 = vpack.c.bf16 %v2241_v16, %v2241_v16  ;;  %v6471_v16 = vld [vmem:[#allocation14 + $0x20] ss:$8 sps:$4 sm:$0xff]  }
 0x388   :  { %2411 = vmatprep.mubr.bf16.mxu1 %v2243_v25  ;;  %v6476_v25 = vld [vmem:[#allocation14 + $0x34] ss:$8 sps:$4 sm:$0xff]  }
 0x389   :  { %2412 = vmatmul.mubr.bf16.vlgmr.msra.gmra.mrb[8].mxu1 %v2242_v28  ;;  %v6479_v28 = vld [vmem:[#allocation14 + $0x44] ss:$8 sps:$4 sm:$0xff]  }
 0x38a   :  { %2530 = vmatpush1.bf16.msra.mxu1 %v6433_v27  ;;  %2561 = vmatprep.mubr.bf16.mxu1 %v7234_v0  ;;  %v6474_v27 = vld [vmem:[#allocation14 + $0x30] ss:$8 sps:$4 sm:$0xff]  }
 0x38b   :  { %2531 = vmatprep.subr.bf16.mxu1 %v6438_v29  ;;  %v6477_v29 = vld [vmem:[#allocation14 + $0x40] ss:$8 sps:$4 sm:$0xff]  }
 0x38e   :  { %2532 = vmatpush1.bf16.msra.mxu1 %v6436_v30  ;;  %v6482_v30 = vld [vmem:[#allocation14 + $0x54] ss:$8 sps:$4 sm:$0xff]  }
 0x38f   :  { %2533 = vmatprep.subr.bf16.mxu1 %v6441_v31  ;;  %v6480_v31 = vld [vmem:[#allocation14 + $0x50] ss:$8 sps:$4 sm:$0xff]  }
 0x392   :  { %2534 = vmatpush1.bf16.msra.mxu1 %v6439_v32  ;;  %v6485_v32 = vld [vmem:[#allocation14 + $0x64] ss:$8 sps:$4 sm:$0xff]  }
 0x393   :  { %2535 = vmatprep.subr.bf16.mxu1 %v6444_v33  ;;  %v6488_v33 = vld [vmem:[#allocation14 + $0x74] ss:$8 sps:$4 sm:$0xff]  }
 0x396   :  { %2536 = vmatpush1.bf16.msra.mxu1 %v6442_v34  ;;  %v6486_v34 = vld [vmem:[#allocation14 + $0x70] ss:$8 sps:$4 sm:$0xff]  }
 0x397   :  { %2537 = vmatprep.subr.bf16.mxu1 %v6447_v35  ;;  %v6489_v35 = vld [vmem:[#allocation16] ss:$16 sps:$4 sm:$0xff]  }
 0x39a   :  { %2538 = vmatpush1.bf16.msra.mxu1 %v6445_v36  ;;  %v6491_v36 = vld [vmem:[#allocation16 + $0x4] ss:$16 sps:$4 sm:$0xff]  }
 0x39b   :  { %2539 = vmatprep.subr.bf16.mxu1 %v6450_v37  ;;  %v6494_v37 = vld [vmem:[#allocation16 + $0xc] ss:$16 sps:$4 sm:$0xff]   ;;  %3250 = vmatprep.subr.bf16.mxu0 %v6491_v36 }
 0x39c   :  { %3251 = vmatpush1.bf16.msra.mxu0 %v6489_v35  ;;  %v6558_v35 = vld [vmem:[#allocation16 + $0x168] ss:$16 sps:$4 sm:$0xff]   ;;  %v6566_v36 = vld [vmem:[#allocation16 + $0x18c] ss:$16 sps:$4 sm:$0xff]  }
 0x39e   :  { %2540 = vmatpush1.bf16.msra.mxu1 %v6448_v38  ;;  %v6497_v38 = vld [vmem:[#allocation16 + $0x24] ss:$16 sps:$4 sm:$0xff]  }
 0x39f   :  { %2541 = vmatprep.subr.bf16.mxu1 %v6453_v39  ;;  %v6495_v39 = vld [vmem:[#allocation16 + $0x20] ss:$16 sps:$4 sm:$0xff]   ;;  %3252 = vmatprep.subr.bf16.mxu0 %v6497_v38  ;;  %v6572_v38 = vld [vmem:[#allocation16 + $0x1ac] ss:$16 sps:$4 sm:$0xff]  }
 0x3a0   :  { %3253 = vmatpush1.bf16.msra.mxu0 %v6495_v39  ;;  %v6570_v39 = vld [vmem:[#allocation16 + $0x1a8] ss:$16 sps:$4 sm:$0xff]  }
 0x3a2   :  { %2542 = vmatpush1.bf16.msra.mxu1 %v6451_v40  ;;  %v6503_v40 = vld [vmem:[#allocation16 + $0x44] ss:$16 sps:$4 sm:$0xff]  }
 0x3a3   :  { %2543 = vmatprep.subr.bf16.mxu1 %v6456_v41  ;;  %v6501_v41 = vld [vmem:[#allocation16 + $0x40] ss:$16 sps:$4 sm:$0xff]   ;;  %3254 = vmatprep.subr.bf16.mxu0 %v6503_v40  ;;  %v6575_v40 = vld [vmem:[#allocation16 + $0x1c4] ss:$16 sps:$4 sm:$0xff]  }
 0x3a4   :  { %3255 = vmatpush1.bf16.msra.mxu0 %v6501_v41  ;;  %v6578_v41 = vld [vmem:[#allocation16 + $0x1cc] ss:$16 sps:$4 sm:$0xff]  }
 0x3a6   :  { %2544 = vmatpush1.bf16.msra.mxu1 %v6454_v42  ;;  %v6509_v42 = vld [vmem:[#allocation16 + $0x64] ss:$16 sps:$4 sm:$0xff]  }
 0x3a7   :  { %5927 = vmatprep.subr.bf16.mxu1 %v7235_v43  ;;  %3256 = vmatprep.subr.bf16.mxu0 %v6509_v42  ;;  %v6573_v42 = vld [vmem:[#allocation16 + $0x1c0] ss:$16 sps:$4 sm:$0xff]  }
 0x45c   :  { %v5868_v44 = vpop.f32.mrb[8].mxu1 }
 0x45d   :  { %v5869_v46 = vpop.f32.mrb[9].mxu1 }
 0x45e   :  { %v5870_v47 = vadd.f32 %v5869_v46, %v5868_v44  ;;  %v5871_v48 = vpop.f32.mrb[10].mxu1  ;;  %v6515_v44 = vld [vmem:[#allocation16 + $0x84] ss:$16 sps:$4 sm:$0xff]  }
 0x45f   :  { %v5872_v49 = vpop.f32.mrb[11].mxu1  ;;  %v6521_v46 = vld [vmem:[#allocation16 + $0xa4] ss:$16 sps:$4 sm:$0xff]  }
 0x460   :  { %v2414_v50 = vadd.f32 %v5870_v47, %v5491_v45  ;;  %v6513_v45 = vld [vmem:[#allocation16 + $0x80] ss:$16 sps:$4 sm:$0xff]   ;;  %v6527_v48 = vld [vmem:[#allocation16 + $0xc4] ss:$16 sps:$4 sm:$0xff]  }
 0x461   :  { %v6519_v47 = vld [vmem:[#allocation16 + $0xa0] ss:$16 sps:$4 sm:$0xff]  }
 0x462   :  { %v2419_v51 = vmax.f32 %v2414_v50, 0.0  ;;  %v6525_v49 = vld [vmem:[#allocation16 + $0xc0] ss:$16 sps:$4 sm:$0xff]   ;;  %v6533_v50 = vld [vmem:[#allocation16 + $0xe4] ss:$16 sps:$4 sm:$0xff]  }
 0x464   :  { %v2420_v53 = vpack.c.bf16 %v2419_v51, %v2419_v51  ;;  %v6531_v51 = vld [vmem:[#allocation16 + $0xe0] ss:$16 sps:$4 sm:$0xff]  }
 0x466   :  { %2562 = vmatmul.mubr.bf16.vlgmr.msra.gmra.mrb[12].mxu1 %v2420_v53  ;;  %v6537_v53 = vld [vmem:[#allocation16 + $0x100] ss:$16 sps:$4 sm:$0xff]  }
 0x467   :  { %5928 = vmatpush3.bf16.msra.mxu1 %v6457_v52  ;;  %5943 = vmatprep.mubr.msk.bf16.mxu1 %vm7236_vm1, %v7235_v43  ;;  %v6539_v52 = vld [vmem:[#allocation16 + $0x104] ss:$16 sps:$4 sm:$0xff]  }
 0x468   :  { %5929 = vmatprep.subr.bf16.mxu1 %v7235_v43 }
 0x46b   :  { %5930 = vmatpush3.bf16.msra.mxu1 %v6458_v54  ;;  %v6545_v54 = vld [vmem:[#allocation16 + $0x124] ss:$16 sps:$4 sm:$0xff]  }
 0x46c   :  { %5931 = vmatprep.subr.bf16.mxu1 %v7235_v43 }
 0x46f   :  { %5932 = vmatpush3.bf16.msra.mxu1 %v6459_v55  ;;  %v6543_v55 = vld [vmem:[#allocation16 + $0x120] ss:$16 sps:$4 sm:$0xff]  }
 0x470   :  { %5933 = vmatprep.subr.bf16.mxu1 %v7235_v43 }
 0x473   :  { %5934 = vmatpush3.bf16.msra.mxu1 %v6460_v56  ;;  %v6551_v56 = vld [vmem:[#allocation16 + $0x144] ss:$16 sps:$4 sm:$0xff]  }
 0x474   :  { %5935 = vmatprep.subr.bf16.mxu1 %v7235_v43 }
 0x477   :  { %5936 = vmatpush3.bf16.msra.mxu1 %v6461_v57  ;;  %v6549_v57 = vld [vmem:[#allocation16 + $0x140] ss:$16 sps:$4 sm:$0xff]  }
 0x478   :  { %5937 = vmatprep.subr.bf16.mxu1 %v7235_v43 }
 0x47b   :  { %5938 = vmatpush3.bf16.msra.mxu1 %v6462_v59  ;;  %v6557_v59 = vld [vmem:[#allocation16 + $0x164] ss:$16 sps:$4 sm:$0xff]  }
 0x47c   :  { %5939 = vmatprep.subr.bf16.mxu1 %v7235_v43 }
 0x47f   :  { %5940 = vmatpush3.bf16.msra.mxu1 %v6463_v60  ;;  %v6555_v60 = vld [vmem:[#allocation16 + $0x160] ss:$16 sps:$4 sm:$0xff]  }
 0x480   :  { %5941 = vmatprep.subr.bf16.mxu1 %v7235_v43  ;;  %v6507_v43 = vld [vmem:[#allocation16 + $0x60] ss:$16 sps:$4 sm:$0xff]  }
 0x481   :  { %3257 = vmatpush1.bf16.msra.mxu0 %v6507_v43  ;;  %v6576_v43 = vld [vmem:[#allocation16 + $0x1c8] ss:$16 sps:$4 sm:$0xff]  }
 0x482   :  { %3258 = vmatprep.subr.bf16.mxu0 %v6515_v44  ;;  %v6581_v44 = vld [vmem:[#allocation16 + $0x1e4] ss:$16 sps:$4 sm:$0xff]  }
 0x483   :  { %5942 = vmatpush3.bf16.msra.mxu1 %v6464_v61  ;;  %v6563_v61 = vld [vmem:[#allocation16 + $0x184] ss:$16 sps:$4 sm:$0xff]  }
 0x484   :  { %2799 = vmatprep.subr.bf16.mxu1 %v6467_v62  ;;  %v6561_v62 = vld [vmem:[#allocation16 + $0x180] ss:$16 sps:$4 sm:$0xff]  }
 0x485   :  { %3259 = vmatpush1.bf16.msra.mxu0 %v6513_v45  ;;  %v6584_v45 = vld [vmem:[#allocation16 + $0x1ec] ss:$16 sps:$4 sm:$0xff]  }
 0x486   :  { %3260 = vmatprep.subr.bf16.mxu0 %v6521_v46  ;;  %v6579_v46 = vld [vmem:[#allocation16 + $0x1e0] ss:$16 sps:$4 sm:$0xff]  }
 0x489   :  { %3261 = vmatpush1.bf16.msra.mxu0 %v6519_v47  ;;  %v6582_v47 = vld [vmem:[#allocation16 + $0x1e8] ss:$16 sps:$4 sm:$0xff]  }
 0x48a   :  { %3262 = vmatprep.subr.bf16.mxu0 %v6527_v48  ;;  %v6587_v48 = vld [vmem:[#allocation17 + $0x4] ss:$28 sps:$4 sm:$0xff]  }
 0x48d   :  { %3263 = vmatpush1.bf16.msra.mxu0 %v6525_v49  ;;  %v6590_v49 = vld [vmem:[#allocation17 + $0xc] ss:$28 sps:$4 sm:$0xff]  }
 0x48e   :  { %3264 = vmatprep.subr.bf16.mxu0 %v6533_v50  ;;  %v2707_v50 = vld [vmem:[%s7663_s13] sm:$0x3] }
 0x491   :  { %3265 = vmatpush1.bf16.msra.mxu0 %v6531_v51  ;;  %v2712_v51 = vrot.slane %v2707_v50, %v7518_v7 }
 0x492   :  { %3266 = vmatprep.subr.bf16.mxu0 %v6539_v52  ;;  %v2716_v52 = vrot.slane %v2707_v50, %v7526_v9  ;;  %v6659_v50 = vld [vmem:[#allocation17 + $0x2a4] ss:$28 sps:$4 sm:$0xff]  }
 0x495   :  { %3267 = vmatpush1.bf16.msra.mxu0 %v6537_v53 }
 0x496   :  { %3268 = vmatprep.subr.bf16.mxu0 %v6545_v54 }
 0x499   :  { %3269 = vmatpush1.bf16.msra.mxu0 %v6543_v55 }
 0x49a   :  { %3270 = vmatprep.subr.bf16.mxu0 %v6551_v56 }
 0x49d   :  { %3271 = vmatpush1.bf16.msra.mxu0 %v6549_v57 }
 0x49e   :  { %3272 = vmatprep.subr.bf16.mxu0 %v6557_v59 }
 0x4a1   :  { %3273 = vmatpush1.bf16.msra.mxu0 %v6555_v60 }
 0x4a2   :  { %3274 = vmatprep.subr.bf16.mxu0 %v6563_v61 }
 0x4a5   :  { %3275 = vmatpush1.bf16.msra.mxu0 %v6561_v62 }
 0x4a6   :  { %3276 = vmatprep.subr.bf16.mxu0 %v6569_v63  ;;  %v6585_v63 = vld [vmem:[#allocation17] ss:$28 sps:$4 sm:$0xff]  }
 0x539   :  { %v2563_v3 = vpop.f32.mrb[12].mxu1 }
 0x53a   :  { %v2564_v4 = vadd.f32 %v2563_v3, %v2442_v1  ;;  %v2565_v5 = vpop.f32.mrb[13].mxu1  ;;  %v6567_v1 = vld [vmem:[#allocation16 + $0x1a0] ss:$16 sps:$4 sm:$0xff]  }
 0x53b   :  { %v2566_v10 = vadd.f32 %v2565_v5, %v2446_v2  ;;  %v2567_v11 = vpop.f32.mrb[14].mxu1  ;;  %3277 = vmatpush1.bf16.msra.mxu0 %v6567_v1  ;;  %v5524_v2 = vld [vmem:[%s7661_s11] ss:$0 sm:$0xff]  ;;  %v6588_v1 = vld [vmem:[#allocation17 + $0x8] ss:$28 sps:$4 sm:$0xff]  }
 0x53c   :  { %5186 = vst [vmem:[#allocation20] sm:$0xff] %v2564_v4  ;;  %v2568_v12 = vpop.f32.mrb[15].mxu1  ;;  %3278 = vmatprep.subr.bf16.mxu0 %v6575_v40  ;;  %v6639_v40 = vld [vmem:[#allocation17 + $0x1f8] ss:$28 sps:$4 sm:$0xff]  }
 0x53d   :  { %v2571_v8 = vmul.f32 0.5, %v2566_v10  ;;  %5187 = vst [vmem:[#allocation20 + $0x8] sm:$0xff] %v2566_v10 }
 0x53f   :  { %v2572_v13 = vmul.f32 1.442695, %v2571_v8  ;;  %v6492_v8 = vld [vmem:[#allocation16 + $0x8] ss:$16 sps:$4 sm:$0xff]   ;;  %3279 = vmatpush1.bf16.msra.mxu0 %v6573_v42  ;;  %v6647_v42 = vld [vmem:[#allocation17 + $0x234] ss:$28 sps:$4 sm:$0xff]  }
 0x540   :  { %3280 = vmatprep.subr.bf16.mxu0 %v6581_v44  ;;  %v6645_v44 = vld [vmem:[#allocation17 + $0x230] ss:$28 sps:$4 sm:$0xff]  }
 0x541   :  { %6905 = vpow2.f32 %v2572_v13 }
 0x543   :  { %3281 = vmatpush1.bf16.msra.mxu0 %v6579_v46  ;;  %v6653_v46 = vld [vmem:[#allocation17 + $0x26c] ss:$28 sps:$4 sm:$0xff]  }
 0x544   :  { %4785 = vmatprep.subr.bf16.mxu0 %v6587_v48  ;;  %v6651_v48 = vld [vmem:[#allocation17 + $0x268] ss:$28 sps:$4 sm:$0xff]  }
 0x54b   :  { %v6906_v17 = vpop.eup %6905 }
 0x54c   :  { %v2575_v18 = vmul.f32 %v6906_v17, %v2574_v15  ;;  %v6498_v15 = vld [vmem:[#allocation16 + $0x28] ss:$16 sps:$4 sm:$0xff]   ;;  %v6506_v17 = vld [vmem:[#allocation16 + $0x4c] ss:$16 sps:$4 sm:$0xff]  }
 0x54e   :  { %v2576_v19 = vadd.f32 %v2575_v18, %v2564_v4  ;;  %v6504_v18 = vld [vmem:[#allocation16 + $0x48] ss:$16 sps:$4 sm:$0xff]  }
 0x550   :  { %v2577_v21 = vpack.c.bf16 %v2576_v19, %v2576_v19  ;;  %v6512_v19 = vld [vmem:[#allocation16 + $0x6c] ss:$16 sps:$4 sm:$0xff]  }
 0x552   :  { %5944 = vmatmul.mubr.bf16.vlgmr.msra.gmra.mrb[16].mxu1 %v2577_v21  ;;  %v6518_v21 = vld [vmem:[#allocation16 + $0x8c] ss:$16 sps:$4 sm:$0xff]  }
 0x553   :  { %2800 = vmatpush1.bf16.msra.mxu1 %v6465_v20  ;;  %2831 = vmatprep.mubr.bf16.mxu1 %v7234_v0  ;;  %v6483_v0 = vld [vmem:[#allocation14 + $0x60] ss:$8 sps:$4 sm:$0xff]  }
 0x554   :  { %2801 = vmatprep.subr.bf16.mxu1 %v6470_v22  ;;  %v6510_v20 = vld [vmem:[#allocation16 + $0x68] ss:$16 sps:$4 sm:$0xff]  }
 0x555   :  { %v6516_v22 = vld [vmem:[#allocation16 + $0x88] ss:$16 sps:$4 sm:$0xff]  }
 0x557   :  { %2802 = vmatpush1.bf16.msra.mxu1 %v6468_v23  ;;  %v6524_v23 = vld [vmem:[#allocation16 + $0xac] ss:$16 sps:$4 sm:$0xff]  }
 0x558   :  { %2803 = vmatprep.subr.bf16.mxu1 %v6473_v24  ;;  %v6522_v24 = vld [vmem:[#allocation16 + $0xa8] ss:$16 sps:$4 sm:$0xff]  }
 0x55b   :  { %2804 = vmatpush1.bf16.msra.mxu1 %v6471_v16  ;;  %v6530_v16 = vld [vmem:[#allocation16 + $0xcc] ss:$16 sps:$4 sm:$0xff]  }
 0x55c   :  { %2805 = vmatprep.subr.bf16.mxu1 %v6476_v25  ;;  %v6528_v25 = vld [vmem:[#allocation16 + $0xc8] ss:$16 sps:$4 sm:$0xff]  }
 0x55f   :  { %2806 = vmatpush1.bf16.msra.mxu1 %v6474_v27  ;;  %v6536_v27 = vld [vmem:[#allocation16 + $0xec] ss:$16 sps:$4 sm:$0xff]  }
 0x560   :  { %2807 = vmatprep.subr.bf16.mxu1 %v6479_v28  ;;  %v6534_v28 = vld [vmem:[#allocation16 + $0xe8] ss:$16 sps:$4 sm:$0xff]  }
 0x563   :  { %2808 = vmatpush1.bf16.msra.mxu1 %v6477_v29  ;;  %v6542_v29 = vld [vmem:[#allocation16 + $0x10c] ss:$16 sps:$4 sm:$0xff]  }
 0x564   :  { %2809 = vmatprep.subr.bf16.mxu1 %v6482_v30  ;;  %v6540_v30 = vld [vmem:[#allocation16 + $0x108] ss:$16 sps:$4 sm:$0xff]  }
 0x567   :  { %2810 = vmatpush1.bf16.msra.mxu1 %v6480_v31  ;;  %v6548_v31 = vld [vmem:[#allocation16 + $0x12c] ss:$16 sps:$4 sm:$0xff]  }
 0x568   :  { %2811 = vmatprep.subr.bf16.mxu1 %v6485_v32  ;;  %v6546_v32 = vld [vmem:[#allocation16 + $0x128] ss:$16 sps:$4 sm:$0xff]  }
 0x56b   :  { %2812 = vmatpush1.bf16.msra.mxu1 %v6483_v0  ;;  %v6554_v0 = vld [vmem:[#allocation16 + $0x14c] ss:$16 sps:$4 sm:$0xff]  }
 0x56c   :  { %2813 = vmatprep.subr.bf16.mxu1 %v6488_v33  ;;  %v6552_v33 = vld [vmem:[#allocation16 + $0x148] ss:$16 sps:$4 sm:$0xff]  }
 0x56f   :  { %2814 = vmatpush1.bf16.msra.mxu1 %v6486_v34  ;;  %v6560_v34 = vld [vmem:[#allocation16 + $0x16c] ss:$16 sps:$4 sm:$0xff]  }
 0x570   :  { %3291 = vmatprep.subr.bf16.mxu1 %v6494_v37  ;;  %v6564_v37 = vld [vmem:[#allocation16 + $0x188] ss:$16 sps:$4 sm:$0xff]  }
 0x625   :  { %v2683_v3 = vpop.f32.mrb[16].mxu1 }
 0x626   :  { %v2684_v4 = vadd.f32 %v5524_v2, %v2683_v3  ;;  %v5945_v5 = vpop.f32.mrb[17].mxu1  ;;  %v6593_v3 = vld [vmem:[#allocation17 + $0x3c] ss:$28 sps:$4 sm:$0xff]  }
 0x627   :  { %v2686_v10 = vpop.f32.mrb[18].mxu1  ;;  %v6591_v5 = vld [vmem:[#allocation17 + $0x38] ss:$28 sps:$4 sm:$0xff]  }
 0x628   :  { %v2689_v11 = vmax.f32 %v2684_v4, 0.0  ;;  %v5946_v12 = vpop.f32.mrb[19].mxu1  ;;  %v6596_v4 = vld [vmem:[#allocation17 + $0x44] ss:$28 sps:$4 sm:$0xff]  }
 0x629   :  { %v6594_v10 = vld [vmem:[#allocation17 + $0x40] ss:$28 sps:$4 sm:$0xff]  }
 0x62a   :  { %v2690_v13 = vpack.c.bf16 %v2689_v11, %v2689_v11  ;;  %v6599_v11 = vld [vmem:[#allocation17 + $0x74] ss:$28 sps:$4 sm:$0xff]   ;;  %v6602_v12 = vld [vmem:[#allocation17 + $0x7c] ss:$28 sps:$4 sm:$0xff]  }
 0x62c   :  { %2832 = vmatmul.mubr.bf16.vlgmr.msra.gmra.mrb[20].mxu1 %v2690_v13  ;;  %v6600_v13 = vld [vmem:[#allocation17 + $0x78] ss:$28 sps:$4 sm:$0xff]  }
 0x62d   :  { %3292 = vmatpush1.bf16.msra.mxu1 %v6492_v8  ;;  %v6597_v8 = vld [vmem:[#allocation17 + $0x70] ss:$28 sps:$4 sm:$0xff]  }
 0x62e   :  { %3293 = vmatprep.subr.bf16.mxu1 %v6500_v14  ;;  %v6605_v14 = vld [vmem:[#allocation17 + $0xac] ss:$28 sps:$4 sm:$0xff]  }
 0x631   :  { %3294 = vmatpush1.bf16.msra.mxu1 %v6498_v15  ;;  %v6608_v15 = vld [vmem:[#allocation17 + $0xb4] ss:$28 sps:$4 sm:$0xff]  }
 0x632   :  { %3295 = vmatprep.subr.bf16.mxu1 %v6506_v17  ;;  %v6603_v17 = vld [vmem:[#allocation17 + $0xa8] ss:$28 sps:$4 sm:$0xff]  }
 0x635   :  { %3296 = vmatpush1.bf16.msra.mxu1 %v6504_v18  ;;  %v6606_v18 = vld [vmem:[#allocation17 + $0xb0] ss:$28 sps:$4 sm:$0xff]  }
 0x636   :  { %3297 = vmatprep.subr.bf16.mxu1 %v6512_v19  ;;  %v6611_v19 = vld [vmem:[#allocation17 + $0xe4] ss:$28 sps:$4 sm:$0xff]  }
 0x639   :  { %3298 = vmatpush1.bf16.msra.mxu1 %v6510_v20  ;;  %v6614_v20 = vld [vmem:[#allocation17 + $0xec] ss:$28 sps:$4 sm:$0xff]  }
 0x63a   :  { %3299 = vmatprep.subr.bf16.mxu1 %v6518_v21  ;;  %v6609_v21 = vld [vmem:[#allocation17 + $0xe0] ss:$28 sps:$4 sm:$0xff]  }
 0x63d   :  { %3300 = vmatpush1.bf16.msra.mxu1 %v6516_v22  ;;  %v6612_v22 = vld [vmem:[#allocation17 + $0xe8] ss:$28 sps:$4 sm:$0xff]  }
 0x63e   :  { %3301 = vmatprep.subr.bf16.mxu1 %v6524_v23  ;;  %v6617_v23 = vld [vmem:[#allocation17 + $0x11c] ss:$28 sps:$4 sm:$0xff]  }
 0x641   :  { %3302 = vmatpush1.bf16.msra.mxu1 %v6522_v24  ;;  %v6620_v24 = vld [vmem:[#allocation17 + $0x124] ss:$28 sps:$4 sm:$0xff]  }
 0x642   :  { %3303 = vmatprep.subr.bf16.mxu1 %v6530_v16  ;;  %v6615_v16 = vld [vmem:[#allocation17 + $0x118] ss:$28 sps:$4 sm:$0xff]  }
 0x645   :  { %3304 = vmatpush1.bf16.msra.mxu1 %v6528_v25  ;;  %v6618_v25 = vld [vmem:[#allocation17 + $0x120] ss:$28 sps:$4 sm:$0xff]  }
 0x646   :  { %3305 = vmatprep.subr.bf16.mxu1 %v6536_v27  ;;  %v6623_v27 = vld [vmem:[#allocation17 + $0x154] ss:$28 sps:$4 sm:$0xff]  }
 0x649   :  { %3306 = vmatpush1.bf16.msra.mxu1 %v6534_v28  ;;  %v6626_v28 = vld [vmem:[#allocation17 + $0x15c] ss:$28 sps:$4 sm:$0xff]  }
 0x64a   :  { %3307 = vmatprep.subr.bf16.mxu1 %v6542_v29  ;;  %v6621_v29 = vld [vmem:[#allocation17 + $0x150] ss:$28 sps:$4 sm:$0xff]  }
 0x64d   :  { %3308 = vmatpush1.bf16.msra.mxu1 %v6540_v30  ;;  %v6624_v30 = vld [vmem:[#allocation17 + $0x158] ss:$28 sps:$4 sm:$0xff]  }
 0x64e   :  { %3309 = vmatprep.subr.bf16.mxu1 %v6548_v31  ;;  %v6629_v31 = vld [vmem:[#allocation17 + $0x18c] ss:$28 sps:$4 sm:$0xff]  }
 0x651   :  { %3310 = vmatpush1.bf16.msra.mxu1 %v6546_v32  ;;  %v6632_v32 = vld [vmem:[#allocation17 + $0x194] ss:$28 sps:$4 sm:$0xff]  }
 0x652   :  { %3311 = vmatprep.subr.bf16.mxu1 %v6554_v0  ;;  %v6627_v0 = vld [vmem:[#allocation17 + $0x188] ss:$28 sps:$4 sm:$0xff]  }
 0x655   :  { %3312 = vmatpush1.bf16.msra.mxu1 %v6552_v33  ;;  %v6630_v33 = vld [vmem:[#allocation17 + $0x190] ss:$28 sps:$4 sm:$0xff]  }
 0x656   :  { %3313 = vmatprep.subr.bf16.mxu1 %v6560_v34  ;;  %v6635_v34 = vld [vmem:[#allocation17 + $0x1c4] ss:$28 sps:$4 sm:$0xff]  }
 0x659   :  { %3314 = vmatpush1.bf16.msra.mxu1 %v6558_v35  ;;  %v6638_v35 = vld [vmem:[#allocation17 + $0x1cc] ss:$28 sps:$4 sm:$0xff]  }
 0x65a   :  { %3315 = vmatprep.subr.bf16.mxu1 %v6566_v36  ;;  %v6633_v36 = vld [vmem:[#allocation17 + $0x1c0] ss:$28 sps:$4 sm:$0xff]  }
 0x65d   :  { %3316 = vmatpush1.bf16.msra.mxu1 %v6564_v37  ;;  %v6636_v37 = vld [vmem:[#allocation17 + $0x1c8] ss:$28 sps:$4 sm:$0xff]  }
 0x65e   :  { %3317 = vmatprep.subr.bf16.mxu1 %v6572_v38  ;;  %v6641_v38 = vld [vmem:[#allocation17 + $0x1fc] ss:$28 sps:$4 sm:$0xff]  }
 0x661   :  { %3318 = vmatpush1.bf16.msra.mxu1 %v6570_v39  ;;  %v6644_v39 = vld [vmem:[#allocation17 + $0x204] ss:$28 sps:$4 sm:$0xff]  }
 0x662   :  { %3319 = vmatprep.subr.bf16.mxu1 %v6578_v41  ;;  %v6642_v41 = vld [vmem:[#allocation17 + $0x200] ss:$28 sps:$4 sm:$0xff]  }
 0x665   :  { %3320 = vmatpush1.bf16.msra.mxu1 %v6576_v43  ;;  %v6650_v43 = vld [vmem:[#allocation17 + $0x23c] ss:$28 sps:$4 sm:$0xff]  }
 0x666   :  { %3321 = vmatprep.subr.bf16.mxu1 %v6584_v45  ;;  %v6648_v45 = vld [vmem:[#allocation17 + $0x238] ss:$28 sps:$4 sm:$0xff]  }
 0x669   :  { %3322 = vmatpush1.bf16.msra.mxu1 %v6582_v47  ;;  %v6656_v47 = vld [vmem:[#allocation17 + $0x274] ss:$28 sps:$4 sm:$0xff]  }
 0x66a   :  { %4867 = vmatprep.subr.bf16.mxu1 %v6590_v49  ;;  %v6654_v49 = vld [vmem:[#allocation17 + $0x270] ss:$28 sps:$4 sm:$0xff]  }
 0x6ff   :  { %v2833_v53 = vpop.f32.mrb[20].mxu1 }
 0x700   :  { %v2834_v54 = vadd.f32 %v2833_v53, %v2712_v51  ;;  %v2835_v55 = vpop.f32.mrb[21].mxu1  ;;  %v6662_v51 = vld [vmem:[#allocation17 + $0x2ac] ss:$28 sps:$4 sm:$0xff]  }
 0x701   :  { %v2836_v56 = vadd.f32 %v2835_v55, %v2716_v52  ;;  %v2837_v57 = vpop.f32.mrb[22].mxu1  ;;  %v6657_v52 = vld [vmem:[#allocation17 + $0x2a0] ss:$28 sps:$4 sm:$0xff]   ;;  %v6660_v53 = vld [vmem:[#allocation17 + $0x2a8] ss:$28 sps:$4 sm:$0xff]  }
 0x702   :  { %v2840_v59 = vmax.f32 %v2834_v54, 0.0  ;;  %v2838_v60 = vpop.f32.mrb[23].mxu1  ;;  %v6665_v54 = vld [vmem:[#allocation17 + $0x2dc] ss:$28 sps:$4 sm:$0xff]   ;;  %v6668_v55 = vld [vmem:[#allocation17 + $0x2e4] ss:$28 sps:$4 sm:$0xff]  }
 0x703   :  { %v2841_v61 = vmax.f32 %v2836_v56, 0.0  ;;  %v6663_v56 = vld [vmem:[#allocation17 + $0x2d8] ss:$28 sps:$4 sm:$0xff]   ;;  %v6666_v57 = vld [vmem:[#allocation17 + $0x2e0] ss:$28 sps:$4 sm:$0xff]  }
 0x704   :  { %v2842_v2 = vpack.c.bf16 %v2840_v59, %v2840_v59  ;;  %v6671_v59 = vld [vmem:[#allocation17 + $0x314] ss:$28 sps:$4 sm:$0xff]   ;;  %v6674_v60 = vld [vmem:[#allocation17 + $0x31c] ss:$28 sps:$4 sm:$0xff]  }
 0x705   :  { %v2843_v62 = vpack.c.bf16 %v2841_v61, %v2841_v61  ;;  %v6669_v61 = vld [vmem:[#allocation17 + $0x310] ss:$28 sps:$4 sm:$0xff]  }
 0x707   :  { %3282 = vmatprep.mubr.bf16.mxu0 %v2843_v62  ;;  %3323 = vmatprep.mubr.bf16.mxu1 %v2843_v62  ;;  %v6672_v62 = vld [vmem:[#allocation17 + $0x318] ss:$28 sps:$4 sm:$0xff]  }
 0x708   :  { %3283 = vmatmul.mubr.bf16.vlgmr.msra.gmra.mrb[8].mxu0 %v2842_v2  ;;  %3324 = vmatmul.mubr.bf16.vlgmr.msra.gmra.mrb[24].mxu1 %v2842_v2  ;;  %v6675_v2 = vld [vmem:[#allocation17 + $0x348] ss:$28 sps:$4 sm:$0xff]  }
 0x709   :  { %4786 = vmatpush1.bf16.msra.mxu0 %v6585_v63  ;;  %4868 = vmatpush1.bf16.msra.mxu1 %v6588_v1  ;;  %v6677_v63 = vld [vmem:[#allocation17 + $0x34c] ss:$28 sps:$4 sm:$0xff]   ;;  %v6680_v1 = vld [vmem:[#allocation17 + $0x354] ss:$28 sps:$4 sm:$0xff]  }
 0x70a   :  { %4787 = vmatprep.subr.bf16.mxu0 %v6593_v3  ;;  %4869 = vmatprep.subr.bf16.mxu1 %v6596_v4  ;;  %v6678_v3 = vld [vmem:[#allocation17 + $0x350] ss:$28 sps:$4 sm:$0xff]   ;;  %v6683_v4 = vld [vmem:[#allocation17 + $0x384] ss:$28 sps:$4 sm:$0xff]  }
 0x70d   :  { %4788 = vmatpush1.bf16.msra.mxu0 %v6591_v5  ;;  %4870 = vmatpush1.bf16.msra.mxu1 %v6594_v10  ;;  %v6686_v5 = vld [vmem:[#allocation17 + $0x38c] ss:$28 sps:$4 sm:$0xff]   ;;  %v7570_v10 = vld [vmem:[%s7665_s15] sm:$0xf] }
 0x70e   :  { %4789 = vmatprep.subr.bf16.mxu0 %v6599_v11  ;;  %4871 = vmatprep.subr.bf16.mxu1 %v6602_v12  ;;  %v2913_v11 = vrot.slane %v7570_v10, %v7518_v7  ;;  %v2917_v12 = vrot.slane %v7570_v10, %v7526_v9 }
 0x711   :  { %4790 = vmatpush1.bf16.msra.mxu0 %v6597_v8  ;;  %4872 = vmatpush1.bf16.msra.mxu1 %v6600_v13  ;;  %v2925_v8 = vrot.slane %v7570_v10, %v7535_v26 }
 0x712   :  { %4791 = vmatprep.subr.bf16.mxu0 %v6605_v14  ;;  %4873 = vmatprep.subr.bf16.mxu1 %v6608_v15 }
 0x715   :  { %4792 = vmatpush1.bf16.msra.mxu0 %v6603_v17  ;;  %4874 = vmatpush1.bf16.msra.mxu1 %v6606_v18 }
 0x716   :  { %4793 = vmatprep.subr.bf16.mxu0 %v6611_v19  ;;  %4875 = vmatprep.subr.bf16.mxu1 %v6614_v20 }
 0x719   :  { %4794 = vmatpush1.bf16.msra.mxu0 %v6609_v21  ;;  %4876 = vmatpush1.bf16.msra.mxu1 %v6612_v22 }
 0x71a   :  { %4795 = vmatprep.subr.bf16.mxu0 %v6617_v23  ;;  %4877 = vmatprep.subr.bf16.mxu1 %v6620_v24 }
 0x71d   :  { %4796 = vmatpush1.bf16.msra.mxu0 %v6615_v16  ;;  %4878 = vmatpush1.bf16.msra.mxu1 %v6618_v25 }
 0x71e   :  { %4797 = vmatprep.subr.bf16.mxu0 %v6623_v27  ;;  %4879 = vmatprep.subr.bf16.mxu1 %v6626_v28 }
 0x721   :  { %4798 = vmatpush1.bf16.msra.mxu0 %v6621_v29  ;;  %4880 = vmatpush1.bf16.msra.mxu1 %v6624_v30  ;;  %v6681_v29 = vld [vmem:[#allocation17 + $0x380] ss:$28 sps:$4 sm:$0xff]   ;;  %v6684_v30 = vld [vmem:[#allocation17 + $0x388] ss:$28 sps:$4 sm:$0xff]  }
 0x722   :  { %4799 = vmatprep.subr.bf16.mxu0 %v6629_v31  ;;  %4881 = vmatprep.subr.bf16.mxu1 %v6632_v32  ;;  %v6689_v32 = vld [vmem:[#allocation17 + $0x3bc] ss:$28 sps:$4 sm:$0xff]  }
 0x725   :  { %4800 = vmatpush1.bf16.msra.mxu0 %v6627_v0  ;;  %4882 = vmatpush1.bf16.msra.mxu1 %v6630_v33  ;;  %v6692_v0 = vld [vmem:[#allocation17 + $0x3c4] ss:$28 sps:$4 sm:$0xff]  }
 0x726   :  { %4801 = vmatprep.subr.bf16.mxu0 %v6635_v34  ;;  %4883 = vmatprep.subr.bf16.mxu1 %v6638_v35  ;;  %v6687_v34 = vld [vmem:[#allocation17 + $0x3b8] ss:$28 sps:$4 sm:$0xff]   ;;  %v6690_v35 = vld [vmem:[#allocation17 + $0x3c0] ss:$28 sps:$4 sm:$0xff]  }
 0x729   :  { %4802 = vmatpush1.bf16.msra.mxu0 %v6633_v36  ;;  %4884 = vmatpush1.bf16.msra.mxu1 %v6636_v37  ;;  %v6695_v36 = vld [vmem:[#allocation17 + $0x3f4] ss:$28 sps:$4 sm:$0xff]   ;;  %v6698_v37 = vld [vmem:[#allocation17 + $0x3fc] ss:$28 sps:$4 sm:$0xff]  }
 0x72a   :  { %4803 = vmatprep.subr.bf16.mxu0 %v6641_v38  ;;  %4885 = vmatprep.subr.bf16.mxu1 %v6644_v39  ;;  %v6693_v38 = vld [vmem:[#allocation17 + $0x3f0] ss:$28 sps:$4 sm:$0xff]   ;;  %v6696_v39 = vld [vmem:[#allocation17 + $0x3f8] ss:$28 sps:$4 sm:$0xff]  }
 0x72d   :  { %4804 = vmatpush1.bf16.msra.mxu0 %v6639_v40  ;;  %4886 = vmatpush1.bf16.msra.mxu1 %v6642_v41  ;;  %v6701_v40 = vld [vmem:[#allocation17 + $0x42c] ss:$28 sps:$4 sm:$0xff]   ;;  %v6704_v41 = vld [vmem:[#allocation17 + $0x434] ss:$28 sps:$4 sm:$0xff]  }
 0x72e   :  { %4805 = vmatprep.subr.bf16.mxu0 %v6647_v42  ;;  %4887 = vmatprep.subr.bf16.mxu1 %v6650_v43  ;;  %v6699_v42 = vld [vmem:[#allocation17 + $0x428] ss:$28 sps:$4 sm:$0xff]   ;;  %v6702_v43 = vld [vmem:[#allocation17 + $0x430] ss:$28 sps:$4 sm:$0xff]  }
 0x731   :  { %4806 = vmatpush1.bf16.msra.mxu0 %v6645_v44  ;;  %4888 = vmatpush1.bf16.msra.mxu1 %v6648_v45  ;;  %v6707_v44 = vld [vmem:[#allocation17 + $0x464] ss:$28 sps:$4 sm:$0xff]   ;;  %v6710_v45 = vld [vmem:[#allocation17 + $0x46c] ss:$28 sps:$4 sm:$0xff]  }
 0x732   :  { %4807 = vmatprep.subr.bf16.mxu0 %v6653_v46  ;;  %4889 = vmatprep.subr.bf16.mxu1 %v6656_v47  ;;  %v6705_v46 = vld [vmem:[#allocation17 + $0x460] ss:$28 sps:$4 sm:$0xff]   ;;  %v6708_v47 = vld [vmem:[#allocation17 + $0x468] ss:$28 sps:$4 sm:$0xff]  }
 0x735   :  { %4808 = vmatpush1.bf16.msra.mxu0 %v6651_v48  ;;  %4890 = vmatpush1.bf16.msra.mxu1 %v6654_v49  ;;  %v6713_v48 = vld [vmem:[#allocation17 + $0x49c] ss:$28 sps:$4 sm:$0xff]   ;;  %v6716_v49 = vld [vmem:[#allocation17 + $0x4a4] ss:$28 sps:$4 sm:$0xff]  }
 0x736   :  { %4809 = vmatprep.subr.bf16.mxu0 %v6659_v50  ;;  %4891 = vmatprep.subr.bf16.mxu1 %v6662_v51  ;;  %v6711_v50 = vld [vmem:[#allocation17 + $0x498] ss:$28 sps:$4 sm:$0xff]   ;;  %v6714_v51 = vld [vmem:[#allocation17 + $0x4a0] ss:$28 sps:$4 sm:$0xff]  }
 0x739   :  { %4810 = vmatpush1.bf16.msra.mxu0 %v6657_v52  ;;  %4892 = vmatpush1.bf16.msra.mxu1 %v6660_v53  ;;  %v6719_v52 = vld [vmem:[#allocation17 + $0x4d4] ss:$28 sps:$4 sm:$0xff]   ;;  %v6722_v53 = vld [vmem:[#allocation17 + $0x4dc] ss:$28 sps:$4 sm:$0xff]  }
 0x73a   :  { %4811 = vmatprep.subr.bf16.mxu0 %v6665_v54  ;;  %4893 = vmatprep.subr.bf16.mxu1 %v6668_v55  ;;  %v6717_v54 = vld [vmem:[#allocation17 + $0x4d0] ss:$28 sps:$4 sm:$0xff]   ;;  %v6720_v55 = vld [vmem:[#allocation17 + $0x4d8] ss:$28 sps:$4 sm:$0xff]  }
 0x73d   :  { %4812 = vmatpush1.bf16.msra.mxu0 %v6663_v56  ;;  %4894 = vmatpush1.bf16.msra.mxu1 %v6666_v57  ;;  %v6725_v56 = vld [vmem:[#allocation17 + $0x50c] ss:$28 sps:$4 sm:$0xff]   ;;  %v6728_v57 = vld [vmem:[#allocation17 + $0x514] ss:$28 sps:$4 sm:$0xff]  }
 0x73e   :  { %4813 = vmatprep.subr.bf16.mxu0 %v6671_v59  ;;  %4895 = vmatprep.subr.bf16.mxu1 %v6674_v60  ;;  %v6723_v59 = vld [vmem:[#allocation17 + $0x508] ss:$28 sps:$4 sm:$0xff]   ;;  %v6726_v60 = vld [vmem:[#allocation17 + $0x510] ss:$28 sps:$4 sm:$0xff]  }
 0x741   :  { %4814 = vmatpush1.bf16.msra.mxu0 %v6669_v61  ;;  %4896 = vmatpush1.bf16.msra.mxu1 %v6672_v62  ;;  %v6731_v61 = vld [vmem:[#allocation17 + $0x544] ss:$28 sps:$4 sm:$0xff]   ;;  %v6734_v62 = vld [vmem:[#allocation17 + $0x54c] ss:$28 sps:$4 sm:$0xff]  }
 0x742   :  { %4815 = vmatprep.subr.bf16.mxu0 %v6677_v63  ;;  %4897 = vmatprep.subr.bf16.mxu1 %v6680_v1  ;;  %v6729_v63 = vld [vmem:[#allocation17 + $0x540] ss:$28 sps:$4 sm:$0xff]   ;;  %v6732_v1 = vld [vmem:[#allocation17 + $0x548] ss:$28 sps:$4 sm:$0xff]  }
 0x745   :  { %4816 = vmatpush1.bf16.msra.mxu0 %v6675_v2  ;;  %4898 = vmatpush1.bf16.msra.mxu1 %v6678_v3  ;;  %v6737_v2 = vld [vmem:[#allocation17 + $0x57c] ss:$28 sps:$4 sm:$0xff]   ;;  %v6740_v3 = vld [vmem:[#allocation17 + $0x584] ss:$28 sps:$4 sm:$0xff]  }
 0x746   :  { %4826 = vmatprep.subr.bf16.mxu0 %v6683_v4  ;;  %4908 = vmatprep.subr.bf16.mxu1 %v6686_v5  ;;  %v6735_v4 = vld [vmem:[#allocation17 + $0x578] ss:$28 sps:$4 sm:$0xff]   ;;  %v6738_v5 = vld [vmem:[#allocation17 + $0x580] ss:$28 sps:$4 sm:$0xff]  }
 0x7db   :  { %v3284_v13 = vpop.f32.mrb[8].mxu0  ;;  %v7578_v14 = vpop.f32.mrb[24].mxu1 }
 0x7dc   :  { %v3285_v15 = vadd.f32 %v3284_v13, %v2913_v11  ;;  %v3286_v17 = vpop.f32.mrb[9].mxu0  ;;  %v3327_v18 = vpop.f32.mrb[25].mxu1  ;;  %v6743_v11 = vld [vmem:[#allocation17 + $0x5b4] ss:$28 sps:$4 sm:$0xff]  }
 0x7dd   :  { %v3287_v19 = vadd.f32 %v3286_v17, %v2917_v12  ;;  %v3328_v20 = vadd.f32 %v3327_v18, %v2925_v8  ;;  %v3288_v21 = vpop.f32.mrb[10].mxu0  ;;  %v3329_v22 = vpop.f32.mrb[26].mxu1  ;;  %v6746_v12 = vld [vmem:[#allocation17 + $0x5bc] ss:$28 sps:$4 sm:$0xff]   ;;  %v6741_v8 = vld [vmem:[#allocation17 + $0x5b0] ss:$28 sps:$4 sm:$0xff]  }
 0x7de   :  { %v3332_v23 = vmax.f32 %v3285_v15, 0.0  ;;  %v3289_v24 = vpop.f32.mrb[11].mxu0  ;;  %v3330_v16 = vpop.f32.mrb[27].mxu1  ;;  %v6744_v13 = vld [vmem:[#allocation17 + $0x5b8] ss:$28 sps:$4 sm:$0xff]  }
 0x7df   :  { %v3333_v25 = vmax.f32 %v3287_v19, 0.0  ;;  %v3335_v27 = vmax.f32 %v3328_v20, 0.0  ;;  %v6749_v15 = vld [vmem:[#allocation17 + $0x5ec] ss:$28 sps:$4 sm:$0xff]   ;;  %v6752_v17 = vld [vmem:[#allocation17 + $0x5f4] ss:$28 sps:$4 sm:$0xff]  }
 0x7e0   :  { %v7582_v31 = vpack.c.bf16 %v3332_v23, %v3332_v23  ;;  %v6747_v18 = vld [vmem:[#allocation17 + $0x5e8] ss:$28 sps:$4 sm:$0xff]   ;;  %v6750_v19 = vld [vmem:[#allocation17 + $0x5f0] ss:$28 sps:$4 sm:$0xff]   ;;  %v6753_v22 = vld [vmem:[#allocation17 + $0x620] ss:$28 sps:$4 sm:$0xff]  }
 0x7e1   :  { %v7580_v28 = vpack.c.bf16 %v3333_v25, %v3333_v25  ;;  %v7586_v33 = vpack.c.bf16 %v3335_v27, %v3335_v27  ;;  %v6755_v20 = vld [vmem:[#allocation17 + $0x624] ss:$28 sps:$4 sm:$0xff]   ;;  %v6758_v21 = vld [vmem:[#allocation17 + $0x62c] ss:$28 sps:$4 sm:$0xff]   ;;  %v6761_v24 = vld [vmem:[#allocation17 + $0x65c] ss:$28 sps:$4 sm:$0xff]  }
 0x7e2   :  { %v6756_v23 = vld [vmem:[#allocation17 + $0x628] ss:$28 sps:$4 sm:$0xff]   ;;  %v6759_v25 = vld [vmem:[#allocation17 + $0x658] ss:$28 sps:$4 sm:$0xff]   ;;  %v6762_v27 = vld [vmem:[#allocation17 + $0x660] ss:$28 sps:$4 sm:$0xff]  }
 0x7e3   :  { %4817 = vmatprep.mubr.bf16.mxu0 %v7580_v28  ;;  %4899 = vmatprep.mubr.bf16.mxu1 %v7580_v28  ;;  %v6764_v16 = vld [vmem:[#allocation17 + $0x664] ss:$28 sps:$4 sm:$0xff]  }
 0x7e4   :  { %4818 = vmatmul.mubr.bf16.vlgmr.msra.gmra.mrb[12].mxu0 %v7582_v31  ;;  %4900 = vmatmul.mubr.bf16.vlgmr.msra.gmra.mrb[28].mxu1 %v7582_v31 }
 0x7e5   :  { %4827 = vmatpush1.bf16.msra.mxu0 %v6681_v29  ;;  %4909 = vmatpush1.bf16.msra.mxu1 %v6684_v30  ;;  %v2921_v29 = vrot.slane %v7570_v10, %v7540_v58  ;;  %v6767_v30 = vld [vmem:[#allocation17 + $0x694] ss:$28 sps:$4 sm:$0xff]  }
 0x7e6   :  { %4858 = vmatprep.mubr.bf16.mxu0 %v7586_v33  ;;  %4940 = vmatprep.mubr.bf16.mxu1 %v7586_v33  ;;  %v6779_v10 = vld [vmem:[#allocation17 + $0x14] ss:$28 sps:$4 sm:$0xff]  }
 0x7e7   :  { %4828 = vmatprep.subr.bf16.mxu0 %v6689_v32  ;;  %4910 = vmatprep.subr.bf16.mxu1 %v6692_v0  ;;  %v6770_v32 = vld [vmem:[#allocation17 + $0x69c] ss:$28 sps:$4 sm:$0xff]   ;;  %v6765_v0 = vld [vmem:[#allocation17 + $0x690] ss:$28 sps:$4 sm:$0xff]  }
 0x7e9   :  { %4829 = vmatpush1.bf16.msra.mxu0 %v6687_v34  ;;  %4911 = vmatpush1.bf16.msra.mxu1 %v6690_v35  ;;  %v6768_v34 = vld [vmem:[#allocation17 + $0x698] ss:$28 sps:$4 sm:$0xff]   ;;  %v3326_v35 = vadd.f32 %v7578_v14, %v2921_v29  ;;  %v6835_v29 = vld [vmem:[#allocation17 + $0x600] ss:$28 sps:$4 sm:$0xff]  }
 0x7ea   :  { %4830 = vmatprep.subr.bf16.mxu0 %v6695_v36  ;;  %4912 = vmatprep.subr.bf16.mxu1 %v6698_v37  ;;  %v6773_v36 = vld [vmem:[#allocation17 + $0x6cc] ss:$28 sps:$4 sm:$0xff]   ;;  %v6776_v37 = vld [vmem:[#allocation17 + $0x6d4] ss:$28 sps:$4 sm:$0xff]  }
 0x7eb   :  { %v6781_v14 = vld [vmem:[#allocation17 + $0x18] ss:$28 sps:$4 sm:$0xff]  }
 0x7ed   :  { %4831 = vmatpush1.bf16.msra.mxu0 %v6693_v38  ;;  %4913 = vmatpush1.bf16.msra.mxu1 %v6696_v39  ;;  %v6771_v38 = vld [vmem:[#allocation17 + $0x6c8] ss:$28 sps:$4 sm:$0xff]   ;;  %v6774_v39 = vld [vmem:[#allocation17 + $0x6d0] ss:$28 sps:$4 sm:$0xff]  }
 0x7ee   :  { %4832 = vmatprep.subr.bf16.mxu0 %v6701_v40  ;;  %4914 = vmatprep.subr.bf16.mxu1 %v6704_v41  ;;  %v3334_v40 = vmax.f32 %v3326_v35, 0.0  ;;  %v6780_v41 = vld [vmem:[#allocation17 + $0x1d8] ss:$28 sps:$4 sm:$0xff]   ;;  %v6837_v35 = vld [vmem:[#allocation17 + $0x2b0] ss:$28 sps:$4 sm:$0xff]  }
 0x7f1   :  { %4833 = vmatpush1.bf16.msra.mxu0 %v6699_v42  ;;  %4915 = vmatpush1.bf16.msra.mxu1 %v6702_v43  ;;  %v6777_v42 = vld [vmem:[#allocation17 + $0x10] ss:$28 sps:$4 sm:$0xff]   ;;  %v7595_v43 = vpack.c.bf16 %v3334_v40, %v3334_v40 }
 0x7f2   :  { %4834 = vmatprep.subr.bf16.mxu0 %v6707_v44  ;;  %4916 = vmatprep.subr.bf16.mxu1 %v6710_v45  ;;  %v6784_v44 = vld [vmem:[#allocation17 + $0x4c] ss:$28 sps:$4 sm:$0xff]  }
 0x7f3   :  { %v6785_v45 = vld [vmem:[#allocation17 + $0x210] ss:$28 sps:$4 sm:$0xff]  }
 0x7f4   :  { %v6846_v40 = vld [vmem:[#allocation17 + $0x4b0] ss:$28 sps:$4 sm:$0xff]  }
 0x7f5   :  { %4835 = vmatpush1.bf16.msra.mxu0 %v6705_v46  ;;  %4917 = vmatpush1.bf16.msra.mxu1 %v6708_v47  ;;  %v6782_v46 = vld [vmem:[#allocation17 + $0x48] ss:$28 sps:$4 sm:$0xff]   ;;  %v6786_v47 = vld [vmem:[#allocation17 + $0x50] ss:$28 sps:$4 sm:$0xff]  }
 0x7f6   :  { %4836 = vmatprep.subr.bf16.mxu0 %v6713_v48  ;;  %4918 = vmatprep.subr.bf16.mxu1 %v6716_v49  ;;  %v6789_v48 = vld [vmem:[#allocation17 + $0x84] ss:$28 sps:$4 sm:$0xff]  }
 0x7f7   :  { %v6790_v49 = vld [vmem:[#allocation17 + $0x248] ss:$28 sps:$4 sm:$0xff]  }
 0x7f9   :  { %4837 = vmatpush1.bf16.msra.mxu0 %v6711_v50  ;;  %4919 = vmatpush1.bf16.msra.mxu1 %v6714_v51  ;;  %v6787_v50 = vld [vmem:[#allocation17 + $0x80] ss:$28 sps:$4 sm:$0xff]   ;;  %v6791_v51 = vld [vmem:[#allocation17 + $0x88] ss:$28 sps:$4 sm:$0xff]  }
 0x7fa   :  { %4838 = vmatprep.subr.bf16.mxu0 %v6719_v52  ;;  %4920 = vmatprep.subr.bf16.mxu1 %v6722_v53  ;;  %v6794_v52 = vld [vmem:[#allocation17 + $0xbc] ss:$28 sps:$4 sm:$0xff]  }
 0x7fb   :  { %v6795_v53 = vld [vmem:[#allocation17 + $0x280] ss:$28 sps:$4 sm:$0xff]  }
 0x7fd   :  { %4839 = vmatpush1.bf16.msra.mxu0 %v6717_v54  ;;  %4921 = vmatpush1.bf16.msra.mxu1 %v6720_v55  ;;  %v6792_v54 = vld [vmem:[#allocation17 + $0xb8] ss:$28 sps:$4 sm:$0xff]   ;;  %v6796_v55 = vld [vmem:[#allocation17 + $0xc0] ss:$28 sps:$4 sm:$0xff]  }
 0x7fe   :  { %4840 = vmatprep.subr.bf16.mxu0 %v6725_v56  ;;  %4922 = vmatprep.subr.bf16.mxu1 %v6728_v57  ;;  %v6799_v56 = vld [vmem:[#allocation17 + $0xf4] ss:$28 sps:$4 sm:$0xff]  }
 0x7ff   :  { %v6797_v57 = vld [vmem:[#allocation17 + $0xf0] ss:$28 sps:$4 sm:$0xff]  }
 0x801   :  { %4841 = vmatpush1.bf16.msra.mxu0 %v6723_v59  ;;  %4923 = vmatpush1.bf16.msra.mxu1 %v6726_v60  ;;  %v6801_v59 = vld [vmem:[#allocation17 + $0xf8] ss:$28 sps:$4 sm:$0xff]   ;;  %v6804_v60 = vld [vmem:[#allocation17 + $0x12c] ss:$28 sps:$4 sm:$0xff]  }
 0x802   :  { %4842 = vmatprep.subr.bf16.mxu0 %v6731_v61  ;;  %4924 = vmatprep.subr.bf16.mxu1 %v6734_v62  ;;  %v6805_v61 = vld [vmem:[#allocation17 + $0x2f0] ss:$28 sps:$4 sm:$0xff]   ;;  %v6802_v62 = vld [vmem:[#allocation17 + $0x128] ss:$28 sps:$4 sm:$0xff]  }
 0x805   :  { %4843 = vmatpush1.bf16.msra.mxu0 %v6729_v63  ;;  %4925 = vmatpush1.bf16.msra.mxu1 %v6732_v1  ;;  %v6806_v63 = vld [vmem:[#allocation17 + $0x130] ss:$28 sps:$4 sm:$0xff]   ;;  %v6809_v1 = vld [vmem:[#allocation17 + $0x164] ss:$28 sps:$4 sm:$0xff]  }
 0x806   :  { %4844 = vmatprep.subr.bf16.mxu0 %v6737_v2  ;;  %4926 = vmatprep.subr.bf16.mxu1 %v6740_v3  ;;  %v6810_v2 = vld [vmem:[#allocation17 + $0x328] ss:$28 sps:$4 sm:$0xff]   ;;  %v6807_v3 = vld [vmem:[#allocation17 + $0x160] ss:$28 sps:$4 sm:$0xff]  }
 0x809   :  { %4845 = vmatpush1.bf16.msra.mxu0 %v6735_v4  ;;  %4927 = vmatpush1.bf16.msra.mxu1 %v6738_v5  ;;  %v6811_v4 = vld [vmem:[#allocation17 + $0x168] ss:$28 sps:$4 sm:$0xff]   ;;  %v6814_v5 = vld [vmem:[#allocation17 + $0x19c] ss:$28 sps:$4 sm:$0xff]  }
 0x80a   :  { %4846 = vmatprep.subr.bf16.mxu0 %v6743_v11  ;;  %4928 = vmatprep.subr.bf16.mxu1 %v6746_v12  ;;  %v6815_v11 = vld [vmem:[#allocation17 + $0x360] ss:$28 sps:$4 sm:$0xff]   ;;  %v6812_v12 = vld [vmem:[#allocation17 + $0x198] ss:$28 sps:$4 sm:$0xff]  }
 0x80d   :  { %4847 = vmatpush1.bf16.msra.mxu0 %v6741_v8  ;;  %4929 = vmatpush1.bf16.msra.mxu1 %v6744_v13  ;;  %v6816_v8 = vld [vmem:[#allocation17 + $0x1a0] ss:$28 sps:$4 sm:$0xff]   ;;  %v6819_v13 = vld [vmem:[#allocation17 + $0x1d4] ss:$28 sps:$4 sm:$0xff]  }
 0x80e   :  { %4848 = vmatprep.subr.bf16.mxu0 %v6749_v15  ;;  %4930 = vmatprep.subr.bf16.mxu1 %v6752_v17  ;;  %v6820_v15 = vld [vmem:[#allocation17 + $0x558] ss:$28 sps:$4 sm:$0xff]   ;;  %v6817_v17 = vld [vmem:[#allocation17 + $0x1d0] ss:$28 sps:$4 sm:$0xff]  }
 0x811   :  { %4849 = vmatpush1.bf16.msra.mxu0 %v6747_v18  ;;  %4931 = vmatpush1.bf16.msra.mxu1 %v6750_v19  ;;  %v6821_v18 = vld [vmem:[#allocation17 + $0x398] ss:$28 sps:$4 sm:$0xff]   ;;  %v6824_v19 = vld [vmem:[#allocation17 + $0x20c] ss:$28 sps:$4 sm:$0xff]  }
 0x812   :  { %4850 = vmatprep.subr.bf16.mxu0 %v6755_v20  ;;  %4932 = vmatprep.subr.bf16.mxu1 %v6758_v21  ;;  %v6825_v20 = vld [vmem:[#allocation17 + $0x590] ss:$28 sps:$4 sm:$0xff]   ;;  %v6822_v21 = vld [vmem:[#allocation17 + $0x208] ss:$28 sps:$4 sm:$0xff]  }
 0x815   :  { %4851 = vmatpush1.bf16.msra.mxu0 %v6753_v22  ;;  %4933 = vmatpush1.bf16.msra.mxu1 %v6756_v23  ;;  %v6826_v22 = vld [vmem:[#allocation17 + $0x3d0] ss:$28 sps:$4 sm:$0xff]   ;;  %v6829_v23 = vld [vmem:[#allocation17 + $0x244] ss:$28 sps:$4 sm:$0xff]  }
 0x816   :  { %4852 = vmatprep.subr.bf16.mxu0 %v6761_v24  ;;  %4934 = vmatprep.subr.bf16.mxu1 %v6764_v16  ;;  %v6830_v24 = vld [vmem:[#allocation17 + $0x5c8] ss:$28 sps:$4 sm:$0xff]   ;;  %v6827_v16 = vld [vmem:[#allocation17 + $0x240] ss:$28 sps:$4 sm:$0xff]  }
 0x819   :  { %4853 = vmatpush1.bf16.msra.mxu0 %v6759_v25  ;;  %4935 = vmatpush1.bf16.msra.mxu1 %v6762_v27  ;;  %v6831_v25 = vld [vmem:[#allocation17 + $0x408] ss:$28 sps:$4 sm:$0xff]   ;;  %v6834_v27 = vld [vmem:[#allocation17 + $0x27c] ss:$28 sps:$4 sm:$0xff]  }
 0x81a   :  { %4854 = vmatprep.subr.bf16.mxu0 %v6767_v30  ;;  %4936 = vmatprep.subr.bf16.mxu1 %v6770_v32  ;;  %v6832_v30 = vld [vmem:[#allocation17 + $0x278] ss:$28 sps:$4 sm:$0xff]   ;;  %v6836_v32 = vld [vmem:[#allocation17 + $0x440] ss:$28 sps:$4 sm:$0xff]  }
 0x81d   :  { %4855 = vmatpush1.bf16.msra.mxu0 %v6765_v0  ;;  %4937 = vmatpush1.bf16.msra.mxu1 %v6768_v34  ;;  %v6839_v0 = vld [vmem:[#allocation17 + $0x2b4] ss:$28 sps:$4 sm:$0xff]  }
 0x81e   :  { %4856 = vmatprep.subr.bf16.mxu0 %v6773_v36  ;;  %4938 = vmatprep.subr.bf16.mxu1 %v6776_v37  ;;  %v6840_v34 = vld [vmem:[#allocation17 + $0x638] ss:$28 sps:$4 sm:$0xff]   ;;  %v6844_v37 = vld [vmem:[#allocation17 + $0x2ec] ss:$28 sps:$4 sm:$0xff]  }
 0x81f   :  { %v6841_v36 = vld [vmem:[#allocation17 + $0x478] ss:$28 sps:$4 sm:$0xff]  }
 0x821   :  { %4857 = vmatpush1.bf16.msra.mxu0 %v6771_v38  ;;  %4939 = vmatpush1.bf16.msra.mxu1 %v6774_v39  ;;  %v6845_v38 = vld [vmem:[#allocation17 + $0x670] ss:$28 sps:$4 sm:$0xff]   ;;  %v6842_v39 = vld [vmem:[#allocation17 + $0x2e8] ss:$28 sps:$4 sm:$0xff]  }
 0x822   :  { %4949 = vmatprep.subr.bf16.mxu0 %v6779_v10  ;;  %5883 = vmatprep.subr.bf16.mxu1 %v6780_v41  ;;  %v6849_v10 = vld [vmem:[#allocation17 + $0x324] ss:$28 sps:$4 sm:$0xff]  }
 0x823   :  { %v6850_v41 = vld [vmem:[#allocation17 + $0x6a8] ss:$28 sps:$4 sm:$0xff]  }
 0x824   :  { %4859 = vmatmul.mubr.bf16.vlgmr.msra.gmra.mrb[12].mxu0 %v7595_v43  ;;  %4941 = vmatmul.mubr.bf16.vlgmr.msra.gmra.mrb[28].mxu1 %v7595_v43 }
 0x825   :  { %4950 = vmatpush1.bf16.msra.mxu0 %v6777_v42  ;;  %4981 = vmatprep.mubr.bf16.mxu0 %v7580_v28  ;;  %v6847_v42 = vld [vmem:[#allocation17 + $0x320] ss:$28 sps:$4 sm:$0xff]  }
 0x826   :  { %5884 = vmatpush3.bf16.msra.mxu1 %v6781_v14  ;;  %5063 = vmatprep.mubr.bf16.mxu1 %v7580_v28  ;;  %v6800_v28 = vld [vmem:[#allocation17 + $0x2b8] ss:$28 sps:$4 sm:$0xff]   ;;  %v6851_v14 = vld [vmem:[#allocation17 + $0x4e8] ss:$28 sps:$4 sm:$0xff]  }
 0x827   :  { %4951 = vmatprep.subr.bf16.mxu0 %v6784_v44  ;;  %5885 = vmatprep.subr.bf16.mxu1 %v6785_v45  ;;  %v6854_v44 = vld [vmem:[#allocation17 + $0x35c] ss:$28 sps:$4 sm:$0xff]  }
 0x828   :  { %v6855_v45 = vld [vmem:[#allocation17 + $0x6e0] ss:$28 sps:$4 sm:$0xff]  }
 0x829   :  { %4952 = vmatpush1.bf16.msra.mxu0 %v6782_v46  ;;  %v6852_v46 = vld [vmem:[#allocation17 + $0x358] ss:$28 sps:$4 sm:$0xff]  }
 0x82a   :  { %5886 = vmatpush3.bf16.msra.mxu1 %v6786_v47  ;;  %4953 = vmatprep.subr.bf16.mxu0 %v6789_v48  ;;  %v6856_v47 = vld [vmem:[#allocation17 + $0x520] ss:$28 sps:$4 sm:$0xff]   ;;  %v6859_v48 = vld [vmem:[#allocation17 + $0x394] ss:$28 sps:$4 sm:$0xff]  }
 0x82b   :  { %5887 = vmatprep.subr.bf16.mxu1 %v6790_v49  ;;  %v6857_v49 = vld [vmem:[#allocation17 + $0x390] ss:$28 sps:$4 sm:$0xff]  }
 0x82d   :  { %4954 = vmatpush1.bf16.msra.mxu0 %v6787_v50  ;;  %v6862_v50 = vld [vmem:[#allocation17 + $0x3cc] ss:$28 sps:$4 sm:$0xff]  }
 0x82e   :  { %5888 = vmatpush3.bf16.msra.mxu1 %v6791_v51  ;;  %4955 = vmatprep.subr.bf16.mxu0 %v6794_v52  ;;  %v6860_v51 = vld [vmem:[#allocation17 + $0x3c8] ss:$28 sps:$4 sm:$0xff]  }
 0x82f   :  { %5889 = vmatprep.subr.bf16.mxu1 %v6795_v53  ;;  %v6865_v52 = vld [vmem:[#allocation17 + $0x404] ss:$28 sps:$4 sm:$0xff]  }
 0x830   :  { %v6863_v53 = vld [vmem:[#allocation17 + $0x400] ss:$28 sps:$4 sm:$0xff]  }
 0x831   :  { %4956 = vmatpush1.bf16.msra.mxu0 %v6792_v54  ;;  %v6868_v54 = vld [vmem:[#allocation17 + $0x43c] ss:$28 sps:$4 sm:$0xff]  }
 0x832   :  { %5890 = vmatpush3.bf16.msra.mxu1 %v6796_v55  ;;  %4957 = vmatprep.subr.bf16.mxu0 %v6799_v56  ;;  %v6866_v55 = vld [vmem:[#allocation17 + $0x438] ss:$28 sps:$4 sm:$0xff]  }
 0x833   :  { %5891 = vmatprep.subr.bf16.mxu1 %v6800_v28  ;;  %v6871_v56 = vld [vmem:[#allocation17 + $0x474] ss:$28 sps:$4 sm:$0xff]  }
 0x834   :  { %v6869_v28 = vld [vmem:[#allocation17 + $0x470] ss:$28 sps:$4 sm:$0xff]  }
 0x835   :  { %4958 = vmatpush1.bf16.msra.mxu0 %v6797_v57  ;;  %v6872_v57 = vld [vmem:[#allocation17 + $0x4a8] ss:$28 sps:$4 sm:$0xff]  }
 0x836   :  { %5892 = vmatpush3.bf16.msra.mxu1 %v6801_v59  ;;  %4959 = vmatprep.subr.bf16.mxu0 %v6804_v60  ;;  %v6877_v59 = vld [vmem:[#allocation17 + $0x4e4] ss:$28 sps:$4 sm:$0xff]   ;;  %v6880_v60 = vld [vmem:[#allocation17 + $0x51c] ss:$28 sps:$4 sm:$0xff]  }
 0x837   :  { %5893 = vmatprep.subr.bf16.mxu1 %v6805_v61  ;;  %v6878_v61 = vld [vmem:[#allocation17 + $0x518] ss:$28 sps:$4 sm:$0xff]  }
 0x839   :  { %4960 = vmatpush1.bf16.msra.mxu0 %v6802_v62  ;;  %v6883_v62 = vld [vmem:[#allocation17 + $0x554] ss:$28 sps:$4 sm:$0xff]  }
 0x83a   :  { %5894 = vmatpush3.bf16.msra.mxu1 %v6806_v63  ;;  %4961 = vmatprep.subr.bf16.mxu0 %v6809_v1  ;;  %v6881_v63 = vld [vmem:[#allocation17 + $0x550] ss:$28 sps:$4 sm:$0xff]  }
 0x83b   :  { %5895 = vmatprep.subr.bf16.mxu1 %v6810_v2  ;;  %v6886_v1 = vld [vmem:[#allocation17 + $0x58c] ss:$28 sps:$4 sm:$0xff]  }
 0x83c   :  { %v6884_v2 = vld [vmem:[#allocation17 + $0x588] ss:$28 sps:$4 sm:$0xff]  }
 0x83d   :  { %4962 = vmatpush1.bf16.msra.mxu0 %v6807_v3  ;;  %v6889_v3 = vld [vmem:[#allocation17 + $0x5c4] ss:$28 sps:$4 sm:$0xff]  }
 0x83e   :  { %5896 = vmatpush3.bf16.msra.mxu1 %v6811_v4  ;;  %4963 = vmatprep.subr.bf16.mxu0 %v6814_v5  ;;  %v6887_v4 = vld [vmem:[#allocation17 + $0x5c0] ss:$28 sps:$4 sm:$0xff]  }
 0x83f   :  { %5897 = vmatprep.subr.bf16.mxu1 %v6815_v11  ;;  %v6892_v5 = vld [vmem:[#allocation17 + $0x5fc] ss:$28 sps:$4 sm:$0xff]  }
 0x840   :  { %v6890_v11 = vld [vmem:[#allocation17 + $0x5f8] ss:$28 sps:$4 sm:$0xff]  }
 0x841   :  { %4964 = vmatpush1.bf16.msra.mxu0 %v6812_v12  ;;  %v6895_v12 = vld [vmem:[#allocation17 + $0x634] ss:$28 sps:$4 sm:$0xff]  }
 0x842   :  { %5898 = vmatpush3.bf16.msra.mxu1 %v6816_v8  ;;  %4965 = vmatprep.subr.bf16.mxu0 %v6819_v13  ;;  %v6893_v8 = vld [vmem:[#allocation17 + $0x630] ss:$28 sps:$4 sm:$0xff]  }
 0x843   :  { %5905 = vmatprep.subr.bf16.mxu1 %v6820_v15  ;;  %v6898_v13 = vld [vmem:[#allocation17 + $0x66c] ss:$28 sps:$4 sm:$0xff]  }
 0x844   :  { %v6896_v15 = vld [vmem:[#allocation17 + $0x668] ss:$28 sps:$4 sm:$0xff]  }
 0x845   :  { %5064 = vmatmul.mubr.bf16.vlgmr.msra.gmra.mrb[32].mxu1 %v7582_v31  ;;  %4966 = vmatpush1.bf16.msra.mxu0 %v6817_v17  ;;  %v6901_v17 = vld [vmem:[#allocation17 + $0x6a4] ss:$28 sps:$4 sm:$0xff]  }
 0x846   :  { %5906 = vmatpush3.bf16.msra.mxu1 %v6821_v18  ;;  %5103 = vmatprep.mubr.bf16.mxu1 %v7586_v33  ;;  %v6899_v18 = vld [vmem:[#allocation17 + $0x6a0] ss:$28 sps:$4 sm:$0xff]  }
 0x847   :  { %4967 = vmatprep.subr.bf16.mxu0 %v6824_v19  ;;  %5907 = vmatprep.subr.bf16.mxu1 %v6825_v20  ;;  %v6904_v19 = vld [vmem:[#allocation17 + $0x6dc] ss:$28 sps:$4 sm:$0xff]  }
 0x848   :  { %v6902_v20 = vld [vmem:[#allocation17 + $0x6d8] ss:$28 sps:$4 sm:$0xff]  }
 0x849   :  { %4968 = vmatpush1.bf16.msra.mxu0 %v6822_v21  ;;  %v7610_v21 = vld [vmem:[%s7667_s17] sm:$0xff]  ;;  %s7237_s17 = smov [#allocation20]  }
 0x84a   :  { %5908 = vmatpush3.bf16.msra.mxu1 %v6826_v22  ;;  %4969 = vmatprep.subr.bf16.mxu0 %v6829_v23  ;;  %v3601_v22 = vrot.slane %v7610_v21, %v7518_v7  ;;  %v3609_v23 = vrot.slane %v7610_v21, %v7540_v58  ;;  %s5204_s23 = sshll.u32 %s7237_s17, 4  ;;  %s5205_s23 = int_to_ptr.vmem [resolvable:$true] %s5204_s23 }
 0x84b   :  { %5909 = vmatprep.subr.bf16.mxu1 %v6830_v24  ;;  %v3605_v24 = vrot.slane %v7610_v21, %v7526_v9  ;;  %s7156_s29 = scalar_lea.vmem %s5205_s23, 256  ;;  %p7161_p11 = scmp.lt.s32.totalorder %s5205_s23, %s5205_s23 }
 0x84c   :  { %p7157_p10 = scmp.ne.s32.totalorder %s5205_s23, %s7156_s29  ;;  %p7162_p12 = scmp.lt.s32.totalorder %s7156_s29, %s7156_s29 }
 0x84d   :  { %4970 = vmatpush1.bf16.msra.mxu0 %v6827_v16  ;;  %v3613_v16 = vrot.slane %v7610_v21, %v7535_v26 }
 0x84e   :  { %5910 = vmatpush3.bf16.msra.mxu1 %v6831_v25  ;;  %4971 = vmatprep.subr.bf16.mxu0 %v6834_v27  ;;  %p7163_p13 = por %p7162_p12, %p7161_p11 }
 0x84f   :  { %5911 = vmatprep.subr.bf16.mxu1 %v6835_v29 }
 0x850   :  { %p7164_p0 = pnand %p7163_p13, %p7157_p10 }
 0x851   :  { %4972 = vmatpush1.bf16.msra.mxu0 %v6832_v30 }
 0x852   :  { %5912 = vmatpush3.bf16.msra.mxu1 %v6836_v32  ;;  %4973 = vmatprep.subr.bf16.mxu0 %v6839_v0 }
 0x853   :  { %5913 = vmatprep.subr.bf16.mxu1 %v6840_v34 }
 0x855   :  { %4974 = vmatpush1.bf16.msra.mxu0 %v6837_v35 }
 0x856   :  { %5914 = vmatpush3.bf16.msra.mxu1 %v6841_v36  ;;  %4975 = vmatprep.subr.bf16.mxu0 %v6844_v37 }
 0x857   :  { %5915 = vmatprep.subr.bf16.mxu1 %v6845_v38 }
 0x859   :  { %4976 = vmatpush1.bf16.msra.mxu0 %v6842_v39 }
 0x85a   :  { %5916 = vmatpush3.bf16.msra.mxu1 %v6846_v40  ;;  %4977 = vmatprep.subr.bf16.mxu0 %v6849_v10 }
 0x85b   :  { %5917 = vmatprep.subr.bf16.mxu1 %v6850_v41 }
 0x85d   :  { %4978 = vmatpush1.bf16.msra.mxu0 %v6847_v42 }
 0x85e   :  { %5918 = vmatpush3.bf16.msra.mxu1 %v6851_v14  ;;  %4979 = vmatprep.subr.bf16.mxu0 %v6854_v44 }
 0x85f   :  { %5919 = vmatprep.subr.bf16.mxu1 %v6855_v45 }
 0x861   :  { %4980 = vmatpush1.bf16.msra.mxu0 %v6852_v46 }
 0x862   :  { %5920 = vmatpush3.bf16.msra.mxu1 %v6856_v47  ;;  %4990 = vmatprep.subr.bf16.mxu0 %v6859_v48 }
 0x864   :  { %4982 = vmatmul.mubr.bf16.vlgmr.msra.gmra.mrb[16].mxu0 %v7582_v31  ;;  %v6874_v31 = vld [vmem:[#allocation17 + $0x4ac] ss:$28 sps:$4 sm:$0xff]  }
 0x865   :  { %5104 = vmatmul.mubr.bf16.vlgmr.msra.gmra.mrb[36].mxu1 %v7595_v43  ;;  %4991 = vmatpush1.bf16.msra.mxu0 %v6857_v49 }
 0x866   :  { %5022 = vmatprep.mubr.bf16.mxu0 %v7586_v33  ;;  %4992 = vmatprep.subr.bf16.mxu0 %v6862_v50  ;;  %v6875_v33 = vld [vmem:[#allocation17 + $0x4e0] ss:$28 sps:$4 sm:$0xff]  }
 0x869   :  { %4993 = vmatpush1.bf16.msra.mxu0 %v6860_v51 }
 0x86a   :  { %4994 = vmatprep.subr.bf16.mxu0 %v6865_v52 }
 0x86d   :  { %4995 = vmatpush1.bf16.msra.mxu0 %v6863_v53 }
 0x86e   :  { %4996 = vmatprep.subr.bf16.mxu0 %v6868_v54 }
 0x871   :  { %4997 = vmatpush1.bf16.msra.mxu0 %v6866_v55 }
 0x872   :  { %4998 = vmatprep.subr.bf16.mxu0 %v6871_v56 }
 0x875   :  { %4999 = vmatpush1.bf16.msra.mxu0 %v6869_v28 }
 0x876   :  { %5000 = vmatprep.subr.bf16.mxu0 %v6874_v31 }
 0x879   :  { %5001 = vmatpush1.bf16.msra.mxu0 %v6872_v57 }
 0x87a   :  { %5002 = vmatprep.subr.bf16.mxu0 %v6877_v59 }
 0x87d   :  { %5003 = vmatpush1.bf16.msra.mxu0 %v6875_v33 }
 0x87e   :  { %5004 = vmatprep.subr.bf16.mxu0 %v6880_v60 }
 0x881   :  { %5005 = vmatpush1.bf16.msra.mxu0 %v6878_v61 }
 0x882   :  { %5006 = vmatprep.subr.bf16.mxu0 %v6883_v62 }
 0x885   :  { %5007 = vmatpush1.bf16.msra.mxu0 %v6881_v63 }
 0x886   :  { %5008 = vmatprep.subr.bf16.mxu0 %v6886_v1 }
 0x889   :  { %5009 = vmatpush1.bf16.msra.mxu0 %v6884_v2 }
 0x88a   :  { %5010 = vmatprep.subr.bf16.mxu0 %v6889_v3 }
 0x88d   :  { %5011 = vmatpush1.bf16.msra.mxu0 %v6887_v4 }
 0x88e   :  { %5012 = vmatprep.subr.bf16.mxu0 %v6892_v5 }
 0x891   :  { %5013 = vmatpush1.bf16.msra.mxu0 %v6890_v11 }
 0x892   :  { %5014 = vmatprep.subr.bf16.mxu0 %v6895_v12 }
 0x895   :  { %5015 = vmatpush1.bf16.msra.mxu0 %v6893_v8 }
 0x896   :  { %5016 = vmatprep.subr.bf16.mxu0 %v6898_v13 }
 0x899   :  { %5017 = vmatpush1.bf16.msra.mxu0 %v6896_v15 }
 0x89a   :  { %5018 = vmatprep.subr.bf16.mxu0 %v6901_v17 }
 0x89d   :  { %5019 = vmatpush1.bf16.msra.mxu0 %v6899_v18 }
 0x89e   :  { %5020 = vmatprep.subr.bf16.mxu0 %v6904_v19 }
 0x8a1   :  { %5021 = vmatpush1.bf16.msra.mxu0 %v6902_v20 }
 0x8a4   :  { %5023 = vmatmul.mubr.bf16.vlgmr.msra.gmra.mrb[16].mxu0 %v7595_v43 }
 0x8f7   :  { %v4860_v25 = vpop.f32.mrb[12].mxu0  ;;  %v4942_v27 = vpop.f32.mrb[28].mxu1 }
 0x8f8   :  { %v5955_v43 = vadd.f32 %v4860_v25, %v3601_v22  ;;  %v5957_v29 = vadd.f32 %v4942_v27, %v3609_v23  ;;  %v4862_v30 = vpop.f32.mrb[13].mxu0  ;;  %v4944_v32 = vpop.f32.mrb[29].mxu1 }
 0x8f9   :  { %v5956_v0 = vadd.f32 %v4862_v30, %v3605_v24  ;;  %v5958_v34 = vadd.f32 %v4944_v32, %v3613_v16  ;;  %v4864_v35 = vpop.f32.mrb[14].mxu0  ;;  %v4946_v36 = vpop.f32.mrb[30].mxu1 }
 0x8fa   :  { %v5837_v7 = vmul.f32 -1.442695, %v5955_v43  ;;  %v5839_v37 = vmul.f32 -1.442695, %v5957_v29  ;;  %v4865_v38 = vpop.f32.mrb[15].mxu0  ;;  %v4947_v58 = vpop.f32.mrb[31].mxu1 }
 0x8fb   :  { %v5838_v39 = vmul.f32 -1.442695, %v5956_v0  ;;  %v5840_v40 = vmul.f32 -1.442695, %v5958_v34 }
 0x8fc   :  { %6907 = vpow2.f32 %v5837_v7 }
 0x8fd   :  { %6909 = vpow2.f32 %v5839_v37 }
 0x8fe   :  { %6911 = vpow2.f32 %v5838_v39 }
 0x8ff   :  { %6913 = vpow2.f32 %v5840_v40 }
 0x906   :  { %v6908_v9 = vpop.eup %6907 }
 0x907   :  { %v6910_v26 = vpop.eup %6909  ;;  %v5132_v10 = vadd.f32 1.0, %v6908_v9 }
 0x908   :  { %v6912_v41 = vpop.eup %6911  ;;  %v5134_v42 = vadd.f32 1.0, %v6910_v26 }
 0x909   :  { %v6914_v14 = vpop.eup %6913  ;;  %6915 = vrcp.f32 %v5132_v10  ;;  %v5133_v44 = vadd.f32 1.0, %v6912_v41 }
 0x90a   :  { %6917 = vrcp.f32 %v5134_v42  ;;  %v5135_v45 = vadd.f32 1.0, %v6914_v14 }
 0x90b   :  { %6919 = vrcp.f32 %v5133_v44 }
 0x90c   :  { %6921 = vrcp.f32 %v5135_v45 }
 0x913   :  { %v6916_v46 = vpop.eup %6915 }
 0x914   :  { %v6918_v47 = vpop.eup %6917 }
 0x915   :  { %v6920_v48 = vpop.eup %6919 }
 0x916   :  { %v6922_v49 = vpop.eup %6921  ;;  %v5848_v50 = vpack.c.bf16 %v6920_v48, %v6916_v46 }
 0x917   :  { %v5849_v51 = vpack.c.bf16 %v6922_v49, %v6918_v47 }
 0x918   :  { %v5899_v52 = vpop.f32.mrb[32].mxu1  ;;  %5182 = vst [vmem:[#allocation19] sm:$0xff] %v5848_v50 }
 0x919   :  { %v5900_v53 = vpop.f32.mrb[33].mxu1  ;;  %5183 = vst [vmem:[#allocation19 + $0x8] sm:$0xff] %v5849_v51 }
 0x91a   :  { %v5901_v54 = vadd.f32 %v5900_v53, %v5899_v52  ;;  %v5902_v55 = vpop.f32.mrb[34].mxu1 }
 0x91b   :  { %7167 = shalt.err (!%p7164_p0)
}
 0x91c   :  { %s7168_s24 = scalar_lea.hbm %s7669_s19, 256 }
 0x91d   :  { %p7169_p1 = scmp.ne.s32.totalorder %s7669_s19, %s7168_s24  ;;  %p7172_p2 = scmp.lt.u32.totalorder %s7168_s24, %s7669_s19 }
 0x91f   :  { %p7174_p3 = pnand %p7172_p2, %p7169_p1 }
 0x921   :  { %7177 = shalt.err (!%p7174_p3)
}
 0x922   :  { %5207 = dma.vmem_to_hbm [thread:$0]  %s5205_s23, 256, %s7669_s19, [#allocation21]   ;;  %v5903_v56 = vpop.f32.mrb[35].mxu1  ;;  %v3624_v28 = vsub.s32 6, %v7515_v6  ;;  %v3616_v11 = vsub.s32 4, %v7515_v6  ;;  %v3620_v12 = vsub.s32 5, %v7515_v6 }
 0x923   :  { %s7238_s19 = smov [#allocation19]  }
 0x924   :  { %v3625_v31 = vrot.slane %v7610_v21, %v3624_v28  ;;  %v3617_v8 = vrot.slane %v7610_v21, %v3616_v11  ;;  %v3621_v13 = vrot.slane %v7610_v21, %v3620_v12  ;;  %s5194_s22 = sshll.u32 %s7238_s19, 4  ;;  %s5195_s22 = int_to_ptr.vmem [resolvable:$true] %s5194_s22 }
 0x925   :  { %s7178_s16 = scalar_lea.vmem %s5195_s22, 448  ;;  %p7183_p5 = scmp.lt.s32.totalorder %s5195_s22, %s5195_s22 }
 0x926   :  { %v5066_v33 = vadd.f32 %v5901_v54, %v3625_v31  ;;  %p7179_p4 = scmp.ne.s32.totalorder %s5195_s22, %s7178_s16  ;;  %p7184_p6 = scmp.lt.s32.totalorder %s7178_s16, %s7178_s16 }
 0x928   :  { %p7185_p7 = por %p7184_p6, %p7183_p5 }
 0x92a   :  { %p7186_p8 = pnand %p7185_p7, %p7179_p4 }
 0x938   :  { %v5921_v57 = vpop.f32.mrb[36].mxu1 }
 0x939   :  { %v5922_v59 = vpop.f32.mrb[37].mxu1 }
 0x93a   :  { %v5923_v60 = vadd.f32 %v5922_v59, %v5921_v57  ;;  %v5924_v61 = vpop.f32.mrb[38].mxu1 }
 0x93b   :  { %v5925_v62 = vpop.f32.mrb[39].mxu1 }
 0x93c   :  { %v5106_v63 = vadd.f32 %v5923_v60, %v5066_v33 }
 0x93e   :  { %v5843_v1 = vmul.f32 -1.442695, %v5106_v63 }
 0x940   :  { %6923 = vpow2.f32 %v5843_v1 }
 0x94a   :  { %v6924_v2 = vpop.eup %6923 }
 0x94b   :  { %v5138_v3 = vadd.f32 1.0, %v6924_v2 }
 0x94d   :  { %6925 = vrcp.f32 %v5138_v3 }
 0x957   :  { %v6926_v4 = vpop.eup %6925 }
 0x958   :  { %v5851_v5 = vpack.c.bf16 %v6926_v4, %v6926_v4 }
 0x95a   :  { %5185 = vst [vmem:[#allocation19 + $0x18] sm:$0xf] %v5851_v5 }
 0x977   :  { %v5024_v15 = vpop.f32.mrb[16].mxu0 }
 0x978   :  { %v5959_v17 = vadd.f32 %v5024_v15, %v3617_v8  ;;  %v5026_v18 = vpop.f32.mrb[17].mxu0 }
 0x979   :  { %v5960_v19 = vadd.f32 %v5026_v18, %v3621_v13  ;;  %v5028_v20 = vpop.f32.mrb[18].mxu0 }
 0x97a   :  { %v5841_v22 = vmul.f32 -1.442695, %v5959_v17  ;;  %v5029_v23 = vpop.f32.mrb[19].mxu0 }
 0x97b   :  { %v5842_v24 = vmul.f32 -1.442695, %v5960_v19 }
 0x97c   :  { %6927 = vpow2.f32 %v5841_v22 }
 0x97d   :  { %6929 = vpow2.f32 %v5842_v24 }
 0x986   :  { %v6928_v16 = vpop.eup %6927 }
 0x987   :  { %v6930_v25 = vpop.eup %6929  ;;  %v5136_v27 = vadd.f32 1.0, %v6928_v16 }
 0x988   :  { %v5137_v43 = vadd.f32 1.0, %v6930_v25 }
 0x989   :  { %6931 = vrcp.f32 %v5136_v27 }
 0x98a   :  { %6933 = vrcp.f32 %v5137_v43 }
 0x993   :  { %v6932_v6 = vpop.eup %6931 }
 0x994   :  { %v6934_v21 = vpop.eup %6933 }
 0x995   :  { %v5850_v29 = vpack.c.bf16 %v6934_v21, %v6932_v6 }
 0x997   :  { %5184 = vst [vmem:[#allocation19 + $0x10] sm:$0xff] %v5850_v29 }
 0x998   :  { %7189 = shalt.err (!%p7186_p8)
}
 0x999   :  { %s7683_s12 = sld [smem:[#allocation34_spill]] }
 0x99f   :  { %s7190_s30 = scalar_lea.hbm %s7683_s12, 448 }
 0x9a0   :  { %p7191_p9 = scmp.ne.s32.totalorder %s7683_s12, %s7190_s30  ;;  %p7194_p10 = scmp.lt.u32.totalorder %s7190_s30, %s7683_s12 }
 0x9a2   :  { %p7196_p11 = pnand %p7194_p10, %p7191_p9 }
 0x9a4   :  { %7199 = shalt.err (!%p7196_p11)
}
 0x9a5   :  { %5197 = dma.vmem_to_hbm [thread:$0]  %s5195_s22, 448, %s7683_s12, [#allocation4]  }
 0x9a6   :  { %7212 = dma.done.wait [#allocation4], 448  }
 0x9a7   :  { %7213 = vsyncadd [#allocation4], 4294966848 }
 0x9a8   :  { %7214 = dma.done.wait [#allocation21], 256  }
 0x9a9   :  { %7215 = vsyncadd [#allocation21], 4294967040 }
 0x9aa   :  { %5214 = vsyncpa [#allocation3], 1 }
 0x9ab   :  { %5215 = vsyncpa [#allocation6], 1 }
 0x9ac   :  { %5216 = vsyncpa [#allocation9], 1 }
 0x9ad   :  { %5217 = vsyncpa [#allocation12], 1 }
 0x9ae   :  { %5218 = vsyncpa [#allocation15], 1 }
 0x9af   :  { %5219 = vsyncpa [#allocation18], 1 }
 0x9b0   :  { %5220 = vsyncpa [#allocation4], 1 }
 0x9b1   :  { %5221 = vsyncpa [#allocation21], 1 }

</bundles_post_ra>
